<compile_context>
chip_gen: v5e
topology: v5e:2x2
jax: 0.10.0
libtpu: 0.0.40
codegen_flags: <defaults>
</compile_context>

<pallas_src>
from functools import partial

import jax
import jax.numpy as jnp
from jax.experimental import pallas as pl
from jax.experimental.pallas import tpu as pltpu


# ----------------------------------------------------------------------------
# Kernel
# ----------------------------------------------------------------------------
def restnn_kernel(x_ref,                       # (in_dim, TB) activation tile (compute dtype)
                  w1, w2, w3, w4,              # linear_stack weights (out, in), BN folded
                  rw1, rw2, rw3,               # res_stack weights (out, in), BN folded
                  fw,                          # fc weight (out_dim, in_dim)
                  b_ref,                       # packed biases (max_width, 8) f32, col j = bias j
                  alphas_ref,                  # (6,) PReLU slopes in SMEM
                  out_ref):                    # (out_dim, TB) lane-dense output tile
    cdt = w1.dtype                             # matmul operand (compute) dtype
    x = x_ref[...]                             # already compute dtype

    def dense(v, w_ref, bcol):
        # v must already be in the compute dtype; f32 accumulate on the MXU.
        n = w_ref.shape[0]
        acc = jnp.dot(w_ref[...], v, preferred_element_type=jnp.float32)
        return acc + b_ref[0:n, bcol:bcol + 1]                  # (n, 1) broadcast over lanes

    def prelu(v, a):
        # v: f32 dense output, a: scalar slope from SMEM.  Emit compute dtype
        # directly so the next matmul needs no extra cast / VMEM round-trip.
        return jnp.where(v >= 0.0, v, a * v).astype(cdt)

    # ---- linear_stack: Lin+BN -> PReLU (x3) -> Lin ----
    h = prelu(dense(x, w1, 0), alphas_ref[0])                   # (2h, TB)
    h = prelu(dense(h, w2, 1), alphas_ref[1])                   # (4h, TB)
    h = prelu(dense(h, w3, 2), alphas_ref[2])                   # (2h, TB)
    x_lin = dense(h, w4, 3)                                     # (in, TB) f32  == x_

    # ---- res_stack applied to (x - x_) ----
    r = (x.astype(jnp.float32) - x_lin).astype(cdt)
    r = prelu(dense(r, rw1, 4), alphas_ref[3])                  # (h,  TB)
    r = prelu(dense(r, rw2, 5), alphas_ref[4])                  # (2h, TB)
    r = prelu(dense(r, rw3, 6), alphas_ref[5])                  # (in, TB)

    # ---- fc_layer on (x_ + res): lane-dense (out_dim, TB) row slab ----
    fc_in = (x_lin + r.astype(jnp.float32)).astype(cdt)
    out_ref[...] = dense(fc_in, fw, 7).astype(out_ref.dtype)


# ----------------------------------------------------------------------------
# Parameter construction (PyTorch-style init, eval-mode BN folded into Linear).
# Weights kept in PyTorch (out_features, in_features) layout.
# ----------------------------------------------------------------------------
def _linear_init(key, fan_in, fan_out):
    kw, kb = jax.random.split(key)
    bound = fan_in ** -0.5
    w = jax.random.uniform(kw, (fan_out, fan_in), jnp.float32, -bound, bound)
    b = jax.random.uniform(kb, (fan_out,), jnp.float32, -bound, bound)
    return w, b


def _bn_fold(key, w, b, eps=1e-5):
    """Fold eval-mode BatchNorm1d into the preceding Linear (w: (out, in))."""
    n = w.shape[0]
    kg, kb, km, kv = jax.random.split(key, 4)
    gamma = jax.random.uniform(kg, (n,), jnp.float32, 0.5, 1.5)
    beta = jax.random.uniform(kb, (n,), jnp.float32, -0.5, 0.5)
    mean = jax.random.uniform(km, (n,), jnp.float32, -0.5, 0.5)
    var = jax.random.uniform(kv, (n,), jnp.float32, 0.5, 1.5)
    scale = gamma / jnp.sqrt(var + eps)
    return w * scale[:, None], b * scale + (beta - mean * scale)


def make_params(key, inp=26, out=1, hidden=64):
    keys = jax.random.split(key, 16)
    ws, bs = [], []

    def add(w, b):
        ws.append(w)
        bs.append(b)

    # linear_stack: inp -> 2h -> 4h -> 2h -> inp (BN after the first three)
    w, b = _linear_init(keys[0], inp, hidden * 2);         add(*_bn_fold(keys[1], w, b))
    w, b = _linear_init(keys[2], hidden * 2, hidden * 4);  add(*_bn_fold(keys[3], w, b))
    w, b = _linear_init(keys[4], hidden * 4, hidden * 2);  add(*_bn_fold(keys[5], w, b))
    add(*_linear_init(keys[6], hidden * 2, inp))

    # res_stack: inp -> h -> 2h -> inp (BN after the first two, PReLU after all three)
    w, b = _linear_init(keys[7], inp, hidden);             add(*_bn_fold(keys[8], w, b))
    w, b = _linear_init(keys[9], hidden, hidden * 2);      add(*_bn_fold(keys[10], w, b))
    add(*_linear_init(keys[11], hidden * 2, inp))

    # fc_layer: inp -> out
    add(*_linear_init(keys[12], inp, out))

    # 6 PReLU units, PyTorch default single slope 0.25 each
    alphas = jnp.full((6,), 0.25, dtype=jnp.float32)
    return ws, bs, alphas


# ----------------------------------------------------------------------------
# One-time parameter prep (hoisted out of the per-call path).
# ----------------------------------------------------------------------------
def prepare_params(weights, biases, compute_dtype=jnp.bfloat16):
    """Cast weights to the matmul operand dtype and pack the 8 biases into one
    padded (max_width, 8) f32 operand (column j = bias j).  Call once."""
    ws = [w.astype(compute_dtype) for w in weights]
    bmax = max(int(b.shape[0]) for b in biases)
    bpack = jnp.zeros((bmax, len(biases)), jnp.float32)
    for j, b in enumerate(biases):
        bpack = bpack.at[: b.shape[0], j].set(b)
    return ws, jax.device_put(bpack)


def _num_tensorcores():
    # v7x has 2 TensorCores per chip; v5e/v6e have 1.
    try:
        kind = jax.devices()[0].device_kind.lower()
    except Exception:
        return 1
    return 2 if ("v7" in kind or "7x" in kind) else 1


def pick_batch_tile(batch, max_tb=4096):
    """As few grid steps as possible, but >=2 tiles on v7x so both TCs work,
    and capped so intermediates stay far below the v5e 16 MiB scoped VMEM."""
    nc = _num_tensorcores()
    tb = -(-batch // nc)               # split batch across TensorCores
    tb = -(-tb // 128) * 128           # lane-align
    return max(128, min(tb, max_tb))


# ----------------------------------------------------------------------------
# Forward (jitted so pad / cast / transpose of x fuse into single ops).
# ----------------------------------------------------------------------------
@partial(jax.jit, static_argnames=("tb",))
def restnn_forward(x, ws, bpack, alphas, *, tb):
    """x: (batch, in_dim) f32 -> (batch, out_dim) f32."""
    batch, in_dim = x.shape
    out_dim = ws[-1].shape[0]
    compute_dtype = ws[0].dtype
    assert tb % 128 == 0, "batch tile must be a multiple of 128"

    num_tiles = -(-batch // tb)
    pb = num_tiles * tb

    # Pad batch to a whole number of tiles and go feature-major (in_dim, pb).
    xp = x
    if pb != batch:
        xp = jnp.pad(xp, ((0, pb - batch), (0, 0)))
    xt = xp.astype(compute_dtype).T                                 # (in_dim, pb)

    # Parameters get constant index_maps => VMEM-resident across grid steps.
    w_specs = [pl.BlockSpec(w.shape, lambda i: (0, 0)) for w in ws]

    out = pl.pallas_call(
        restnn_kernel,
        out_shape=jax.ShapeDtypeStruct((out_dim, pb), jnp.float32),
        grid=(num_tiles,),
        in_specs=(
            [pl.BlockSpec((in_dim, tb), lambda i: (0, i))]          # streamed x tile
            + w_specs                                               # resident weights
            + [pl.BlockSpec(bpack.shape, lambda i: (0, 0)),         # resident packed biases
               pl.BlockSpec(memory_space=pltpu.MemorySpace.SMEM)]   # PReLU scalars
        ),
        out_specs=pl.BlockSpec((out_dim, tb), lambda i: (0, i)),    # lane-dense out slab
        compiler_params=pltpu.CompilerParams(
            dimension_semantics=("parallel",)),                     # v7x: 2 TCs share the grid
    )(xt, *ws, bpack, alphas)

    # Un-transpose the tiny output back to the PyTorch (batch, out_dim) layout.
    return out[:, :batch].T


# ----------------------------------------------------------------------------
# Pure-JAX f32 reference (same math, for a loose correctness check).
# ----------------------------------------------------------------------------
def restnn_ref(x, weights, biases, slope=0.25):
    def dense(v, w, b):
        return v @ w.T + b

    def prelu(v):
        return jnp.where(v >= 0, v, slope * v)

    h = prelu(dense(x, weights[0], biases[0]))
    h = prelu(dense(h, weights[1], biases[1]))
    h = prelu(dense(h, weights[2], biases[2]))
    x_lin = dense(h, weights[3], biases[3])
    r = x - x_lin
    r = prelu(dense(r, weights[4], biases[4]))
    r = prelu(dense(r, weights[5], biases[5]))
    r = prelu(dense(r, weights[6], biases[6]))
    return dense(x_lin + r, weights[7], biases[7])


if __name__ == "__main__":
    key = jax.random.PRNGKey(0)
    kp, kx = jax.random.split(key)

    INPUT, OUTPUT, HIDDEN = 26, 1, 64          # module defaults
    BATCH = 256                                # small example batch

    weights, biases, alphas = make_params(kp, INPUT, OUTPUT, HIDDEN)
    x = jax.random.normal(kx, (BATCH, INPUT), dtype=jnp.float32)

    # bf16 MXU operands on every generation (f32 accumulate kept via
    # preferred_element_type).  Prep parameters once, outside the call path.
    compute_dtype = jnp.bfloat16
    ws, bpack = prepare_params(weights, biases, compute_dtype)
    tb = pick_batch_tile(BATCH)                # 1 tile (2 on v7x) at this size

    y = restnn_forward(x, ws, bpack, alphas, tb=tb)
    jax.block_until_ready(y)
    assert y.shape == (BATCH, OUTPUT)

    # Loose numerical check vs. an f32 reference using the same bf16-quantized
    # weights/input (remaining drift is only from in-kernel bf16 activations).
    ws_f32 = [w.astype(jnp.float32) for w in ws]
    xq = x.astype(compute_dtype).astype(jnp.float32)
    ref = restnn_ref(xq, ws_f32, biases)
    err = float(jnp.max(jnp.abs(y - ref)))
    scale = float(jnp.maximum(1.0, jnp.max(jnp.abs(ref))))
    assert err <= 0.05 * scale, f"max abs err {err} vs scale {scale}"

    print("KERNEL_OK")
</pallas_src>

<mosaic_0001>
module attributes {stable_mosaic.version = 11 : i64} {
  func.func @restnn_kernel(%arg0: i32, %arg1: memref<26x256xbf16, #tpu.memory_space<vmem>>, %arg2: memref<128x26xbf16, #tpu.memory_space<vmem>>, %arg3: memref<256x128xbf16, #tpu.memory_space<vmem>>, %arg4: memref<128x256xbf16, #tpu.memory_space<vmem>>, %arg5: memref<26x128xbf16, #tpu.memory_space<vmem>>, %arg6: memref<64x26xbf16, #tpu.memory_space<vmem>>, %arg7: memref<128x64xbf16, #tpu.memory_space<vmem>>, %arg8: memref<26x128xbf16, #tpu.memory_space<vmem>>, %arg9: memref<1x26xbf16, #tpu.memory_space<vmem>>, %arg10: memref<256x8xf32, #tpu.memory_space<vmem>>, %arg11: memref<6xf32, #tpu.memory_space<smem>>, %arg12: memref<1x256xf32, #tpu.memory_space<vmem>>) attributes {dimension_semantics = [#tpu.dimension_semantics<parallel>], iteration_bounds = array<i64: 1>, scalar_prefetch = 0 : i64, scratch_operands = 0 : i64, tpu.core_type = #tpu.core_type<tc>, window_params = [{transform_indices = @transform_0, window_bounds = array<i64: 26, 256>}, {pipeline_mode = #tpu.pipeline_mode<synchronous>, transform_indices = @transform_1, window_bounds = array<i64: 128, 26>}, {pipeline_mode = #tpu.pipeline_mode<synchronous>, transform_indices = @transform_2, window_bounds = array<i64: 256, 128>}, {pipeline_mode = #tpu.pipeline_mode<synchronous>, transform_indices = @transform_3, window_bounds = array<i64: 128, 256>}, {pipeline_mode = #tpu.pipeline_mode<synchronous>, transform_indices = @transform_4, window_bounds = array<i64: 26, 128>}, {pipeline_mode = #tpu.pipeline_mode<synchronous>, transform_indices = @transform_5, window_bounds = array<i64: 64, 26>}, {pipeline_mode = #tpu.pipeline_mode<synchronous>, transform_indices = @transform_6, window_bounds = array<i64: 128, 64>}, {pipeline_mode = #tpu.pipeline_mode<synchronous>, transform_indices = @transform_7, window_bounds = array<i64: 26, 128>}, {pipeline_mode = #tpu.pipeline_mode<synchronous>, transform_indices = @transform_8, window_bounds = array<i64: 1, 26>}, {pipeline_mode = #tpu.pipeline_mode<synchronous>, transform_indices = @transform_9, window_bounds = array<i64: 256, 8>}, {transform_indices = @transform_10, window_bounds = array<i64: 6>}, {transform_indices = @transform_11, window_bounds = array<i64: 1, 256>}]} {
    %c0 = arith.constant 0 : index
    %c0_0 = arith.constant 0 : index
    %0 = vector.load %arg1[%c0, %c0_0] : memref<26x256xbf16, #tpu.memory_space<vmem>>, vector<26x256xbf16>
    %c0_1 = arith.constant 0 : index
    %c0_2 = arith.constant 0 : index
    %1 = vector.load %arg2[%c0_1, %c0_2] : memref<128x26xbf16, #tpu.memory_space<vmem>>, vector<128x26xbf16>
    %cst = arith.constant dense<0.000000e+00> : vector<128x256xf32>
    %2 = tpu.matmul %1, %0, %cst {dimension_numbers = #tpu.dot_dimension_numbers<[1], [0], [0], [1], [0, 0, 1, 1], [], []>} : vector<128x26xbf16>, vector<26x256xbf16>, vector<128x256xf32> -> vector<128x256xf32>
    %c0_3 = arith.constant 0 : index
    %c0_4 = arith.constant 0 : index
    %3 = vector.load %arg10[%c0_3, %c0_4] : memref<256x8xf32, #tpu.memory_space<vmem>>, vector<128x1xf32>
    %4 = vector.broadcast %3 : vector<128x1xf32> to vector<128x256xf32>
    %5 = arith.addf %2, %4 : vector<128x256xf32>
    %c0_5 = arith.constant 0 : index
    %6 = memref.load %arg11[%c0_5] : memref<6xf32, #tpu.memory_space<smem>>
    %cst_6 = arith.constant 0.000000e+00 : f32
    %7 = vector.broadcast %cst_6 : f32 to vector<128x256xf32>
    %8 = arith.cmpf oge, %5, %7 : vector<128x256xf32>
    %9 = vector.broadcast %6 : f32 to vector<128x256xf32>
    %10 = arith.mulf %9, %5 : vector<128x256xf32>
    %11 = arith.select %8, %5, %10 : vector<128x256xi1>, vector<128x256xf32>
    %12 = arith.truncf %11 : vector<128x256xf32> to vector<128x256xbf16>
    %c0_7 = arith.constant 0 : index
    %c0_8 = arith.constant 0 : index
    %13 = vector.load %arg3[%c0_7, %c0_8] : memref<256x128xbf16, #tpu.memory_space<vmem>>, vector<256x128xbf16>
    %cst_9 = arith.constant dense<0.000000e+00> : vector<256x256xf32>
    %14 = tpu.matmul %13, %12, %cst_9 {dimension_numbers = #tpu.dot_dimension_numbers<[1], [0], [0], [1], [0, 0, 1, 1], [], []>} : vector<256x128xbf16>, vector<128x256xbf16>, vector<256x256xf32> -> vector<256x256xf32>
    %c0_10 = arith.constant 0 : index
    %c1 = arith.constant 1 : index
    %15 = vector.load %arg10[%c0_10, %c1] : memref<256x8xf32, #tpu.memory_space<vmem>>, vector<256x1xf32>
    %16 = vector.broadcast %15 : vector<256x1xf32> to vector<256x256xf32>
    %17 = arith.addf %14, %16 : vector<256x256xf32>
    %c1_11 = arith.constant 1 : index
    %18 = memref.load %arg11[%c1_11] : memref<6xf32, #tpu.memory_space<smem>>
    %cst_12 = arith.constant 0.000000e+00 : f32
    %19 = vector.broadcast %cst_12 : f32 to vector<256x256xf32>
    %20 = arith.cmpf oge, %17, %19 : vector<256x256xf32>
    %21 = vector.broadcast %18 : f32 to vector<256x256xf32>
    %22 = arith.mulf %21, %17 : vector<256x256xf32>
    %23 = arith.select %20, %17, %22 : vector<256x256xi1>, vector<256x256xf32>
    %24 = arith.truncf %23 : vector<256x256xf32> to vector<256x256xbf16>
    %c0_13 = arith.constant 0 : index
    %c0_14 = arith.constant 0 : index
    %25 = vector.load %arg4[%c0_13, %c0_14] : memref<128x256xbf16, #tpu.memory_space<vmem>>, vector<128x256xbf16>
    %cst_15 = arith.constant dense<0.000000e+00> : vector<128x256xf32>
    %26 = tpu.matmul %25, %24, %cst_15 {dimension_numbers = #tpu.dot_dimension_numbers<[1], [0], [0], [1], [0, 0, 1, 1], [], []>} : vector<128x256xbf16>, vector<256x256xbf16>, vector<128x256xf32> -> vector<128x256xf32>
    %c0_16 = arith.constant 0 : index
    %c2 = arith.constant 2 : index
    %27 = vector.load %arg10[%c0_16, %c2] : memref<256x8xf32, #tpu.memory_space<vmem>>, vector<128x1xf32>
    %28 = vector.broadcast %27 : vector<128x1xf32> to vector<128x256xf32>
    %29 = arith.addf %26, %28 : vector<128x256xf32>
    %c2_17 = arith.constant 2 : index
    %30 = memref.load %arg11[%c2_17] : memref<6xf32, #tpu.memory_space<smem>>
    %cst_18 = arith.constant 0.000000e+00 : f32
    %31 = vector.broadcast %cst_18 : f32 to vector<128x256xf32>
    %32 = arith.cmpf oge, %29, %31 : vector<128x256xf32>
    %33 = vector.broadcast %30 : f32 to vector<128x256xf32>
    %34 = arith.mulf %33, %29 : vector<128x256xf32>
    %35 = arith.select %32, %29, %34 : vector<128x256xi1>, vector<128x256xf32>
    %36 = arith.truncf %35 : vector<128x256xf32> to vector<128x256xbf16>
    %c0_19 = arith.constant 0 : index
    %c0_20 = arith.constant 0 : index
    %37 = vector.load %arg5[%c0_19, %c0_20] : memref<26x128xbf16, #tpu.memory_space<vmem>>, vector<26x128xbf16>
    %cst_21 = arith.constant dense<0.000000e+00> : vector<26x256xf32>
    %38 = tpu.matmul %37, %36, %cst_21 {dimension_numbers = #tpu.dot_dimension_numbers<[1], [0], [0], [1], [0, 0, 1, 1], [], []>} : vector<26x128xbf16>, vector<128x256xbf16>, vector<26x256xf32> -> vector<26x256xf32>
    %c0_22 = arith.constant 0 : index
    %c3 = arith.constant 3 : index
    %39 = vector.load %arg10[%c0_22, %c3] : memref<256x8xf32, #tpu.memory_space<vmem>>, vector<26x1xf32>
    %40 = vector.broadcast %39 : vector<26x1xf32> to vector<26x256xf32>
    %41 = arith.addf %38, %40 : vector<26x256xf32>
    %42 = arith.extf %0 : vector<26x256xbf16> to vector<26x256xf32>
    %43 = arith.subf %42, %41 : vector<26x256xf32>
    %44 = arith.truncf %43 : vector<26x256xf32> to vector<26x256xbf16>
    %c0_23 = arith.constant 0 : index
    %c0_24 = arith.constant 0 : index
    %45 = vector.load %arg6[%c0_23, %c0_24] : memref<64x26xbf16, #tpu.memory_space<vmem>>, vector<64x26xbf16>
    %cst_25 = arith.constant dense<0.000000e+00> : vector<64x256xf32>
    %46 = tpu.matmul %45, %44, %cst_25 {dimension_numbers = #tpu.dot_dimension_numbers<[1], [0], [0], [1], [0, 0, 1, 1], [], []>} : vector<64x26xbf16>, vector<26x256xbf16>, vector<64x256xf32> -> vector<64x256xf32>
    %c0_26 = arith.constant 0 : index
    %c4 = arith.constant 4 : index
    %47 = vector.load %arg10[%c0_26, %c4] : memref<256x8xf32, #tpu.memory_space<vmem>>, vector<64x1xf32>
    %48 = vector.broadcast %47 : vector<64x1xf32> to vector<64x256xf32>
    %49 = arith.addf %46, %48 : vector<64x256xf32>
    %c3_27 = arith.constant 3 : index
    %50 = memref.load %arg11[%c3_27] : memref<6xf32, #tpu.memory_space<smem>>
    %cst_28 = arith.constant 0.000000e+00 : f32
    %51 = vector.broadcast %cst_28 : f32 to vector<64x256xf32>
    %52 = arith.cmpf oge, %49, %51 : vector<64x256xf32>
    %53 = vector.broadcast %50 : f32 to vector<64x256xf32>
    %54 = arith.mulf %53, %49 : vector<64x256xf32>
    %55 = arith.select %52, %49, %54 : vector<64x256xi1>, vector<64x256xf32>
    %56 = arith.truncf %55 : vector<64x256xf32> to vector<64x256xbf16>
    %c0_29 = arith.constant 0 : index
    %c0_30 = arith.constant 0 : index
    %57 = vector.load %arg7[%c0_29, %c0_30] : memref<128x64xbf16, #tpu.memory_space<vmem>>, vector<128x64xbf16>
    %cst_31 = arith.constant dense<0.000000e+00> : vector<128x256xf32>
    %58 = tpu.matmul %57, %56, %cst_31 {dimension_numbers = #tpu.dot_dimension_numbers<[1], [0], [0], [1], [0, 0, 1, 1], [], []>} : vector<128x64xbf16>, vector<64x256xbf16>, vector<128x256xf32> -> vector<128x256xf32>
    %c0_32 = arith.constant 0 : index
    %c5 = arith.constant 5 : index
    %59 = vector.load %arg10[%c0_32, %c5] : memref<256x8xf32, #tpu.memory_space<vmem>>, vector<128x1xf32>
    %60 = vector.broadcast %59 : vector<128x1xf32> to vector<128x256xf32>
    %61 = arith.addf %58, %60 : vector<128x256xf32>
    %c4_33 = arith.constant 4 : index
    %62 = memref.load %arg11[%c4_33] : memref<6xf32, #tpu.memory_space<smem>>
    %cst_34 = arith.constant 0.000000e+00 : f32
    %63 = vector.broadcast %cst_34 : f32 to vector<128x256xf32>
    %64 = arith.cmpf oge, %61, %63 : vector<128x256xf32>
    %65 = vector.broadcast %62 : f32 to vector<128x256xf32>
    %66 = arith.mulf %65, %61 : vector<128x256xf32>
    %67 = arith.select %64, %61, %66 : vector<128x256xi1>, vector<128x256xf32>
    %68 = arith.truncf %67 : vector<128x256xf32> to vector<128x256xbf16>
    %c0_35 = arith.constant 0 : index
    %c0_36 = arith.constant 0 : index
    %69 = vector.load %arg8[%c0_35, %c0_36] : memref<26x128xbf16, #tpu.memory_space<vmem>>, vector<26x128xbf16>
    %cst_37 = arith.constant dense<0.000000e+00> : vector<26x256xf32>
    %70 = tpu.matmul %69, %68, %cst_37 {dimension_numbers = #tpu.dot_dimension_numbers<[1], [0], [0], [1], [0, 0, 1, 1], [], []>} : vector<26x128xbf16>, vector<128x256xbf16>, vector<26x256xf32> -> vector<26x256xf32>
    %c0_38 = arith.constant 0 : index
    %c6 = arith.constant 6 : index
    %71 = vector.load %arg10[%c0_38, %c6] : memref<256x8xf32, #tpu.memory_space<vmem>>, vector<26x1xf32>
    %72 = vector.broadcast %71 : vector<26x1xf32> to vector<26x256xf32>
    %73 = arith.addf %70, %72 : vector<26x256xf32>
    %c5_39 = arith.constant 5 : index
    %74 = memref.load %arg11[%c5_39] : memref<6xf32, #tpu.memory_space<smem>>
    %cst_40 = arith.constant 0.000000e+00 : f32
    %75 = vector.broadcast %cst_40 : f32 to vector<26x256xf32>
    %76 = arith.cmpf oge, %73, %75 : vector<26x256xf32>
    %77 = vector.broadcast %74 : f32 to vector<26x256xf32>
    %78 = arith.mulf %77, %73 : vector<26x256xf32>
    %79 = arith.select %76, %73, %78 : vector<26x256xi1>, vector<26x256xf32>
    %80 = arith.truncf %79 : vector<26x256xf32> to vector<26x256xbf16>
    %81 = arith.extf %80 : vector<26x256xbf16> to vector<26x256xf32>
    %82 = arith.addf %41, %81 : vector<26x256xf32>
    %83 = arith.truncf %82 : vector<26x256xf32> to vector<26x256xbf16>
    %c0_41 = arith.constant 0 : index
    %c0_42 = arith.constant 0 : index
    %84 = vector.load %arg9[%c0_41, %c0_42] : memref<1x26xbf16, #tpu.memory_space<vmem>>, vector<1x26xbf16>
    %cst_43 = arith.constant dense<0.000000e+00> : vector<1x256xf32>
    %85 = tpu.matmul %84, %83, %cst_43 {dimension_numbers = #tpu.dot_dimension_numbers<[1], [0], [0], [1], [0, 0, 1, 1], [], []>} : vector<1x26xbf16>, vector<26x256xbf16>, vector<1x256xf32> -> vector<1x256xf32>
    %c0_44 = arith.constant 0 : index
    %c7 = arith.constant 7 : index
    %86 = vector.load %arg10[%c0_44, %c7] : memref<256x8xf32, #tpu.memory_space<vmem>>, vector<1x1xf32>
    %87 = vector.broadcast %86 : vector<1x1xf32> to vector<1x256xf32>
    %88 = arith.addf %85, %87 : vector<1x256xf32>
    %c0_45 = arith.constant 0 : index
    %c0_46 = arith.constant 0 : index
    %89 = vector.load %arg12[%c0_45, %c0_46] : memref<1x256xf32, #tpu.memory_space<vmem>>, vector<1x256xf32>
    tpu.vector_store %arg12[%c0_45, %c0_46], %88 {strides = array<i32>} : memref<1x256xf32, #tpu.memory_space<vmem>>, vector<1x256xf32>,
    return
  }
  func.func @transform_0(%arg0: i32) -> (i32, i32) {
    %c0_i32 = arith.constant 0 : i32
    %c0_i32_0 = arith.constant 0 : i32
    return %c0_i32, %arg0 : i32, i32
  }
  func.func @transform_1(%arg0: i32) -> (i32, i32) {
    %c0_i32 = arith.constant 0 : i32
    %c0_i32_0 = arith.constant 0 : i32
    %c0_i32_1 = arith.constant 0 : i32
    return %c0_i32, %c0_i32_0 : i32, i32
  }
  func.func @transform_2(%arg0: i32) -> (i32, i32) {
    %c0_i32 = arith.constant 0 : i32
    %c0_i32_0 = arith.constant 0 : i32
    %c0_i32_1 = arith.constant 0 : i32
    return %c0_i32, %c0_i32_0 : i32, i32
  }
  func.func @transform_3(%arg0: i32) -> (i32, i32) {
    %c0_i32 = arith.constant 0 : i32
    %c0_i32_0 = arith.constant 0 : i32
    %c0_i32_1 = arith.constant 0 : i32
    return %c0_i32, %c0_i32_0 : i32, i32
  }
  func.func @transform_4(%arg0: i32) -> (i32, i32) {
    %c0_i32 = arith.constant 0 : i32
    %c0_i32_0 = arith.constant 0 : i32
    %c0_i32_1 = arith.constant 0 : i32
    return %c0_i32, %c0_i32_0 : i32, i32
  }
  func.func @transform_5(%arg0: i32) -> (i32, i32) {
    %c0_i32 = arith.constant 0 : i32
    %c0_i32_0 = arith.constant 0 : i32
    %c0_i32_1 = arith.constant 0 : i32
    return %c0_i32, %c0_i32_0 : i32, i32
  }
  func.func @transform_6(%arg0: i32) -> (i32, i32) {
    %c0_i32 = arith.constant 0 : i32
    %c0_i32_0 = arith.constant 0 : i32
    %c0_i32_1 = arith.constant 0 : i32
    return %c0_i32, %c0_i32_0 : i32, i32
  }
  func.func @transform_7(%arg0: i32) -> (i32, i32) {
    %c0_i32 = arith.constant 0 : i32
    %c0_i32_0 = arith.constant 0 : i32
    %c0_i32_1 = arith.constant 0 : i32
    return %c0_i32, %c0_i32_0 : i32, i32
  }
  func.func @transform_8(%arg0: i32) -> (i32, i32) {
    %c0_i32 = arith.constant 0 : i32
    %c0_i32_0 = arith.constant 0 : i32
    %c0_i32_1 = arith.constant 0 : i32
    return %c0_i32, %c0_i32_0 : i32, i32
  }
  func.func @transform_9(%arg0: i32) -> (i32, i32) {
    %c0_i32 = arith.constant 0 : i32
    %c0_i32_0 = arith.constant 0 : i32
    %c0_i32_1 = arith.constant 0 : i32
    return %c0_i32, %c0_i32_0 : i32, i32
  }
  func.func @transform_10(%arg0: i32) -> i32 {
    %c0_i32 = arith.constant 0 : i32
    %c0_i32_0 = arith.constant 0 : i32
    return %c0_i32 : i32
  }
  func.func @transform_11(%arg0: i32) -> (i32, i32) {
    %c0_i32 = arith.constant 0 : i32
    %c0_i32_0 = arith.constant 0 : i32
    return %c0_i32, %arg0 : i32, i32
  }
}

</mosaic_0001>

<bundles_post_ra>
// kernel: restnn_forward.1
= control target key start
LH: loop header
LB: loop body
LE: loop exit
PB: predicated region body
PF: predicated region fallthrough
CT: control target
= control target key end

     0   :  { %16 = vsyncpa [#allocation4], 0  ;;  %s4718_s0 = inlined_call_operand.vmem [shape: bf16[26,256], index: 0, kind: input, shape index: {}]   ;;  %s4719_s1 = inlined_call_operand.vmem [shape: bf16[128,26], index: 1, kind: input, shape index: {}]   ;;  %s4720_s2 = inlined_call_operand.vmem [shape: bf16[256,128], index: 2, kind: input, shape index: {}]   ;;  %s4721_s3 = inlined_call_operand.vmem [shape: bf16[128,256], index: 3, kind: input, shape index: {}]   ;;  %s4722_s4 = inlined_call_operand.vmem [shape: bf16[26,128], index: 4, kind: input, shape index: {}]   ;;  %s4723_s5 = inlined_call_operand.vmem [shape: bf16[64,26], index: 5, kind: input, shape index: {}]   ;;  %s4724_s6 = inlined_call_operand.vmem [shape: bf16[128,64], index: 6, kind: input, shape index: {}]   ;;  %s4725_s7 = inlined_call_operand.vmem [shape: bf16[26,128], index: 7, kind: input, shape index: {}]   ;;  %s4726_s8 = inlined_call_operand.vmem [shape: bf16[1,26], index: 8, kind: input, shape index: {}]   ;;  %s4727_s9 = inlined_call_operand.vmem [shape: f32[256,8], index: 9, kind: input, shape index: {}]   ;;  %s4728_s10 = inlined_call_operand.vmem [shape: f32[6], index: 10, kind: input, shape index: {}]   ;;  %s4729_s11 = inlined_call_operand.hbm [shape: f32[1,256], index: 11, kind: output, shape index: {}]  }
   0x1   :  { %17 = vsyncpa [#allocation3], 0  ;;  %s43_s19 = sshll.u32 %s4728_s10, 4  ;;  %s2991_s20 = smov [#allocation2]   ;;  %s44_s19 = int_to_ptr.vmem [resolvable:$true] %s43_s19 }
   0x2   :  { %46 = dma.vmem_to_smem %s44_s19, 16, %s2991_s20, [#allocation4]  }
   0x3   :  { %2987 = dma.done.wait [#allocation4], 16  }
   0x4   :  { %2988 = vsyncadd [#allocation4], 4294967280 }
   0x5   :  { %51 = sfence }
   0x6   :  { %v3067_v0 = vld [vmem:[%s4727_s9 + $0x70] sm:$0xff]  ;;  %v2810_v2 = vld [vmem:[%s4718_s0 + $0x14] sm:$0x10]  ;;  %v2992_v3 = vmov 0   ;;  %vm252_vm0 = vcmask 1044480   ;;  %v3098_v13 = vld [vmem:[%s4727_s9 + $0x60] sm:$0xff] }
   0x7   :  { %v2562_v1 = vld [vmem:[%s4718_s0 + $0x10] sm:$0xf]  ;;  %2893 = vset.pattern.permute.xlu0 %v2992_v3  ;;  %v2809_v5 = vld [vmem:[%s4718_s0 + $0x14] sm:$0xf]  ;;  %v2564_v6 = vld [vmem:[%s4718_s0 + $0x18] sm:$0x10]  ;;  %2895 = vset.pattern.permute.xlu2 %v2992_v3 }
   0x8   :  { %v2563_v4 = vor.u32 %v2810_v2, %v2562_v1  ;;  %161 = vperm.xlu0 %2893, %v3067_v0   ;;  %v2567_v7 = vor.u32 %v2809_v5, %v2564_v6  ;;  %v2554_v8 = vld [vmem:[%s4718_s0] sm:$0xf]  ;;  %v2808_v9 = vld [vmem:[%s4718_s0 + $0x4] sm:$0xf0]  ;;  %v2807_v10 = vld [vmem:[%s4718_s0 + $0x4] sm:$0xf]  ;;  %2894 = vset.pattern.permute.xlu1 %v2992_v3 }
   0x9   :  { %v2556_v12 = vld [vmem:[%s4718_s0 + $0x8] sm:$0xf0]  ;;  %v2555_v15 = vor.u32 %v2808_v9, %v2554_v8  ;;  %151 = vperm.xlu1 %2894, %v3098_v13   ;;  %v3105_v16 = vld [vmem:[%s4727_s9 + $0x50] sm:$0xff]  ;;  %v3111_v18 = vld [vmem:[%s4727_s9 + $0x78] sm:$0xff]  ;;  %vm227_vm1 = vcmask 211968   ;;  %v2993_v3 = vmov 1  }
   0xa   :  { %v254_v11 = vsel %vm252_vm0, %v2563_v4, 0  ;;  %v257_v14 = vsel %vm252_vm0, %v2567_v7, 0  ;;  %v2559_v17 = vor.u32 %v2807_v10, %v2556_v12  ;;  %141 = vperm.xlu2 %2895, %v3105_v16   ;;  %v2811_v19 = vld [vmem:[%s4719_s1] sm:$0xff]  ;;  %v3119_v20 = vld [vmem:[%s4727_s9 + $0x68] sm:$0xff]  ;;  %v3125_v21 = vld [vmem:[%s4727_s9 + $0x58] sm:$0xff]  ;;  %s357_s26 = sld [smem:[#allocation2]] }
   0xb   :  { %265 = vmatpush.bf16.msra.mxu0 %v254_v11  ;;  %314 = vmatpush.bf16.msra.mxu1 %v257_v14  ;;  %v3134_v22 = vld [vmem:[%s4727_s9 + $0x40] sm:$0xff]  ;;  %v3139_v23 = vld [vmem:[%s4727_s9 + $0x48] sm:$0xff]  ;;  %v3145_v24 = vld [vmem:[%s4727_s9 + $0x30] sm:$0xff]  ;;  %s2648_s17 = sld [smem:[#allocation2 + $0x1]]  ;;  %s3000_s15 = smov [#allocation5]  }
   0xc   :  { %v3152_v25 = vld [vmem:[%s4727_s9 + $0x38] sm:$0xff]  ;;  %v2812_v26 = vld [vmem:[%s4719_s1 + $0x8] sm:$0xff]  ;;  %v3160_v27 = vld [vmem:[%s4727_s9 + $0x20] sm:$0xff]  ;;  %s2795_s24 = sld [smem:[#allocation2 + $0x4]]  ;;  %s2508_s16 = sshll.u32 %s3000_s15, 4  ;;  %s2509_s16 = int_to_ptr.vmem [resolvable:$true] %s2508_s16 }
   0xd   :  { %v3166_v28 = vld [vmem:[%s4727_s9 + $0x28] sm:$0xff]  ;;  %v3175_v29 = vld [vmem:[%s4727_s9 + $0x10] sm:$0xff]  ;;  %v3180_v30 = vld [vmem:[%s4727_s9 + $0x18] sm:$0xff] }
   0xe   :  { %v3186_v31 = vld [vmem:[%s4727_s9] sm:$0xff]  ;;  %v3193_v32 = vld [vmem:[%s4727_s9 + $0x8] sm:$0xff]  ;;  %v2813_v33 = vld [vmem:[%s4719_s1 + $0x10] sm:$0xff] }
   0xf   :  { %266 = vmatpush.bf16.msra.mxu0 %v2555_v15  ;;  %315 = vmatpush.bf16.msra.mxu1 %v2559_v17  ;;  %4732 = vst [vmem:[#allocation8_spill] sm:$0xff] %v3186_v31  ;;  %v2814_v34 = vld [vmem:[%s4719_s1 + $0x18] sm:$0xff]  ;;  %v2815_v35 = vld [vmem:[%s4719_s1 + $0x20] sm:$0xff]  ;;  %v2816_v36 = vld [vmem:[%s4719_s1 + $0x28] sm:$0xff] }
  0x10   :  { %166 = vperm.xlu0 %2893, %v3111_v18   ;;  %4733 = vst [vmem:[#allocation9_spill] sm:$0xff] %v3193_v32  ;;  %v2817_v37 = vld [vmem:[%s4719_s1 + $0x30] sm:$0xff]  ;;  %v2818_v38 = vld [vmem:[%s4719_s1 + $0x38] sm:$0xff] }
  0x11   :  { %156 = vperm.xlu1 %2894, %v3119_v20   ;;  %v534_v7 = vld [vmem:[%s4727_s9 + $0xf8] sm:$0xff] }
  0x12   :  { %2568 = vmatmul.msk.bf16.vlgmr.msra.gmra.mxu0 %vm227_vm1, %v2811_v19  ;;  %2576 = vmatmul.msk.bf16.vlgmr.msra.gmra.mxu1 %vm227_vm1, %v2811_v19 }
  0x13   :  { %146 = vperm.xlu2 %2895, %v3125_v21  }
  0x18   :  { %131 = vperm.xlu0 %2893, %v3134_v22  }
  0x19   :  { %136 = vperm.xlu1 %2894, %v3139_v23  }
  0x1b   :  { %121 = vperm.xlu2 %2895, %v3145_v24  }
  0x20   :  { %126 = vperm.xlu0 %2893, %v3152_v25  }
  0x21   :  { %111 = vperm.xlu1 %2894, %v3160_v27  }
  0x22   :  { %2569 = vmatmul.msk.bf16.gmra.mxu0 %vm227_vm1, %v2812_v26  ;;  %2577 = vmatmul.msk.bf16.gmra.mxu1 %vm227_vm1, %v2812_v26 }
  0x23   :  { %116 = vperm.xlu2 %2895, %v3166_v28  }
  0x28   :  { %101 = vperm.xlu0 %2893, %v3175_v29  }
  0x29   :  { %106 = vperm.xlu1 %2894, %v3180_v30  }
  0x2b   :  { %91 = vperm.xlu2 %2895, %v3186_v31  }
  0x30   :  { %96 = vperm.xlu0 %2893, %v3193_v32  }
  0x31   :  { %2896 = vset.pattern.permute.xlu1 %v2993_v3 }
  0x32   :  { %2570 = vmatmul.msk.bf16.gmra.mxu0 %vm227_vm1, %v2813_v33  ;;  %2578 = vmatmul.msk.bf16.gmra.mxu1 %vm227_vm1, %v2813_v33 }
  0x33   :  { %2897 = vset.pattern.permute.xlu2 %v2993_v3  ;;  %607 = vperm.xlu1 %2896, %v3067_v0  }
  0x34   :  { %612 = vperm.xlu2 %2897, %v3111_v18  }
  0x38   :  { %2898 = vset.pattern.permute.xlu0 %v2993_v3 }
  0x3b   :  { %692 = vperm.xlu1 %2896, %v534_v7  }
  0x3c   :  { %597 = vperm.xlu2 %2897, %v3098_v13   ;;  %v3256_v13 = vstv %s357_s26  ;;  %s2746_s26 = sld [smem:[#allocation2 + $0x3]] }
  0x42   :  { %2571 = vmatmul.msk.bf16.gmra.mxu0 %vm227_vm1, %v2814_v34  ;;  %2579 = vmatmul.msk.bf16.gmra.mxu1 %vm227_vm1, %v2814_v34 }
  0x43   :  { %602 = vperm.xlu1 %2896, %v3119_v20  }
  0x4b   :  { %587 = vperm.xlu1 %2896, %v3105_v16  }
  0x52   :  { %2572 = vmatmul.msk.bf16.gmra.mxu0 %vm227_vm1, %v2815_v35  ;;  %2580 = vmatmul.msk.bf16.gmra.mxu1 %vm227_vm1, %v2815_v35 }
  0x62   :  { %2573 = vmatmul.msk.bf16.gmra.mxu0 %vm227_vm1, %v2816_v36  ;;  %2581 = vmatmul.msk.bf16.gmra.mxu1 %vm227_vm1, %v2816_v36 }
  0x64   :  { %v142_v57 = vpop.permute.xlu2 %141 }
  0x6d   :  { %v147_v63 = vpop.permute.xlu2 %146 }
  0x72   :  { %2574 = vmatmul.msk.bf16.gmra.mxu0 %vm227_vm1, %v2817_v37  ;;  %2582 = vmatmul.msk.bf16.gmra.mxu1 %vm227_vm1, %v2817_v37 }
  0x75   :  { %v122_v6 = vpop.permute.xlu2 %121 }
  0x7a   :  { %v162_v60 = vpop.permute.xlu0 %161 }
  0x7b   :  { %v152_v1 = vpop.permute.xlu1 %151 }
  0x7d   :  { %v3248_v12 = vpop.permute.xlu2 %116 }
  0x82   :  { %2575 = vmatmul.msk.bf16.gmra.mxu0 %vm227_vm1, %v2818_v38  ;;  %2583 = vmatmul.msk.bf16.gmra.mxu1 %vm227_vm1, %v2818_v38  ;;  %v167_v2 = vpop.permute.xlu0 %166 }
  0x83   :  { %v157_v8 = vpop.permute.xlu1 %156 }
  0x85   :  { %v92_v18 = vpop.permute.xlu2 %91 }
  0x8a   :  { %v132_v9 = vpop.permute.xlu0 %131 }
  0x8b   :  { %v137_v0 = vpop.permute.xlu1 %136 }
  0x8f   :  { %v268_v39 = vpop.f32.mrf.mxu0  ;;  %v317_v40 = vpop.f32.mrf.mxu1 }
  0x90   :  { %v3254_v33 = vadd.f32 %v268_v39, %v92_v18  ;;  %v3258_v36 = vadd.f32 %v317_v40, %v92_v18  ;;  %v530_v39 = vld [vmem:[%s4727_s9 + $0xd8] sm:$0xff] }
  0x91   :  { %672 = vperm.xlu1 %2896, %v530_v39  }
  0x92   :  { %v3251_v15 = vpop.permute.xlu0 %126 }
  0x93   :  { %v112_v35 = vpop.permute.xlu1 %111 }
  0x97   :  { %v3226_v41 = vpop.f32.mrf.mxu0  ;;  %v3228_v42 = vpop.f32.mrf.mxu1 }
  0x9a   :  { %v102_v34 = vpop.permute.xlu0 %101 }
  0x9f   :  { %v273_v43 = vpop.f32.mrf.mxu0  ;;  %v322_v44 = vpop.f32.mrf.mxu1 }
  0xa0   :  { %v3260_v20 = vadd.f32 %v273_v43, %v102_v34  ;;  %v3262_v37 = vadd.f32 %v322_v44, %v102_v34 }
  0xa7   :  { %v3230_v45 = vpop.f32.mrf.mxu0  ;;  %v3232_v46 = vpop.f32.mrf.mxu1 }
  0xaf   :  { %v278_v47 = vpop.f32.mrf.mxu0  ;;  %v327_v48 = vpop.f32.mrf.mxu1 }
  0xb0   :  { %v3264_v38 = vadd.f32 %v278_v47, %v112_v35  ;;  %v3266_v3 = vadd.f32 %v327_v48, %v112_v35 }
  0xb7   :  { %v3234_v49 = vpop.f32.mrf.mxu0  ;;  %v3236_v50 = vpop.f32.mrf.mxu1 }
  0xbf   :  { %v283_v51 = vpop.f32.mrf.mxu0  ;;  %v332_v52 = vpop.f32.mrf.mxu1 }
  0xc0   :  { %v3268_v16 = vadd.f32 %v283_v51, %v122_v6  ;;  %v3273_v31 = vadd.f32 %v332_v52, %v122_v6 }
  0xc7   :  { %v3238_v53 = vpop.f32.mrf.mxu0  ;;  %v3240_v54 = vpop.f32.mrf.mxu1 }
  0xcf   :  { %v288_v55 = vpop.f32.mrf.mxu0  ;;  %v337_v56 = vpop.f32.mrf.mxu1 }
  0xd0   :  { %v3275_v40 = vadd.f32 %v288_v55, %v132_v9  ;;  %v3277_v44 = vadd.f32 %v337_v56, %v132_v9 }
  0xd2   :  { %vm375_vm15 = vcmp.ge.f32.partialorder %v3277_v44, 0.0 }
  0xd7   :  { %v290_v58 = vpop.f32.mrf.mxu0  ;;  %v339_v59 = vpop.f32.mrf.mxu1 }
  0xd8   :  { %v3279_v47 = vadd.f32 %v290_v58, %v137_v0  ;;  %v3281_v48 = vadd.f32 %v339_v59, %v137_v0 }
  0xda   :  { %vm376_vm14 = vcmp.ge.f32.partialorder %v3279_v47, 0.0 }
  0xdf   :  { %v293_v61 = vpop.f32.mrf.mxu0  ;;  %v342_v62 = vpop.f32.mrf.mxu1 }
  0xe7   :  { %v295_v4 = vpop.f32.mrf.mxu0  ;;  %v344_v5 = vpop.f32.mrf.mxu1 }
  0xe8   :  { %v296_v34 = vadd.f32 %v295_v4, %v147_v63  ;;  %v345_v6 = vadd.f32 %v344_v5, %v147_v63 }
  0xea   :  { %v414_v39 = vmul.f32 %v3256_v13, %v345_v6  ;;  %vm380_vm10 = vcmp.ge.f32.partialorder %v296_v34, 0.0  ;;  %vm381_vm12 = vcmp.ge.f32.partialorder %v345_v6, 0.0 }
  0xef   :  { %v298_v10 = vpop.f32.mrf.mxu0  ;;  %v347_v11 = vpop.f32.mrf.mxu1 }
  0xf0   :  { %v299_v7 = vadd.f32 %v298_v10, %v152_v1  ;;  %v348_v43 = vadd.f32 %v347_v11, %v152_v1  ;;  %v3283_v10 = vadd.f32 %v293_v61, %v142_v57 }
  0xf2   :  { %v415_v55 = vmul.f32 %v3256_v13, %v299_v7  ;;  %v416_v58 = vmul.f32 %v3256_v13, %v348_v43  ;;  %vm383_vm7 = vcmp.ge.f32.partialorder %v348_v43, 0.0  ;;  %vm382_vm9 = vcmp.ge.f32.partialorder %v299_v7, 0.0 }
  0xf3   :  { %vm378_vm13 = vcmp.ge.f32.partialorder %v3283_v10, 0.0 }
  0xf7   :  { %v300_v14 = vpop.f32.mrf.mxu0  ;;  %v349_v17 = vpop.f32.mrf.mxu1 }
  0xf8   :  { %v301_v51 = vadd.f32 %v300_v14, %v157_v8  ;;  %v350_v35 = vadd.f32 %v349_v17, %v157_v8  ;;  %v413_v14 = vmul.f32 %v3256_v13, %v296_v34 }
  0xfa   :  { %v417_v61 = vmul.f32 %v3256_v13, %v301_v51  ;;  %vm384_vm6 = vcmp.ge.f32.partialorder %v301_v51, 0.0  ;;  %vm385_vm8 = vcmp.ge.f32.partialorder %v350_v35, 0.0 }
  0xff   :  { %v303_v19 = vpop.f32.mrf.mxu0  ;;  %v352_v26 = vpop.f32.mrf.mxu1 }
 0x100   :  { %v304_v32 = vadd.f32 %v303_v19, %v162_v60  ;;  %v353_v18 = vadd.f32 %v352_v26, %v162_v60  ;;  %v3285_v19 = vadd.f32 %v342_v62, %v142_v57  ;;  %v418_v62 = vmul.f32 %v3256_v13, %v350_v35 }
 0x101   :  { %v449_v26 = vsel %vm384_vm6, %v301_v51, %v417_v61  ;;  %v447_v51 = vsel %vm382_vm9, %v299_v7, %v415_v55  ;;  %v408_v7 = vmul.f32 %v3256_v13, %v3277_v44  ;;  %v409_v55 = vmul.f32 %v3256_v13, %v3279_v47 }
 0x102   :  { %v419_v60 = vmul.f32 %v3256_v13, %v304_v32  ;;  %v420_v59 = vmul.f32 %v3256_v13, %v353_v18  ;;  %vm386_vm2 = vcmp.ge.f32.partialorder %v304_v32, 0.0  ;;  %vm387_vm4 = vcmp.ge.f32.partialorder %v353_v18, 0.0 }
 0x103   :  { %v412_v0 = vmul.f32 %v3256_v13, %v3285_v19  ;;  %vm379_vm11 = vcmp.ge.f32.partialorder %v3285_v19, 0.0  ;;  %v407_v61 = vmul.f32 %v3256_v13, %v3275_v40  ;;  %vm367_vm9 = vcmp.ge.f32.partialorder %v3266_v3, 0.0 }
 0x104   :  { %v451_v4 = vsel %vm386_vm2, %v304_v32, %v419_v60  ;;  %v452_v11 = vsel %vm387_vm4, %v353_v18, %v420_v59  ;;  %v450_v32 = vsel %vm385_vm8, %v350_v35, %v418_v62  ;;  %v527_v18 = vld [vmem:[%s4727_s9 + $0xc0] sm:$0xff]  ;;  %v533_v60 = vld [vmem:[%s4727_s9 + $0xf0] sm:$0xff]  ;;  %v286_v35 = vadd.f32 %v3238_v53, %v3251_v15  ;;  %v107_v62 = vpop.permute.xlu1 %106 }
 0x105   :  { %657 = vperm.xlu1 %2896, %v527_v18   ;;  %687 = vperm.xlu0 %2898, %v533_v60   ;;  %v410_v53 = vmul.f32 %v3256_v13, %v3281_v48  ;;  %vm377_vm2 = vcmp.ge.f32.partialorder %v3281_v48, 0.0 }
 0x106   :  { %vm372_vm4 = vcmp.ge.f32.partialorder %v286_v35, 0.0 }
 0x107   :  { %v305_v52 = vpop.f32.mrf.mxu0  ;;  %v354_v56 = vpop.f32.mrf.mxu1 }
 0x108   :  { %v306_v1 = vadd.f32 %v305_v52, %v167_v2  ;;  %v355_v9 = vadd.f32 %v354_v56, %v167_v2  ;;  %v448_v52 = vsel %vm383_vm7, %v348_v43, %v416_v58  ;;  %v531_v43 = vld [vmem:[%s4727_s9 + $0xe0] sm:$0xff]  ;;  %v335_v56 = vadd.f32 %v3240_v54, %v3251_v15 }
 0x109   :  { %v467_v58 = vpack.c.bf16 %v449_v26, %v447_v51  ;;  %v468_v59 = vpack.c.bf16 %v450_v32, %v448_v52  ;;  %677 = vperm.xlu2 %2897, %v531_v43   ;;  %v444_v54 = vsel %vm379_vm11, %v3285_v19, %v412_v0  ;;  %v446_v15 = vsel %vm381_vm12, %v345_v6, %v414_v39 }
 0x10a   :  { %v421_v57 = vmul.f32 %v3256_v13, %v306_v1  ;;  %vm388_vm3 = vcmp.ge.f32.partialorder %v306_v1, 0.0  ;;  %v422_v63 = vmul.f32 %v3256_v13, %v355_v9  ;;  %vm389_vm5 = vcmp.ge.f32.partialorder %v355_v9, 0.0 }
 0x10b   :  { %v281_v19 = vadd.f32 %v3234_v49, %v3248_v12  ;;  %v330_v6 = vadd.f32 %v3236_v50, %v3248_v12  ;;  %v406_v49 = vmul.f32 %v3256_v13, %v335_v56  ;;  %v440_v50 = vsel %vm375_vm15, %v3277_v44, %v408_v7 }
 0x10c   :  { %v453_v5 = vsel %vm388_vm3, %v306_v1, %v421_v57  ;;  %v454_v2 = vsel %vm389_vm5, %v355_v9, %v422_v63  ;;  %v411_v1 = vmul.f32 %v3256_v13, %v3283_v10  ;;  %v445_v9 = vsel %vm380_vm10, %v296_v34, %v413_v14 }
 0x10d   :  { %v469_v8 = vpack.c.bf16 %v453_v5, %v451_v4  ;;  %v470_v17 = vpack.c.bf16 %v454_v2, %v452_v11  ;;  %vm374_vm3 = vcmp.ge.f32.partialorder %v3275_v40, 0.0  ;;  %v404_v63 = vmul.f32 %v3256_v13, %v3273_v31  ;;  %572 = vperm.xlu1 %2896, %v3152_v25  }
 0x10e   :  { %v443_v34 = vsel %vm378_vm13, %v3283_v10, %v411_v1  ;;  %v405_v4 = vmul.f32 %v3256_v13, %v286_v35  ;;  %v466_v10 = vpack.c.bf16 %v446_v15, %v444_v54  ;;  %v441_v5 = vsel %vm376_vm14, %v3279_v47, %v409_v55 }
 0x10f   :  { %791 = vmatpush.bf16.msrb.mxu0 %v469_v8  ;;  %2867 = vmatpush.bf16.msra.mxu2 %v469_v8  ;;  %v465_v57 = vpack.c.bf16 %v445_v9, %v443_v34  ;;  %v532_v8 = vld [vmem:[%s4727_s9 + $0xe8] sm:$0xff]  ;;  %v442_v12 = vsel %vm377_vm2, %v3281_v48, %v410_v53  ;;  %v403_v11 = vmul.f32 %v3256_v13, %v3268_v16  ;;  %vm371_vm5 = vcmp.ge.f32.partialorder %v3273_v31, 0.0  ;;  %v97_v48 = vpop.permute.xlu0 %96 }
 0x110   :  { %880 = vmatpush.bf16.msrb.mxu1 %v470_v17  ;;  %2875 = vmatpush.bf16.msra.mxu3 %v470_v17  ;;  %v439_v47 = vsel %vm374_vm3, %v3275_v40, %v407_v61  ;;  %vm373_vm6 = vcmp.ge.f32.partialorder %v335_v56, 0.0  ;;  %v276_v2 = vadd.f32 %v3230_v45, %v107_v62  ;;  %v325_v0 = vadd.f32 %v3232_v46, %v107_v62  ;;  %v526_v62 = vld [vmem:[%s4727_s9 + $0xb8] sm:$0xff] }
 0x111   :  { %v463_v44 = vpack.c.bf16 %v441_v5, %v439_v47  ;;  %vm370_vm7 = vcmp.ge.f32.partialorder %v3268_v16, 0.0  ;;  %682 = vperm.xlu0 %2898, %v532_v8   ;;  %v400_v14 = vmul.f32 %v3256_v13, %v3266_v3  ;;  %v401_v17 = vmul.f32 %v3256_v13, %v281_v19  ;;  %592 = vperm.xlu2 %2897, %v3125_v21   ;;  %v3448_v5 = vpop.permute.xlu2 %612 }
 0x112   :  { %v464_v40 = vpack.c.bf16 %v442_v12, %v440_v50  ;;  %v437_v26 = vsel %vm372_vm4, %v286_v35, %v405_v4  ;;  %v402_v45 = vmul.f32 %v3256_v13, %v330_v6  ;;  %v436_v25 = vsel %vm371_vm5, %v3273_v31, %v404_v63  ;;  %v3440_v63 = vpop.permute.xlu1 %607  ;;  %v523_v4 = vld [vmem:[%s4727_s9 + $0xa0] sm:$0xff]  ;;  %v524_v12 = vld [vmem:[%s4727_s9 + $0xa8] sm:$0xff] }
 0x113   :  { %792 = vmatpush.bf16.msrb.mxu0 %v467_v58  ;;  %2868 = vmatpush.bf16.msra.mxu2 %v467_v58  ;;  %v438_v46 = vsel %vm373_vm6, %v335_v56, %v406_v49  ;;  %vm368_vm8 = vcmp.ge.f32.partialorder %v281_v19, 0.0  ;;  %v399_v39 = vmul.f32 %v3256_v13, %v3264_v38  ;;  %v435_v21 = vsel %vm370_vm7, %v3268_v16, %v403_v11  ;;  %v2826_v49 = vld [vmem:[%s4720_s2 + $0x38] sm:$0xff]  ;;  %v4734_v11 = vld [vmem:[#allocation8_spill] sm:$0xff] }
 0x114   :  { %881 = vmatpush.bf16.msrb.mxu1 %v468_v59  ;;  %2876 = vmatpush.bf16.msra.mxu3 %v468_v59  ;;  %vm369_vm10 = vcmp.ge.f32.partialorder %v330_v6, 0.0  ;;  %v396_v52 = vmul.f32 %v3256_v13, %v3262_v37  ;;  %v271_v31 = vadd.f32 %v3226_v41, %v97_v48  ;;  %v461_v32 = vpack.c.bf16 %v437_v26, %v435_v21  ;;  %v529_v41 = vld [vmem:[%s4727_s9 + $0xd0] sm:$0xff] }
 0x115   :  { %vm366_vm11 = vcmp.ge.f32.partialorder %v3264_v38, 0.0  ;;  %v320_v18 = vadd.f32 %v3228_v42, %v97_v48  ;;  %v397_v60 = vmul.f32 %v3256_v13, %v276_v2  ;;  %v462_v1 = vpack.c.bf16 %v438_v46, %v436_v25  ;;  %557 = vperm.xlu1 %2896, %v3160_v27   ;;  %v2828_v46 = vld [vmem:[%s4720_s2 + $0x48] sm:$0xff] }
 0x116   :  { %v433_v51 = vsel %vm368_vm8, %v281_v19, %v401_v17  ;;  %v398_v43 = vmul.f32 %v3256_v13, %v325_v0  ;;  %v432_v16 = vsel %vm367_vm9, %v3266_v3, %v400_v14  ;;  %v434_v35 = vsel %vm369_vm10, %v330_v6, %v402_v45  ;;  %v2821_v6 = vld [vmem:[%s4720_s2 + $0x10] sm:$0xff]  ;;  %v522_v17 = vld [vmem:[%s4727_s9 + $0x98] sm:$0xff]  ;;  %v519_v45 = vld [vmem:[%s4727_s9 + $0x80] sm:$0xff] }
 0x117   :  { %793 = vmatpush.bf16.msrb.mxu0 %v465_v57  ;;  %2869 = vmatpush.bf16.msra.mxu2 %v465_v57  ;;  %vm364_vm12 = vcmp.ge.f32.partialorder %v276_v2, 0.0  ;;  %v395_v56 = vmul.f32 %v3256_v13, %v3260_v20  ;;  %v431_v42 = vsel %vm366_vm11, %v3264_v38, %v399_v39  ;;  %vm363_vm13 = vcmp.ge.f32.partialorder %v3262_v37, 0.0  ;;  %v2823_v57 = vld [vmem:[%s4720_s2 + $0x20] sm:$0xff] }
 0x118   :  { %882 = vmatpush.bf16.msrb.mxu1 %v466_v10  ;;  %2877 = vmatpush.bf16.msra.mxu3 %v466_v10  ;;  %vm365_vm14 = vcmp.ge.f32.partialorder %v325_v0, 0.0  ;;  %v459_v58 = vpack.c.bf16 %v433_v51, %v431_v42  ;;  %vm362_vm15 = vcmp.ge.f32.partialorder %v3260_v20, 0.0  ;;  %v392_v3 = vmul.f32 %v3256_v13, %v3258_v36  ;;  %v2820_v10 = vld [vmem:[%s4720_s2 + $0x8] sm:$0xff] }
 0x119   :  { %667 = vperm.xlu0 %2898, %v529_v41   ;;  %v393_v7 = vmul.f32 %v3256_v13, %v271_v31  ;;  %v460_v55 = vpack.c.bf16 %v434_v35, %v432_v16  ;;  %v429_v59 = vsel %vm364_vm12, %v276_v2, %v397_v60  ;;  %577 = vperm.xlu2 %2897, %v3134_v22   ;;  %vm360_vm2 = vcmp.ge.f32.partialorder %v271_v31, 0.0  ;;  %v3456_v50 = vpop.permute.xlu2 %597 }
 0x11a   :  { %v394_v38 = vmul.f32 %v3256_v13, %v320_v18  ;;  %v428_v9 = vsel %vm363_vm13, %v3262_v37, %v396_v52  ;;  %v430_v53 = vsel %vm365_vm14, %v325_v0, %v398_v43  ;;  %v391_v27 = vmul.f32 %v3256_v13, %v3254_v33  ;;  %v3450_v8 = vpop.permute.xlu1 %692  ;;  %v521_v0 = vld [vmem:[%s4727_s9 + $0x90] sm:$0xff] }
 0x11b   :  { %794 = vmatpush.bf16.msrb.mxu0 %v463_v44  ;;  %2870 = vmatpush.bf16.msra.mxu2 %v463_v44  ;;  %v427_v54 = vsel %vm362_vm15, %v3260_v20, %v395_v56  ;;  %vm359_vm3 = vcmp.ge.f32.partialorder %v3258_v36, 0.0  ;;  %vm361_vm4 = vcmp.ge.f32.partialorder %v320_v18, 0.0  ;;  %vm358_vm5 = vcmp.ge.f32.partialorder %v3254_v33, 0.0  ;;  %v2827_v44 = vld [vmem:[%s4720_s2 + $0x40] sm:$0xff] }
 0x11c   :  { %883 = vmatpush.bf16.msrb.mxu1 %v464_v40  ;;  %2878 = vmatpush.bf16.msra.mxu3 %v464_v40  ;;  %v457_v22 = vpack.c.bf16 %v429_v59, %v427_v54  ;;  %v458_v15 = vpack.c.bf16 %v430_v53, %v428_v9  ;;  %v425_v61 = vsel %vm360_vm2, %v271_v31, %v393_v7  ;;  %v4735_v40 = vld [vmem:[#allocation9_spill] sm:$0xff]  ;;  %v3515_v41 = vstv %s2648_s17  ;;  %v2830_v59 = vld [vmem:[%s4720_s2 + $0x58] sm:$0xff] }
 0x11d   :  { %v424_v37 = vsel %vm359_vm3, %v3258_v36, %v392_v3  ;;  %v426_v34 = vsel %vm361_vm4, %v320_v18, %v394_v38  ;;  %v423_v13 = vsel %vm358_vm5, %v3254_v33, %v391_v27  ;;  %v528_v36 = vld [vmem:[%s4727_s9 + $0xc8] sm:$0xff]  ;;  %v2822_v33 = vld [vmem:[%s4720_s2 + $0x18] sm:$0xff]  ;;  %642 = vperm.xlu1 %2896, %v524_v12   ;;  %v2829_v18 = vld [vmem:[%s4720_s2 + $0x50] sm:$0xff] }
 0x11e   :  { %v455_v19 = vpack.c.bf16 %v425_v61, %v423_v13  ;;  %v456_v20 = vpack.c.bf16 %v426_v34, %v424_v37 }
 0x11f   :  { %795 = vmatpush.bf16.msrb.mxu0 %v461_v32  ;;  %2871 = vmatpush.bf16.msra.mxu2 %v461_v32 }
 0x120   :  { %884 = vmatpush.bf16.msrb.mxu1 %v462_v1  ;;  %2879 = vmatpush.bf16.msra.mxu3 %v462_v1 }
 0x121   :  { %582 = vperm.xlu0 %2898, %v3139_v23   ;;  %662 = vperm.xlu2 %2897, %v528_v36   ;;  %v525_v23 = vld [vmem:[%s4727_s9 + $0xb0] sm:$0xff] }
 0x122   :  { %v3462_v47 = vpop.permute.xlu1 %602 }
 0x123   :  { %796 = vmatpush.bf16.msrb.mxu0 %v459_v58  ;;  %2872 = vmatpush.bf16.msra.mxu2 %v459_v58 }
 0x124   :  { %885 = vmatpush.bf16.msrb.mxu1 %v460_v55  ;;  %2880 = vmatpush.bf16.msra.mxu3 %v460_v55 }
 0x125   :  { %627 = vperm.xlu1 %2896, %v521_v0  }
 0x127   :  { %797 = vmatpush.bf16.msrb.mxu0 %v457_v22  ;;  %2873 = vmatpush.bf16.msra.mxu2 %v457_v22 }
 0x128   :  { %886 = vmatpush.bf16.msrb.mxu1 %v458_v15  ;;  %2881 = vmatpush.bf16.msra.mxu3 %v458_v15 }
 0x129   :  { %567 = vperm.xlu0 %2898, %v3145_v24   ;;  %647 = vperm.xlu2 %2897, %v525_v23   ;;  %v2824_v24 = vld [vmem:[%s4720_s2 + $0x28] sm:$0xff] }
 0x12a   :  { %v3475_v48 = vpop.permute.xlu1 %587 }
 0x12b   :  { %798 = vmatpush.bf16.msrb.mxu0 %v455_v19  ;;  %2874 = vmatpush.bf16.msra.mxu2 %v455_v19 }
 0x12c   :  { %887 = vmatpush.bf16.msrb.mxu1 %v456_v20  ;;  %2882 = vmatpush.bf16.msra.mxu3 %v456_v20  ;;  %v2831_v20 = vld [vmem:[%s4720_s2 + $0x60] sm:$0xff] }
 0x12d   :  { %542 = vperm.xlu1 %2896, %v4735_v40  }
 0x12e   :  { %809 = vmatmul.bf16.vlgmr.msra.gmra.mxu2 %v2821_v6 }
 0x12f   :  { %898 = vmatmul.bf16.vlgmr.msra.gmra.mxu3 %v2821_v6 }
 0x131   :  { %562 = vperm.xlu2 %2897, %v3166_v28   ;;  %v2819_v28 = vld [vmem:[%s4720_s2] sm:$0xff]  ;;  %652 = vperm.xlu0 %2898, %v526_v62  }
 0x132   :  { %799 = vmatmul.bf16.vlgmr.msrb.gmra.mxu0 %v2819_v28  ;;  %888 = vmatmul.bf16.vlgmr.msrb.gmra.mxu1 %v2819_v28  ;;  %v3483_v26 = vpop.permute.xlu1 %672 }
 0x139   :  { %547 = vperm.xlu2 %2897, %v3175_v29   ;;  %v2825_v29 = vld [vmem:[%s4720_s2 + $0x30] sm:$0xff]  ;;  %637 = vperm.xlu0 %2898, %v523_v4  }
 0x13e   :  { %814 = vmatmul.bf16.gmra.mxu2 %v2822_v33 }
 0x13f   :  { %903 = vmatmul.bf16.gmra.mxu3 %v2822_v33 }
 0x141   :  { %552 = vperm.xlu0 %2898, %v3180_v30   ;;  %v520_v30 = vld [vmem:[%s4727_s9 + $0x88] sm:$0xff]  ;;  %632 = vperm.xlu2 %2897, %v522_v17  }
 0x142   :  { %804 = vmatmul.bf16.gmra.mxu0 %v2820_v10  ;;  %893 = vmatmul.bf16.gmra.mxu1 %v2820_v10 }
 0x149   :  { %537 = vperm.xlu0 %2898, %v4734_v11   ;;  %617 = vperm.xlu2 %2897, %v519_v45   ;;  %v2833_v11 = vld [vmem:[%s4720_s2 + $0x70] sm:$0xff]  ;;  %v2834_v45 = vld [vmem:[%s4720_s2 + $0x78] sm:$0xff] }
 0x14e   :  { %819 = vmatmul.bf16.gmra.mxu2 %v2823_v57 }
 0x14f   :  { %908 = vmatmul.bf16.gmra.mxu3 %v2823_v57 }
 0x151   :  { %622 = vperm.xlu0 %2898, %v520_v30  }
 0x15e   :  { %824 = vmatmul.bf16.gmra.mxu2 %v2824_v24 }
 0x15f   :  { %913 = vmatmul.bf16.gmra.mxu3 %v2824_v24 }
 0x163   :  { %v3464_v2 = vpop.permute.xlu2 %677 }
 0x16b   :  { %v3477_v14 = vpop.permute.xlu2 %592 }
 0x16e   :  { %829 = vmatmul.bf16.gmra.mxu2 %v2825_v29 }
 0x16f   :  { %918 = vmatmul.bf16.gmra.mxu3 %v2825_v29  ;;  %v2832_v29 = vld [vmem:[%s4720_s2 + $0x68] sm:$0xff] }
 0x173   :  { %v3488_v25 = vpop.permute.xlu2 %577 }
 0x177   :  { %v3493_v39 = vpop.permute.xlu0 %687  ;;  %v3495_v21 = vpop.permute.xlu1 %657 }
 0x17b   :  { %v3497_v52 = vpop.permute.xlu2 %662 }
 0x17e   :  { %834 = vmatmul.bf16.gmra.mxu2 %v2826_v49 }
 0x17f   :  { %923 = vmatmul.bf16.gmra.mxu3 %v2826_v49  ;;  %v3501_v32 = vpop.permute.xlu1 %572 }
 0x183   :  { %v3499_v31 = vpop.permute.xlu0 %682  ;;  %v3506_v60 = vpop.permute.xlu2 %647 }
 0x187   :  { %v3512_v16 = vpop.permute.xlu1 %557 }
 0x18b   :  { %v3508_v1 = vpop.permute.xlu0 %667  ;;  %v3517_v56 = vpop.permute.xlu2 %562 }
 0x18e   :  { %839 = vmatmul.bf16.gmra.mxu2 %v2827_v44 }
 0x18f   :  { %928 = vmatmul.bf16.gmra.mxu3 %v2827_v44 }
 0x193   :  { %v3519_v42 = vpop.permute.xlu0 %582 }
 0x19b   :  { %v3537_v15 = vpop.permute.xlu0 %567 }
 0x19e   :  { %844 = vmatmul.bf16.gmra.mxu2 %v2828_v46 }
 0x19f   :  { %933 = vmatmul.bf16.gmra.mxu3 %v2828_v46 }
 0x1a3   :  { %v3575_v46 = vpop.permute.xlu0 %652 }
 0x1ae   :  { %849 = vmatmul.bf16.gmra.mxu2 %v2829_v18 }
 0x1af   :  { %938 = vmatmul.bf16.gmra.mxu3 %v2829_v18  ;;  %v3570_v17 = vpop.f32.mrf.mxu0 }
 0x1b1   :  { %v810_v51 = vpop.f32.mrf.mxu2 }
 0x1b2   :  { %v3510_v43 = vpop.f32.mrf.mxu3  ;;  %v811_v35 = vadd.f32 %v810_v51, %v3512_v16 }
 0x1b4   :  { %v1043_v3 = vmul.f32 %v3515_v41, %v811_v35  ;;  %vm978_vm6 = vcmp.ge.f32.partialorder %v811_v35, 0.0 }
 0x1b6   :  { %v3529_v9 = vsel %vm978_vm6, %v811_v35, %v1043_v3 }
 0x1b7   :  { %v3579_v35 = vpop.f32.mrf.mxu0 }
 0x1b9   :  { %v812_v58 = vpop.f32.mrf.mxu2 }
 0x1ba   :  { %v813_v7 = vadd.f32 %v812_v58, %v3517_v56  ;;  %v3523_v55 = vpop.f32.mrf.mxu3 }
 0x1bc   :  { %vm980_vm7 = vcmp.ge.f32.partialorder %v813_v7, 0.0  ;;  %v1045_v38 = vmul.f32 %v3515_v41, %v813_v7 }
 0x1be   :  { %854 = vmatmul.bf16.gmra.mxu2 %v2830_v59  ;;  %v3531_v53 = vsel %vm980_vm7, %v813_v7, %v1045_v38  ;;  %v3583_v7 = vpop.permute.xlu1 %642 }
 0x1bf   :  { %943 = vmatmul.bf16.gmra.mxu3 %v2830_v59 }
 0x1c1   :  { %v815_v54 = vpop.f32.mrf.mxu2 }
 0x1c2   :  { %v3535_v22 = vpop.f32.mrf.mxu3  ;;  %v816_v61 = vadd.f32 %v815_v54, %v3537_v15  ;;  %v3587_v54 = vpop.permute.xlu0 %637 }
 0x1c4   :  { %v1047_v34 = vmul.f32 %v3515_v41, %v816_v61  ;;  %vm982_vm8 = vcmp.ge.f32.partialorder %v816_v61, 0.0 }
 0x1c6   :  { %v3548_v36 = vsel %vm982_vm8, %v816_v61, %v1047_v34 }
 0x1c9   :  { %v817_v37 = vpop.f32.mrf.mxu2 }
 0x1ca   :  { %v818_v13 = vadd.f32 %v817_v37, %v3501_v32  ;;  %v3542_v19 = vpop.f32.mrf.mxu3 }
 0x1cc   :  { %vm984_vm9 = vcmp.ge.f32.partialorder %v818_v13, 0.0  ;;  %v1049_v6 = vmul.f32 %v3515_v41, %v818_v13 }
 0x1ce   :  { %859 = vmatmul.bf16.gmra.mxu2 %v2831_v20  ;;  %v3550_v23 = vsel %vm984_vm9, %v818_v13, %v1049_v6  ;;  %v900_v6 = vadd.f32 %v3510_v43, %v3512_v16 }
 0x1cf   :  { %948 = vmatmul.bf16.gmra.mxu3 %v2831_v20 }
 0x1d0   :  { %vm979_vm2 = vcmp.ge.f32.partialorder %v900_v6, 0.0 }
 0x1d1   :  { %v3554_v57 = vpop.f32.mrf.mxu2 }
 0x1d2   :  { %v3556_v24 = vpop.f32.mrf.mxu3 }
 0x1d9   :  { %v822_v62 = vpop.f32.mrf.mxu2 }
 0x1da   :  { %v3558_v28 = vpop.f32.mrf.mxu3 }
 0x1de   :  { %864 = vmatmul.bf16.gmra.mxu2 %v2832_v29 }
 0x1df   :  { %953 = vmatmul.bf16.gmra.mxu3 %v2832_v29 }
 0x1e1   :  { %v825_v4 = vpop.f32.mrf.mxu2 }
 0x1e2   :  { %v3563_v10 = vpop.f32.mrf.mxu3  ;;  %v826_v43 = vadd.f32 %v825_v4, %v3475_v48 }
 0x1e4   :  { %vm990_vm5 = vcmp.ge.f32.partialorder %v826_v43, 0.0 }
 0x1e9   :  { %v827_v49 = vpop.f32.mrf.mxu2 }
 0x1ea   :  { %v3565_v12 = vpop.f32.mrf.mxu3  ;;  %v828_v29 = vadd.f32 %v827_v49, %v3477_v14 }
 0x1ec   :  { %vm992_vm3 = vcmp.ge.f32.partialorder %v828_v29, 0.0 }
 0x1ee   :  { %869 = vmatmul.bf16.gmra.mxu2 %v2833_v11 }
 0x1ef   :  { %958 = vmatmul.bf16.gmra.mxu3 %v2833_v11 }
 0x1f1   :  { %v830_v30 = vpop.f32.mrf.mxu2 }
 0x1f2   :  { %v919_v0 = vpop.f32.mrf.mxu3  ;;  %v831_v37 = vadd.f32 %v830_v30, %v3456_v50  ;;  %v902_v30 = vadd.f32 %v3523_v55, %v3517_v56  ;;  %v1044_v55 = vmul.f32 %v3515_v41, %v900_v6 }
 0x1f3   :  { %v920_v3 = vadd.f32 %v919_v0, %v3456_v50 }
 0x1f4   :  { %v1059_v16 = vmul.f32 %v3515_v41, %v831_v37  ;;  %vm994_vm15 = vcmp.ge.f32.partialorder %v831_v37, 0.0  ;;  %vm981_vm4 = vcmp.ge.f32.partialorder %v902_v30, 0.0 }
 0x1f5   :  { %v1060_v11 = vmul.f32 %v3515_v41, %v920_v3  ;;  %vm995_vm12 = vcmp.ge.f32.partialorder %v920_v3, 0.0 }
 0x1f7   :  { %v3607_v33 = vsel %vm995_vm12, %v920_v3, %v1060_v11  ;;  %v821_v3 = vadd.f32 %v3554_v57, %v3488_v25  ;;  %v1123_v11 = vsel %vm994_vm15, %v831_v37, %v1059_v16 }
 0x1f9   :  { %v832_v44 = vpop.f32.mrf.mxu2  ;;  %v1051_v37 = vmul.f32 %v3515_v41, %v821_v3  ;;  %vm986_vm7 = vcmp.ge.f32.partialorder %v821_v3, 0.0 }
 0x1fa   :  { %v921_v40 = vpop.f32.mrf.mxu3  ;;  %v833_v59 = vadd.f32 %v832_v44, %v3462_v47  ;;  %v805_v44 = vpop.f32.mrf.mxu0 }
 0x1fb   :  { %v922_v38 = vadd.f32 %v921_v40, %v3462_v47 }
 0x1fc   :  { %v1061_v47 = vmul.f32 %v3515_v41, %v833_v59  ;;  %vm996_vm13 = vcmp.ge.f32.partialorder %v833_v59, 0.0 }
 0x1fd   :  { %v1062_v0 = vmul.f32 %v3515_v41, %v922_v38  ;;  %vm997_vm14 = vcmp.ge.f32.partialorder %v922_v38, 0.0 }
 0x1fe   :  { %874 = vmatmul.bf16.gmra.mxu2 %v2834_v45  ;;  %v1125_v27 = vsel %vm996_vm13, %v833_v59, %v1061_v47  ;;  %v1055_v59 = vmul.f32 %v3515_v41, %v826_v43 }
 0x1ff   :  { %963 = vmatmul.bf16.gmra.mxu3 %v2834_v45  ;;  %v823_v45 = vadd.f32 %v822_v62, %v3519_v42  ;;  %v3609_v56 = vsel %vm997_vm14, %v922_v38, %v1062_v0  ;;  %v3622_v38 = vpop.permute.xlu0 %552  ;;  %v1175_v47 = vpack.c.bf16 %v1125_v27, %v1123_v11  ;;  %v905_v0 = vadd.f32 %v3535_v22, %v3537_v15 }
 0x200   :  { %v1176_v62 = vpack.c.bf16 %v3609_v56, %v3607_v33  ;;  %v1119_v16 = vsel %vm990_vm5, %v826_v43, %v1055_v59 }
 0x201   :  { %v835_v18 = vpop.f32.mrf.mxu2  ;;  %vm988_vm6 = vcmp.ge.f32.partialorder %v823_v45, 0.0  ;;  %vm983_vm8 = vcmp.ge.f32.partialorder %v905_v0, 0.0 }
 0x202   :  { %v3577_v51 = vpop.f32.mrf.mxu3  ;;  %v836_v58 = vadd.f32 %v835_v18, %v3440_v63  ;;  %v807_v15 = vpop.f32.mrf.mxu0 }
 0x203   :  { %v808_v59 = vadd.f32 %v807_v15, %v3622_v38 }
 0x204   :  { %v1063_v34 = vmul.f32 %v3515_v41, %v836_v58  ;;  %vm998_vm10 = vcmp.ge.f32.partialorder %v836_v58, 0.0 }
 0x206   :  { %v1127_v49 = vsel %vm998_vm10, %v836_v58, %v1063_v34  ;;  %v3614_v58 = vpop.permute.xlu1 %627  ;;  %v1046_v34 = vmul.f32 %v3515_v41, %v902_v30 }
 0x208   :  { %v3639_v27 = vsel %vm981_vm4, %v902_v30, %v1046_v34  ;;  %v1115_v34 = vsel %vm986_vm7, %v821_v3, %v1051_v37  ;;  %v1041_v37 = vmul.f32 %v3515_v41, %v808_v59 }
 0x209   :  { %v837_v61 = vpop.f32.mrf.mxu2 }
 0x20a   :  { %v838_v13 = vadd.f32 %v837_v61, %v3448_v5  ;;  %v3592_v20 = vpop.f32.mrf.mxu3  ;;  %v1057_v61 = vmul.f32 %v3515_v41, %v828_v29 }
 0x20c   :  { %vm1000_vm11 = vcmp.ge.f32.partialorder %v838_v13, 0.0  ;;  %v1065_v50 = vmul.f32 %v3515_v41, %v838_v13  ;;  %v1121_v57 = vsel %vm992_vm3, %v828_v29, %v1057_v61 }
 0x20d   :  { %v1173_v22 = vpack.c.bf16 %v1121_v57, %v1119_v16  ;;  %v3655_v57 = vpop.permute.xlu0 %537 }
 0x20e   :  { %v1129_v40 = vsel %vm1000_vm11, %v838_v13, %v1065_v50  ;;  %v907_v50 = vadd.f32 %v3542_v19, %v3501_v32  ;;  %v1048_v19 = vmul.f32 %v3515_v41, %v905_v0  ;;  %v801_v16 = vadd.f32 %v3570_v17, %v3655_v57 }
 0x20f   :  { %v1177_v18 = vpack.c.bf16 %v1129_v40, %v1127_v49  ;;  %v1053_v49 = vmul.f32 %v3515_v41, %v823_v45  ;;  %v3634_v40 = vsel %vm979_vm2, %v900_v6, %v1044_v55  ;;  %v3645_v6 = vpop.permute.xlu2 %547  ;;  %vm976_vm11 = vcmp.ge.f32.partialorder %v808_v59, 0.0 }
 0x210   :  { %v1050_v29 = vmul.f32 %v3515_v41, %v907_v50  ;;  %vm985_vm9 = vcmp.ge.f32.partialorder %v907_v50, 0.0  ;;  %v806_v30 = vadd.f32 %v805_v44, %v3645_v6  ;;  %vm970_vm12 = vcmp.ge.f32.partialorder %v801_v16, 0.0 }
 0x211   :  { %v3612_v4 = vpop.f32.mrf.mxu2  ;;  %1355 = vmatpush.bf16.msra.mxu0 %v1177_v18  ;;  %v3637_v18 = vpop.f32.mrf.mxu1  ;;  %v1117_v61 = vsel %vm988_vm6, %v823_v45, %v1053_v49  ;;  %v3657_v45 = vsel %vm983_vm8, %v905_v0, %v1048_v19  ;;  %v925_v0 = vadd.f32 %v3577_v51, %v3440_v63  ;;  %v1035_v15 = vmul.f32 %v3515_v41, %v801_v16 }
 0x212   :  { %v3624_v13 = vpop.f32.mrf.mxu3  ;;  %v1171_v11 = vpack.c.bf16 %v1117_v61, %v1115_v34  ;;  %v3659_v49 = vsel %vm985_vm9, %v907_v50, %v1050_v29  ;;  %v1039_v3 = vmul.f32 %v3515_v41, %v806_v30  ;;  %v927_v50 = vadd.f32 %v3592_v20, %v3448_v5 }
 0x213   :  { %vm974_vm10 = vcmp.ge.f32.partialorder %v806_v30, 0.0  ;;  %v4736_v29 = vpack.c.bf16 %v3550_v23, %v3548_v36  ;;  %v1105_v5 = vsel %vm976_vm11, %v808_v59, %v1041_v37  ;;  %v1064_v20 = vmul.f32 %v3515_v41, %v925_v0 }
 0x214   :  { %v1103_v51 = vsel %vm974_vm10, %v806_v30, %v1039_v3  ;;  %v1066_v34 = vmul.f32 %v3515_v41, %v927_v50  ;;  %vm999_vm14 = vcmp.ge.f32.partialorder %v925_v0, 0.0  ;;  %vm1001_vm15 = vcmp.ge.f32.partialorder %v927_v50, 0.0 }
 0x215   :  { %1356 = vmatpush.bf16.msra.mxu0 %v1175_v47  ;;  %v3653_v47 = vpop.permute.xlu1 %542  ;;  %v4737_v36 = vpack.c.bf16 %v3531_v53, %v3529_v9  ;;  %v1165_v23 = vpack.c.bf16 %v1105_v5, %v1103_v51  ;;  %v915_v30 = vadd.f32 %v3563_v10, %v3475_v48  ;;  %v917_v59 = vadd.f32 %v3565_v12, %v3477_v14 }
 0x216   :  { %v1128_v3 = vsel %vm999_vm14, %v925_v0, %v1064_v20  ;;  %v910_v53 = vadd.f32 %v3556_v24, %v3488_v25  ;;  %v890_v33 = vadd.f32 %v3637_v18, %v3655_v57 }
 0x217   :  { %v1056_v48 = vmul.f32 %v3515_v41, %v915_v30  ;;  %v1058_v14 = vmul.f32 %v3515_v41, %v917_v59  ;;  %vm991_vm2 = vcmp.ge.f32.partialorder %v915_v30, 0.0  ;;  %vm993_vm3 = vcmp.ge.f32.partialorder %v917_v59, 0.0 }
 0x218   :  { %v1052_v10 = vmul.f32 %v3515_v41, %v910_v53  ;;  %vm987_vm4 = vcmp.ge.f32.partialorder %v910_v53, 0.0 }
 0x219   :  { %v3647_v43 = vpop.f32.mrf.mxu2  ;;  %1357 = vmatpush.bf16.msra.mxu0 %v1173_v22  ;;  %v803_v22 = vadd.f32 %v3579_v35, %v3653_v47  ;;  %v3673_v17 = vpop.f32.mrf.mxu1  ;;  %v1122_v0 = vsel %vm993_vm3, %v917_v59, %v1058_v14 }
 0x21a   :  { %v3650_v55 = vpop.f32.mrf.mxu3 }
 0x21b   :  { %v1037_v63 = vmul.f32 %v3515_v41, %v803_v22  ;;  %vm972_vm13 = vcmp.ge.f32.partialorder %v803_v22, 0.0 }
 0x21d   :  { %1358 = vmatpush.bf16.msra.mxu0 %v1171_v11 }
 0x221   :  { %v845_v19 = vpop.f32.mrf.mxu2  ;;  %1359 = vmatpush.bf16.msra.mxu0 %v4736_v29  ;;  %v1101_v29 = vsel %vm972_vm13, %v803_v22, %v1037_v63  ;;  %v894_v9 = vpop.f32.mrf.mxu1  ;;  %v1120_v22 = vsel %vm991_vm2, %v915_v30, %v1056_v48  ;;  %v1036_v30 = vmul.f32 %v3515_v41, %v890_v33 }
 0x222   :  { %v3680_v35 = vadd.f32 %v845_v19, %v3614_v58  ;;  %v934_v61 = vpop.f32.mrf.mxu3  ;;  %v1099_v19 = vsel %vm970_vm12, %v801_v16, %v1035_v15  ;;  %v912_v16 = vadd.f32 %v3558_v28, %v3519_v42  ;;  %v1174_v42 = vpack.c.bf16 %v1122_v0, %v1120_v22 }
 0x223   :  { %v3686_v11 = vadd.f32 %v934_v61, %v3614_v58  ;;  %v1130_v58 = vsel %vm1001_vm15, %v927_v50, %v1066_v34  ;;  %v1163_v61 = vpack.c.bf16 %v1101_v29, %v1099_v19  ;;  %v1116_v28 = vsel %vm987_vm4, %v910_v53, %v1052_v10 }
 0x224   :  { %v1178_v32 = vpack.c.bf16 %v1130_v58, %v1128_v3  ;;  %v1054_v12 = vmul.f32 %v3515_v41, %v912_v16  ;;  %vm989_vm5 = vcmp.ge.f32.partialorder %v912_v16, 0.0  ;;  %v895_v5 = vadd.f32 %v894_v9, %v3645_v6 }
 0x225   :  { %1360 = vmatpush.bf16.msra.mxu0 %v4737_v36  ;;  %vm971_vm12 = vcmp.ge.f32.partialorder %v890_v33, 0.0 }
 0x226   :  { %v1118_v50 = vsel %vm989_vm5, %v912_v16, %v1054_v12  ;;  %vm975_vm9 = vcmp.ge.f32.partialorder %v895_v5, 0.0  ;;  %v1100_v48 = vsel %vm971_vm12, %v890_v33, %v1036_v30  ;;  %v2919_v33 = vld [vmem:[%s4727_s9 + $0x68] sm:$0xff] }
 0x227   :  { %v1172_v51 = vpack.c.bf16 %v1118_v50, %v1116_v28 }
 0x229   :  { %v3696_v37 = vpop.f32.mrf.mxu2  ;;  %1361 = vmatpush.bf16.msra.mxu0 %v1165_v23  ;;  %v896_v15 = vpop.f32.mrf.mxu1 }
 0x22a   :  { %v3698_v44 = vpop.f32.mrf.mxu3  ;;  %v897_v20 = vadd.f32 %v896_v15, %v3622_v38  ;;  %v1040_v38 = vmul.f32 %v3515_v41, %v895_v5 }
 0x22c   :  { %v1042_v19 = vmul.f32 %v3515_v41, %v897_v20  ;;  %vm977_vm10 = vcmp.ge.f32.partialorder %v897_v20, 0.0  ;;  %v1104_v3 = vsel %vm975_vm9, %v895_v5, %v1040_v38  ;;  %v2918_v5 = vld [vmem:[%s4727_s9 + $0x60] sm:$0xff] }
 0x22d   :  { %1362 = vmatpush.bf16.msra.mxu0 %v1163_v61 }
 0x22e   :  { %v1106_v58 = vsel %vm977_vm10, %v897_v20, %v1042_v19  ;;  %v2922_v19 = vld [vmem:[%s4727_s9 + $0x58] sm:$0xff] }
 0x231   :  { %1453 = vmatpush.bf16.msrb.mxu0 %v1178_v32  ;;  %v850_v25 = vpop.f32.mrf.mxu2 }
 0x232   :  { %v939_v24 = vpop.f32.mrf.mxu3  ;;  %v851_v63 = vadd.f32 %v850_v25, %v3587_v54 }
 0x233   :  { %v940_v32 = vadd.f32 %v939_v24, %v3587_v54  ;;  %v892_v54 = vadd.f32 %v3673_v17, %v3653_v47 }
 0x234   :  { %vm1010_vm7 = vcmp.ge.f32.partialorder %v851_v63, 0.0 }
 0x235   :  { %1454 = vmatpush.bf16.msrb.mxu0 %v1176_v62  ;;  %v1076_v34 = vmul.f32 %v3515_v41, %v940_v32  ;;  %v1075_v62 = vmul.f32 %v3515_v41, %v851_v63  ;;  %vm1011_vm6 = vcmp.ge.f32.partialorder %v940_v32, 0.0  ;;  %v1038_v47 = vmul.f32 %v3515_v41, %v892_v54 }
 0x236   :  { %vm973_vm13 = vcmp.ge.f32.partialorder %v892_v54, 0.0 }
 0x237   :  { %v3727_v29 = vsel %vm1011_vm6, %v940_v32, %v1076_v34  ;;  %v3734_v17 = vsel %vm1010_vm7, %v851_v63, %v1075_v62  ;;  %v1102_v14 = vsel %vm973_vm13, %v892_v54, %v1038_v47  ;;  %v2994_v32 = vmov 2   ;;  %v2916_v63 = vld [vmem:[%s4727_s9 + $0x70] sm:$0xff]  ;;  %v2921_v62 = vld [vmem:[%s4727_s9 + $0x48] sm:$0xff] }
 0x238   :  { %v1164_v12 = vpack.c.bf16 %v1102_v14, %v1100_v48  ;;  %2899 = vset.pattern.permute.xlu1 %v2994_v32  ;;  %2900 = vset.pattern.permute.xlu2 %v2994_v32  ;;  %v2836_v54 = vld [vmem:[%s4721_s3 + $0x4] sm:$0xf0]  ;;  %v2925_v48 = vld [vmem:[%s4727_s9 + $0x30] sm:$0xff]  ;;  %v2926_v14 = vld [vmem:[%s4727_s9 + $0x38] sm:$0xff] }
 0x239   :  { %1455 = vmatpush.bf16.msrb.mxu0 %v1174_v42  ;;  %v852_v56 = vpop.f32.mrf.mxu2  ;;  %1268 = vperm.xlu1 %2899, %v2916_v63   ;;  %v2927_v63 = vld [vmem:[%s4727_s9 + $0x18] sm:$0xff] }
 0x23a   :  { %v853_v36 = vadd.f32 %v852_v56, %v3583_v7  ;;  %v941_v23 = vpop.f32.mrf.mxu3  ;;  %2901 = vset.pattern.permute.xlu0 %v2994_v32  ;;  %v2920_v56 = vld [vmem:[%s4727_s9 + $0x50] sm:$0xff] }
 0x23b   :  { %v942_v6 = vadd.f32 %v941_v23, %v3583_v7  ;;  %v4738_v7 = vpack.c.bf16 %v3659_v49, %v3657_v45  ;;  %v4739_v45 = vpack.c.bf16 %v3639_v27, %v3634_v40  ;;  %v1166_v49 = vpack.c.bf16 %v1106_v58, %v1104_v3  ;;  %1260 = vperm.xlu0 %2901, %v2918_v5   ;;  %v2651_v23 = vld [vmem:[%s4721_s3] sm:$0xf] }
 0x23c   :  { %vm1012_vm8 = vcmp.ge.f32.partialorder %v853_v36, 0.0  ;;  %v1077_v18 = vmul.f32 %v3515_v41, %v853_v36  ;;  %v3791_v38 = vor.u32 %v2836_v54, %v2651_v23  ;;  %v2659_v54 = vld [vmem:[%s4721_s3 + $0x10] sm:$0xf] }
 0x23d   :  { %1456 = vmatpush.bf16.msrb.mxu0 %v1172_v51  ;;  %vm1013_vm11 = vcmp.ge.f32.partialorder %v942_v6, 0.0  ;;  %v1078_v57 = vmul.f32 %v3515_v41, %v942_v6  ;;  %v2917_v51 = vld [vmem:[%s4727_s9 + $0x78] sm:$0xff] }
 0x23e   :  { %v3736_v59 = vsel %vm1012_vm8, %v853_v36, %v1077_v18  ;;  %1272 = vperm.xlu2 %2900, %v2917_v51   ;;  %v2923_v18 = vld [vmem:[%s4727_s9 + $0x40] sm:$0xff]  ;;  %1363 = vmatmul.bf16.vlgmr.msra.gmra.mxu0 %v3791_v38 }
 0x23f   :  { %v1183_v61 = vpack.c.bf16 %v3736_v59, %v3734_v17  ;;  %v3740_v9 = vsel %vm1013_vm11, %v942_v6, %v1078_v57  ;;  %v2924_v57 = vld [vmem:[%s4727_s9 + $0x20] sm:$0xff]  ;;  %vm1006_vm11 = vcmp.ge.f32.partialorder %v3680_v35, 0.0 }
 0x240   :  { %v1184_v53 = vpack.c.bf16 %v3740_v9, %v3727_v29  ;;  %v2691_v29 = vld [vmem:[%s4721_s3 + $0x50] sm:$0xf]  ;;  %v2846_v9 = vld [vmem:[%s4721_s3 + $0x54] sm:$0xf0] }
 0x241   :  { %1457 = vmatpush.bf16.msrb.mxu0 %v4738_v7  ;;  %v3744_v16 = vpop.f32.mrf.mxu2  ;;  %1264 = vperm.xlu1 %2899, %v2919_v33  }
 0x242   :  { %v3749_v10 = vpop.f32.mrf.mxu3 }
 0x243   :  { %1248 = vperm.xlu0 %2901, %v2921_v62  }
 0x245   :  { %1458 = vmatpush.bf16.msrb.mxu0 %v4739_v45 }
 0x246   :  { %1252 = vperm.xlu2 %2900, %v2920_v56  }
 0x249   :  { %1459 = vmatpush.bf16.msrb.mxu0 %v1166_v49  ;;  %v3751_v22 = vpop.f32.mrf.mxu2  ;;  %1256 = vperm.xlu1 %2899, %v2922_v19  }
 0x24a   :  { %v3753_v0 = vpop.f32.mrf.mxu3 }
 0x24b   :  { %1228 = vperm.xlu0 %2901, %v2924_v57   ;;  %v2928_v57 = vld [vmem:[%s4727_s9 + $0x28] sm:$0xff] }
 0x24d   :  { %1460 = vmatpush.bf16.msrb.mxu0 %v1164_v12 }
 0x24e   :  { %1244 = vperm.xlu2 %2900, %v2923_v18  }
 0x251   :  { %v3755_v25 = vpop.f32.mrf.mxu2  ;;  %1236 = vperm.xlu1 %2899, %v2925_v48   ;;  %v856_v48 = vadd.f32 %v3744_v16, %v3506_v60  ;;  %v2931_v16 = vld [vmem:[%s4727_s9 + $0x8] sm:$0xff] }
 0x252   :  { %v3757_v24 = vpop.f32.mrf.mxu3  ;;  %v861_v19 = vadd.f32 %v3755_v25, %v3495_v21  ;;  %v858_v25 = vadd.f32 %v3751_v22, %v3575_v46 }
 0x253   :  { %1224 = vperm.xlu0 %2901, %v2927_v63   ;;  %vm1014_vm9 = vcmp.ge.f32.partialorder %v856_v48, 0.0 }
 0x254   :  { %vm1018_vm7 = vcmp.ge.f32.partialorder %v861_v19, 0.0  ;;  %v1081_v63 = vmul.f32 %v3515_v41, %v858_v25  ;;  %vm1016_vm8 = vcmp.ge.f32.partialorder %v858_v25, 0.0 }
 0x256   :  { %1240 = vperm.xlu2 %2900, %v2926_v14   ;;  %v1083_v14 = vmul.f32 %v3515_v41, %v861_v19 }
 0x259   :  { %v862_v42 = vpop.f32.mrf.mxu2  ;;  %1232 = vperm.xlu1 %2899, %v2928_v57  }
 0x25a   :  { %v3759_v40 = vpop.f32.mrf.mxu3 }
 0x261   :  { %v865_v28 = vpop.f32.mrf.mxu2 }
 0x262   :  { %v3761_v50 = vpop.f32.mrf.mxu3  ;;  %v866_v51 = vadd.f32 %v865_v28, %v3508_v1 }
 0x264   :  { %vm1022_vm5 = vcmp.ge.f32.partialorder %v866_v51, 0.0 }
 0x269   :  { %v867_v27 = vpop.f32.mrf.mxu2 }
 0x26a   :  { %v3772_v20 = vpop.f32.mrf.mxu3  ;;  %v868_v12 = vadd.f32 %v867_v27, %v3483_v26  ;;  %v863_v27 = vadd.f32 %v862_v42, %v3497_v52  ;;  %v1087_v42 = vmul.f32 %v3515_v41, %v866_v51 }
 0x26c   :  { %v1089_v62 = vmul.f32 %v3515_v41, %v868_v12  ;;  %vm1024_vm4 = vcmp.ge.f32.partialorder %v868_v12, 0.0  ;;  %vm1020_vm6 = vcmp.ge.f32.partialorder %v863_v27, 0.0 }
 0x271   :  { %v870_v15 = vpop.f32.mrf.mxu2 }
 0x272   :  { %v3783_v36 = vpop.f32.mrf.mxu3  ;;  %v871_v3 = vadd.f32 %v870_v15, %v3464_v2 }
 0x274   :  { %v1091_v5 = vmul.f32 %v3515_v41, %v871_v3  ;;  %vm1026_vm3 = vcmp.ge.f32.partialorder %v871_v3, 0.0 }
 0x276   :  { %v1155_v18 = vsel %vm1026_vm3, %v871_v3, %v1091_v5  ;;  %v1079_v5 = vmul.f32 %v3515_v41, %v856_v48 }
 0x279   :  { %v872_v34 = vpop.f32.mrf.mxu2 }
 0x27a   :  { %v873_v47 = vadd.f32 %v872_v34, %v3499_v31  ;;  %v3806_v58 = vpop.f32.mrf.mxu3 }
 0x27c   :  { %v1093_v15 = vmul.f32 %v3515_v41, %v873_v47  ;;  %vm1028_vm2 = vcmp.ge.f32.partialorder %v873_v47, 0.0 }
 0x27e   :  { %v1157_v23 = vsel %vm1028_vm2, %v873_v47, %v1093_v15  ;;  %v1151_v15 = vsel %vm1022_vm5, %v866_v51, %v1087_v42 }
 0x27f   :  { %v1191_v47 = vpack.c.bf16 %v1157_v23, %v1155_v18  ;;  %v1143_v23 = vsel %vm1014_vm9, %v856_v48, %v1079_v5  ;;  %v2667_v18 = vld [vmem:[%s4721_s3 + $0x20] sm:$0xf]  ;;  %v952_v5 = vadd.f32 %v3759_v40, %v3497_v52  ;;  %v2675_v52 = vld [vmem:[%s4721_s3 + $0x30] sm:$0xf]  ;;  %v2842_v40 = vld [vmem:[%s4721_s3 + $0x34] sm:$0xf0] }
 0x281   :  { %v875_v6 = vpop.f32.mrf.mxu2 }
 0x282   :  { %v876_v30 = vadd.f32 %v875_v6, %v3493_v39  ;;  %v2838_v6 = vld [vmem:[%s4721_s3 + $0x14] sm:$0xf0]  ;;  %v964_v3 = vpop.f32.mrf.mxu3 }
 0x283   :  { %v3832_v28 = vor.u32 %v2838_v6, %v2659_v54 }
 0x284   :  { %v1095_v45 = vmul.f32 %v3515_v41, %v876_v30  ;;  %vm1030_vm14 = vcmp.ge.f32.partialorder %v876_v30, 0.0 }
 0x285   :  { %1368 = vmatmul.bf16.gmra.mxu0 %v3832_v28 }
 0x286   :  { %v1159_v34 = vsel %vm1030_vm14, %v876_v30, %v1095_v45  ;;  %v2929_v30 = vld [vmem:[%s4727_s9 + $0x10] sm:$0xff]  ;;  %v1153_v45 = vsel %vm1024_vm4, %v868_v12, %v1089_v62  ;;  %v1147_v12 = vsel %vm1018_vm7, %v861_v19, %v1083_v14 }
 0x287   :  { %1220 = vperm.xlu2 %2900, %v2929_v30  }
 0x289   :  { %v877_v7 = vpop.f32.mrf.mxu2 }
 0x28a   :  { %v878_v49 = vadd.f32 %v877_v7, %v3450_v8  ;;  %v1085_v7 = vmul.f32 %v3515_v41, %v863_v27  ;;  %v966_v62 = vpop.f32.mrf.mxu3 }
 0x28b   :  { %v967_v57 = vadd.f32 %v966_v62, %v3450_v8  ;;  %v962_v8 = vadd.f32 %v3806_v58, %v3499_v31  ;;  %v957_v58 = vadd.f32 %v3772_v20, %v3483_v26  ;;  %v3930_v62 = vor.u32 %v2842_v40, %v2675_v52 }
 0x28c   :  { %vm1032_vm15 = vcmp.ge.f32.partialorder %v878_v49, 0.0  ;;  %v1097_v32 = vmul.f32 %v3515_v41, %v878_v49  ;;  %v1149_v22 = vsel %vm1020_vm6, %v863_v27, %v1085_v7  ;;  %v3863_v27 = vpop.permute.xlu0 %622  ;;  %vm1021_vm6 = vcmp.ge.f32.partialorder %v952_v5, 0.0 }
 0x28d   :  { %v1187_v51 = vpack.c.bf16 %v1149_v22, %v1147_v12  ;;  %v843_v19 = vadd.f32 %v3647_v43, %v3863_v27  ;;  %v1071_v43 = vmul.f32 %v3515_v41, %v3680_v35  ;;  %v1098_v48 = vmul.f32 %v3515_v41, %v967_v57 }
 0x28e   :  { %v1161_v33 = vsel %vm1032_vm15, %v878_v49, %v1097_v32  ;;  %v3848_v49 = vpop.permute.xlu2 %632  ;;  %v1189_v32 = vpack.c.bf16 %v1153_v45, %v1151_v15  ;;  %vm1033_vm13 = vcmp.ge.f32.partialorder %v967_v57, 0.0  ;;  %v1094_v17 = vmul.f32 %v3515_v41, %v962_v8 }
 0x28f   :  { %v1193_v56 = vpack.c.bf16 %v1161_v33, %v1159_v34  ;;  %v2930_v34 = vld [vmem:[%s4727_s9] sm:$0xff]  ;;  %1216 = vperm.xlu2 %2900, %v2931_v16   ;;  %v848_v33 = vadd.f32 %v3696_v37, %v3848_v49  ;;  %v2840_v37 = vld [vmem:[%s4721_s3 + $0x24] sm:$0xf0]  ;;  %v1069_v7 = vmul.f32 %v3515_v41, %v843_v19  ;;  %vm1004_vm12 = vcmp.ge.f32.partialorder %v843_v19, 0.0 }
 0x290   :  { %1212 = vperm.xlu1 %2899, %v2930_v34   ;;  %v3877_v30 = vor.u32 %v2840_v37, %v2667_v18  ;;  %v1162_v59 = vsel %vm1033_vm13, %v967_v57, %v1098_v48  ;;  %vm1029_vm2 = vcmp.ge.f32.partialorder %v962_v8, 0.0  ;;  %v1090_v12 = vmul.f32 %v3515_v41, %v957_v58 }
 0x291   :  { %1404 = vmatpush.bf16.msra.mxu1 %v1193_v56  ;;  %v1145_v56 = vsel %vm1016_vm8, %v858_v25, %v1081_v63  ;;  %v1073_v42 = vmul.f32 %v3515_v41, %v848_v33  ;;  %vm1008_vm10 = vcmp.ge.f32.partialorder %v848_v33, 0.0  ;;  %v965_v25 = vadd.f32 %v964_v3, %v3493_v39 }
 0x292   :  { %v1185_v6 = vpack.c.bf16 %v1145_v56, %v1143_v23  ;;  %v1135_v39 = vsel %vm1006_vm11, %v3680_v35, %v1071_v43  ;;  %v960_v3 = vadd.f32 %v3783_v36, %v3464_v2  ;;  %v1133_v31 = vsel %vm1004_vm12, %v843_v19, %v1069_v7  ;;  %v2835_v35 = vld [vmem:[%s4721_s3 + $0x4] sm:$0xf]  ;;  %v2653_v2 = vld [vmem:[%s4721_s3 + $0x8] sm:$0xf0]  ;;  %v2661_v43 = vld [vmem:[%s4721_s3 + $0x18] sm:$0xf0] }
 0x293   :  { %v1137_v45 = vsel %vm1008_vm10, %v848_v33, %v1073_v42  ;;  %v1096_v14 = vmul.f32 %v3515_v41, %v965_v25  ;;  %vm1031_vm15 = vcmp.ge.f32.partialorder %v965_v25, 0.0  ;;  %v955_v36 = vadd.f32 %v3761_v50, %v3508_v1 }
 0x294   :  { %v1181_v15 = vpack.c.bf16 %v1137_v45, %v1135_v39  ;;  %vm1027_vm3 = vcmp.ge.f32.partialorder %v960_v3, 0.0  ;;  %v3910_v22 = vor.u32 %v2835_v35, %v2653_v2  ;;  %v1158_v34 = vsel %vm1029_vm2, %v962_v8, %v1094_v17  ;;  %v2841_v17 = vld [vmem:[%s4721_s3 + $0x34] sm:$0xf]  ;;  %v2699_v2 = vld [vmem:[%s4721_s3 + $0x60] sm:$0xf] }
 0x295   :  { %1405 = vmatpush.bf16.msra.mxu1 %v1191_v47  ;;  %1373 = vmatmul.bf16.gmra.mxu0 %v3877_v30  ;;  %v1160_v26 = vsel %vm1031_vm15, %v965_v25, %v1096_v14  ;;  %vm1025_vm4 = vcmp.ge.f32.partialorder %v957_v58, 0.0  ;;  %v950_v1 = vadd.f32 %v3757_v24, %v3495_v21  ;;  %v1088_v50 = vmul.f32 %v3515_v41, %v955_v36 }
 0x296   :  { %v3865_v54 = vpop.permute.xlu2 %617  ;;  %v1194_v63 = vpack.c.bf16 %v1162_v59, %v1160_v26  ;;  %vm1023_vm5 = vcmp.ge.f32.partialorder %v955_v36, 0.0  ;;  %v947_v21 = vadd.f32 %v3753_v0, %v3575_v46  ;;  %v1086_v24 = vmul.f32 %v3515_v41, %v952_v5  ;;  %v2677_v59 = vld [vmem:[%s4721_s3 + $0x38] sm:$0xf0]  ;;  %v2685_v26 = vld [vmem:[%s4721_s3 + $0x48] sm:$0xf0] }
 0x297   :  { %v841_v47 = vadd.f32 %v3612_v4, %v3865_v54  ;;  %v1154_v56 = vsel %vm1025_vm4, %v957_v58, %v1090_v12  ;;  %vm1019_vm7 = vcmp.ge.f32.partialorder %v950_v1, 0.0  ;;  %v937_v18 = vadd.f32 %v3698_v44, %v3848_v49 }
 0x298   :  { %v1082_v19 = vmul.f32 %v3515_v41, %v947_v21  ;;  %v1150_v42 = vsel %vm1021_vm6, %v952_v5, %v1086_v24  ;;  %vm1017_vm9 = vcmp.ge.f32.partialorder %v947_v21, 0.0  ;;  %v930_v25 = vadd.f32 %v3624_v13, %v3865_v54  ;;  %v2683_v13 = vld [vmem:[%s4721_s3 + $0x40] sm:$0xf]  ;;  %v2850_v5 = vld [vmem:[%s4721_s3 + $0x74] sm:$0xf0] }
 0x299   :  { %1406 = vmatpush.bf16.msra.mxu1 %v1189_v32  ;;  %v1067_v4 = vmul.f32 %v3515_v41, %v841_v47  ;;  %vm1002_vm14 = vcmp.ge.f32.partialorder %v841_v47, 0.0  ;;  %v1092_v32 = vmul.f32 %v3515_v41, %v960_v3  ;;  %v932_v44 = vadd.f32 %v3650_v55, %v3863_v27  ;;  %v2844_v55 = vld [vmem:[%s4721_s3 + $0x44] sm:$0xf0]  ;;  %v2701_v24 = vld [vmem:[%s4721_s3 + $0x68] sm:$0xf0] }
 0x29a   :  { %v1146_v57 = vsel %vm1017_vm9, %v947_v21, %v1082_v19  ;;  %v1072_v49 = vmul.f32 %v3515_v41, %v3686_v11  ;;  %v1074_v8 = vmul.f32 %v3515_v41, %v937_v18  ;;  %vm1007_vm10 = vcmp.ge.f32.partialorder %v3686_v11, 0.0  ;;  %v2847_v21 = vld [vmem:[%s4721_s3 + $0x64] sm:$0xf]  ;;  %v2849_v19 = vld [vmem:[%s4721_s3 + $0x74] sm:$0xf] }
 0x29b   :  { %v1156_v16 = vsel %vm1027_vm3, %v960_v3, %v1092_v32  ;;  %vm1009_vm11 = vcmp.ge.f32.partialorder %v937_v18, 0.0  ;;  %v1068_v48 = vmul.f32 %v3515_v41, %v930_v25  ;;  %v1070_v27 = vmul.f32 %v3515_v41, %v932_v44  ;;  %v2843_v32 = vld [vmem:[%s4721_s3 + $0x44] sm:$0xf] }
 0x29c   :  { %v1192_v33 = vpack.c.bf16 %v1158_v34, %v1156_v16  ;;  %v1136_v54 = vsel %vm1007_vm10, %v3686_v11, %v1072_v49  ;;  %v3964_v39 = vor.u32 %v2844_v55, %v2683_v13  ;;  %vm1003_vm12 = vcmp.ge.f32.partialorder %v930_v25, 0.0  ;;  %v2669_v11 = vld [vmem:[%s4721_s3 + $0x28] sm:$0xf0] }
 0x29d   :  { %1407 = vmatpush.bf16.msra.mxu1 %v1187_v51  ;;  %v945_v51 = vadd.f32 %v3749_v10, %v3506_v60  ;;  %v1084_v60 = vmul.f32 %v3515_v41, %v950_v1  ;;  %v1152_v10 = vsel %vm1023_vm5, %v955_v36, %v1088_v50  ;;  %vm1005_vm13 = vcmp.ge.f32.partialorder %v932_v44, 0.0  ;;  %v2693_v50 = vld [vmem:[%s4721_s3 + $0x58] sm:$0xf0] }
 0x29e   :  { %v1190_v23 = vpack.c.bf16 %v1154_v56, %v1152_v10  ;;  %v1132_v14 = vsel %vm1003_vm12, %v930_v25, %v1068_v48  ;;  %v3994_v35 = vor.u32 %v2841_v17, %v2677_v59  ;;  %v4050_v10 = vor.u32 %v2847_v21, %v2701_v24 }
 0x29f   :  { %vm1015_vm8 = vcmp.ge.f32.partialorder %v945_v51, 0.0  ;;  %v1148_v46 = vsel %vm1019_vm7, %v950_v1, %v1084_v60  ;;  %v2845_v1 = vld [vmem:[%s4721_s3 + $0x54] sm:$0xf] }
 0x2a0   :  { %v1188_v0 = vpack.c.bf16 %v1150_v42, %v1148_v46  ;;  %v4032_v16 = vor.u32 %v2845_v1, %v2693_v50  ;;  %v2709_v42 = vld [vmem:[%s4721_s3 + $0x78] sm:$0xf0] }
 0x2a1   :  { %1408 = vmatpush.bf16.msra.mxu1 %v1185_v6  ;;  %v1080_v6 = vmul.f32 %v3515_v41, %v945_v51  ;;  %v2839_v41 = vld [vmem:[%s4721_s3 + $0x24] sm:$0xf] }
 0x2a2   :  { %v3976_v58 = vor.u32 %v2839_v41, %v2669_v11 }
 0x2a3   :  { %v1144_v37 = vsel %vm1015_vm8, %v945_v51, %v1080_v6  ;;  %v4034_v51 = vpop.permute.xlu2 %1272 }
 0x2a4   :  { %v1186_v7 = vpack.c.bf16 %v1146_v57, %v1144_v37 }
 0x2a5   :  { %1409 = vmatpush.bf16.msra.mxu1 %v1183_v61  ;;  %v1131_v61 = vsel %vm1002_vm14, %v841_v47, %v1067_v4  ;;  %1378 = vmatmul.bf16.gmra.mxu0 %v3930_v62  ;;  %v2837_v47 = vld [vmem:[%s4721_s3 + $0x14] sm:$0xf]  ;;  %v1138_v4 = vsel %vm1009_vm11, %v937_v18, %v1074_v8 }
 0x2a6   :  { %v1179_v20 = vpack.c.bf16 %v1133_v31, %v1131_v61  ;;  %v3946_v45 = vor.u32 %v2837_v47, %v2661_v43  ;;  %v1182_v3 = vpack.c.bf16 %v1138_v4, %v1136_v54  ;;  %v2848_v61 = vld [vmem:[%s4721_s3 + $0x64] sm:$0xf0] }
 0x2a7   :  { %v4003_v36 = vor.u32 %v2848_v61, %v2699_v2 }
 0x2a9   :  { %1410 = vmatpush.bf16.msra.mxu1 %v1181_v15  ;;  %v1134_v15 = vsel %vm1005_vm13, %v932_v44, %v1070_v27 }
 0x2aa   :  { %v1180_v31 = vpack.c.bf16 %v1134_v15, %v1132_v14 }
 0x2ab   :  { %v4024_v34 = vpop.permute.xlu1 %1268  ;;  %v4040_v40 = vpop.permute.xlu2 %1252 }
 0x2ad   :  { %1411 = vmatpush.bf16.msra.mxu1 %v1179_v20  ;;  %v4012_v20 = vor.u32 %v2843_v32, %v2685_v26  ;;  %v4071_v47 = vpop.permute.xlu0 %1260 }
 0x2b0   :  { %1412 = vmatmul.bf16.vlgmr.msra.gmra.mxu1 %v3910_v22 }
 0x2b1   :  { %1502 = vmatpush.bf16.msrb.mxu1 %v1194_v63  ;;  %v2707_v63 = vld [vmem:[%s4721_s3 + $0x70] sm:$0xf]  ;;  %s2713_s3 = sld [smem:[#allocation2 + $0x2]] }
 0x2b2   :  { %v4021_v12 = vor.u32 %v2850_v5, %v2707_v63 }
 0x2b3   :  { %v4053_v6 = vpop.permute.xlu2 %1244 }
 0x2b5   :  { %1503 = vmatpush.bf16.msrb.mxu1 %v1192_v33  ;;  %1383 = vmatmul.bf16.gmra.mxu0 %v3964_v39  ;;  %v4036_v33 = vpop.permute.xlu1 %1264  ;;  %v4079_v44 = vpop.permute.xlu0 %1248 }
 0x2b7   :  { %v4084_v55 = vstv %s2713_s3 }
 0x2b9   :  { %1504 = vmatpush.bf16.msrb.mxu1 %v1190_v23 }
 0x2bb   :  { %v1364_v52 = vpop.f32.mrf.mxu0  ;;  %v4066_v18 = vpop.permute.xlu2 %1240 }
 0x2bd   :  { %1505 = vmatpush.bf16.msrb.mxu1 %v1188_v0  ;;  %v4048_v56 = vpop.permute.xlu1 %1256  ;;  %v4064_v0 = vor.u32 %v2849_v19, %v2709_v42 }
 0x2c0   :  { %1417 = vmatmul.bf16.gmra.mxu1 %v3946_v45 }
 0x2c1   :  { %1506 = vmatpush.bf16.msrb.mxu1 %v1186_v7 }
 0x2c3   :  { %v1366_v60 = vpop.f32.mrf.mxu0 }
 0x2c5   :  { %1507 = vmatpush.bf16.msrb.mxu1 %v1184_v53  ;;  %v3985_v53 = vor.u32 %v2846_v9, %v2691_v29 }
 0x2c7   :  { %1388 = vmatmul.bf16.gmra.mxu0 %v3985_v53 }
 0x2c9   :  { %1508 = vmatpush.bf16.msrb.mxu1 %v1182_v3  ;;  %v4089_v3 = vpop.permute.xlu0 %1228 }
 0x2cd   :  { %1509 = vmatpush.bf16.msrb.mxu1 %v1180_v31 }
 0x2d0   :  { %1422 = vmatmul.bf16.gmra.mxu1 %v3976_v58 }
 0x2d1   :  { %v4100_v9 = vpop.permute.xlu0 %1224 }
 0x2d7   :  { %1393 = vmatmul.bf16.gmra.mxu0 %v4003_v36 }
 0x2e0   :  { %1427 = vmatmul.bf16.gmra.mxu1 %v3994_v35 }
 0x2e7   :  { %1398 = vmatmul.bf16.gmra.mxu0 %v4021_v12 }
 0x2f0   :  { %1432 = vmatmul.bf16.gmra.mxu1 %v4012_v20 }
 0x2f7   :  { %1461 = vmatmul.bf16.vlgmr.msrb.gmra.mxu0 %v3791_v38  ;;  %v4055_v38 = vpop.permute.xlu1 %1236 }
 0x2ff   :  { %v4068_v37 = vpop.permute.xlu1 %1232 }
 0x300   :  { %1437 = vmatmul.bf16.gmra.mxu1 %v4032_v16 }
 0x302   :  { %v1369_v23 = vpop.f32.mrf.mxu0 }
 0x307   :  { %1466 = vmatmul.bf16.gmra.mxu0 %v3832_v28  ;;  %v4074_v28 = vpop.permute.xlu2 %1220  ;;  %v4076_v43 = vpop.permute.xlu1 %1212 }
 0x308   :  { %v1365_v7 = vadd.f32 %v1364_v52, %v4076_v43  ;;  %v1370_v15 = vadd.f32 %v1369_v23, %v4074_v28 }
 0x30a   :  { %v1371_v46 = vpop.f32.mrf.mxu0 }
 0x30b   :  { %v1372_v59 = vadd.f32 %v1371_v46, %v4100_v9 }
 0x30f   :  { %v4082_v48 = vpop.permute.xlu2 %1216 }
 0x310   :  { %1442 = vmatmul.bf16.gmra.mxu1 %v4050_v10 }
 0x312   :  { %v1374_v57 = vpop.f32.mrf.mxu0 }
 0x313   :  { %v1375_v5 = vadd.f32 %v1374_v57, %v4089_v3 }
 0x317   :  { %1471 = vmatmul.bf16.gmra.mxu0 %v3877_v30  ;;  %v1367_v30 = vadd.f32 %v1366_v60, %v4082_v48 }
 0x31a   :  { %v1376_v25 = vpop.f32.mrf.mxu0 }
 0x31b   :  { %v1377_v24 = vadd.f32 %v1376_v25, %v4068_v37 }
 0x320   :  { %1447 = vmatmul.bf16.gmra.mxu1 %v4064_v0 }
 0x322   :  { %v1379_v13 = vpop.f32.mrf.mxu0 }
 0x323   :  { %v1380_v57 = vadd.f32 %v1379_v13, %v4055_v38 }
 0x327   :  { %1476 = vmatmul.bf16.gmra.mxu0 %v3930_v62 }
 0x32d   :  { %v1413_v49 = vpop.f32.mrf.mxu1 }
 0x32e   :  { %v1414_v8 = vadd.f32 %v1413_v49, %v1365_v7 }
 0x330   :  { %1510 = vmatmul.bf16.vlgmr.msrb.gmra.mxu1 %v3910_v22  ;;  %v1585_v54 = vmul.f32 %v4084_v55, %v1414_v8  ;;  %vm1552_vm14 = vcmp.ge.f32.partialorder %v1414_v8, 0.0  ;;  %v1381_v22 = vpop.f32.mrf.mxu0 }
 0x332   :  { %v4093_v31 = vsel %vm1552_vm14, %v1414_v8, %v1585_v54 }
 0x335   :  { %v1415_v27 = vpop.f32.mrf.mxu1 }
 0x336   :  { %v1416_v4 = vadd.f32 %v1415_v27, %v1367_v30  ;;  %v1382_v30 = vadd.f32 %v1381_v22, %v4066_v18 }
 0x337   :  { %1481 = vmatmul.bf16.gmra.mxu0 %v3964_v39 }
 0x338   :  { %v1587_v14 = vmul.f32 %v4084_v55, %v1416_v4  ;;  %vm1554_vm15 = vcmp.ge.f32.partialorder %v1416_v4, 0.0  ;;  %v1384_v17 = vpop.f32.mrf.mxu0 }
 0x33a   :  { %v4095_v41 = vsel %vm1554_vm15, %v1416_v4, %v1587_v14  ;;  %v1385_v14 = vadd.f32 %v1384_v17, %v4053_v6 }
 0x33b   :  { %v1649_v62 = vpack.c.bf16 %v4095_v41, %v4093_v31  ;;  %v1672_v31 = vld [vmem:[%s4727_s9 + $0x18] sm:$0x3] }
 0x33d   :  { %v1418_v11 = vpop.f32.mrf.mxu1 }
 0x33e   :  { %v1419_v29 = vadd.f32 %v1418_v11, %v1370_v15 }
 0x340   :  { %1515 = vmatmul.bf16.gmra.mxu1 %v3946_v45  ;;  %v1589_v61 = vmul.f32 %v4084_v55, %v1419_v29  ;;  %vm1556_vm2 = vcmp.ge.f32.partialorder %v1419_v29, 0.0  ;;  %v4106_v63 = vpop.f32.mrf.mxu0 }
 0x342   :  { %v4109_v45 = vsel %vm1556_vm2, %v1419_v29, %v1589_v61 }
 0x345   :  { %v1420_v2 = vpop.f32.mrf.mxu1 }
 0x346   :  { %v1421_v32 = vadd.f32 %v1420_v2, %v1372_v59 }
 0x347   :  { %1486 = vmatmul.bf16.gmra.mxu0 %v3985_v53 }
 0x348   :  { %v1591_v26 = vmul.f32 %v4084_v55, %v1421_v32  ;;  %vm1558_vm3 = vcmp.ge.f32.partialorder %v1421_v32, 0.0  ;;  %v1389_v21 = vpop.f32.mrf.mxu0 }
 0x34a   :  { %v4111_v1 = vsel %vm1558_vm3, %v1421_v32, %v1591_v26 }
 0x34b   :  { %v1651_v39 = vpack.c.bf16 %v4111_v1, %v4109_v45 }
 0x34d   :  { %v1423_v50 = vpop.f32.mrf.mxu1 }
 0x34e   :  { %v1424_v52 = vadd.f32 %v1423_v50, %v1375_v5 }
 0x350   :  { %1520 = vmatmul.bf16.gmra.mxu1 %v3976_v58  ;;  %v1593_v23 = vmul.f32 %v4084_v55, %v1424_v52  ;;  %vm1560_vm4 = vcmp.ge.f32.partialorder %v1424_v52, 0.0  ;;  %v1391_v46 = vpop.f32.mrf.mxu0 }
 0x352   :  { %v4121_v7 = vsel %vm1560_vm4, %v1424_v52, %v1593_v23 }
 0x355   :  { %v1425_v60 = vpop.f32.mrf.mxu1 }
 0x356   :  { %v1426_v19 = vadd.f32 %v1425_v60, %v1377_v24 }
 0x357   :  { %1491 = vmatmul.bf16.gmra.mxu0 %v4003_v36 }
 0x358   :  { %v1595_v42 = vmul.f32 %v4084_v55, %v1426_v19  ;;  %vm1562_vm5 = vcmp.ge.f32.partialorder %v1426_v19, 0.0  ;;  %v1394_v8 = vpop.f32.mrf.mxu0 }
 0x35a   :  { %v4123_v49 = vsel %vm1562_vm5, %v1426_v19, %v1595_v42 }
 0x35b   :  { %v1653_v58 = vpack.c.bf16 %v4123_v49, %v4121_v7 }
 0x35d   :  { %v1428_v53 = vpop.f32.mrf.mxu1 }
 0x35e   :  { %v1429_v25 = vadd.f32 %v1428_v53, %v1380_v57  ;;  %v1390_v57 = vadd.f32 %v1389_v21, %v4040_v40 }
 0x360   :  { %1525 = vmatmul.bf16.gmra.mxu1 %v3994_v35  ;;  %v1597_v54 = vmul.f32 %v4084_v55, %v1429_v25  ;;  %vm1564_vm6 = vcmp.ge.f32.partialorder %v1429_v25, 0.0  ;;  %v1396_v29 = vpop.f32.mrf.mxu0 }
 0x362   :  { %v4133_v15 = vsel %vm1564_vm6, %v1429_v25, %v1597_v54 }
 0x365   :  { %v1430_v27 = vpop.f32.mrf.mxu1 }
 0x366   :  { %v1431_v13 = vadd.f32 %v1430_v27, %v1382_v30 }
 0x367   :  { %1496 = vmatmul.bf16.gmra.mxu0 %v4021_v12  ;;  %v1397_v12 = vadd.f32 %v1396_v29, %v4036_v33 }
 0x368   :  { %v1599_v4 = vmul.f32 %v4084_v55, %v1431_v13  ;;  %vm1566_vm7 = vcmp.ge.f32.partialorder %v1431_v13, 0.0  ;;  %v1399_v2 = vpop.f32.mrf.mxu0 }
 0x369   :  { %v1400_v60 = vadd.f32 %v1399_v2, %v4024_v34 }
 0x36a   :  { %v4135_v11 = vsel %vm1566_vm7, %v1431_v13, %v1599_v4  ;;  %v1387_v13 = vadd.f32 %v4106_v63, %v4079_v44 }
 0x36b   :  { %v1655_v35 = vpack.c.bf16 %v4135_v11, %v4133_v15  ;;  %v4191_v11 = vld [vmem:[%s4722_s4] sm:$0xff] }
 0x36d   :  { %v1433_v36 = vpop.f32.mrf.mxu1 }
 0x36e   :  { %v4139_v22 = vadd.f32 %v1433_v36, %v1385_v14 }
 0x370   :  { %1530 = vmatmul.bf16.gmra.mxu1 %v4012_v20  ;;  %v1401_v17 = vpop.f32.mrf.mxu0  ;;  %v1395_v20 = vadd.f32 %v1394_v8, %v4071_v47  ;;  %vm1568_vm15 = vcmp.ge.f32.partialorder %v4139_v22, 0.0 }
 0x371   :  { %v1402_v42 = vadd.f32 %v1401_v17, %v4034_v51 }
 0x375   :  { %v1435_v59 = vpop.f32.mrf.mxu1 }
 0x376   :  { %v1436_v17 = vadd.f32 %v1435_v59, %v1387_v13  ;;  %v1601_v59 = vmul.f32 %v4084_v55, %v4139_v22 }
 0x378   :  { %v1462_v26 = vpop.f32.mrf.mxu0  ;;  %vm1570_vm14 = vcmp.ge.f32.partialorder %v1436_v17, 0.0 }
 0x37d   :  { %v1438_v61 = vpop.f32.mrf.mxu1 }
 0x37e   :  { %v1439_v4 = vadd.f32 %v1438_v61, %v1390_v57 }
 0x380   :  { %1535 = vmatmul.bf16.gmra.mxu1 %v4032_v16  ;;  %v1464_v52 = vpop.f32.mrf.mxu0  ;;  %v1605_v63 = vmul.f32 %v4084_v55, %v1439_v4  ;;  %vm1572_vm13 = vcmp.ge.f32.partialorder %v1439_v4, 0.0 }
 0x385   :  { %v1440_v32 = vpop.f32.mrf.mxu1 }
 0x388   :  { %v1467_v23 = vpop.f32.mrf.mxu0 }
 0x38d   :  { %v1443_v5 = vpop.f32.mrf.mxu1 }
 0x38e   :  { %v1444_v25 = vadd.f32 %v1443_v5, %v1395_v20  ;;  %v1603_v20 = vmul.f32 %v4084_v55, %v1436_v17 }
 0x390   :  { %1540 = vmatmul.bf16.gmra.mxu1 %v4050_v10  ;;  %v1392_v10 = vadd.f32 %v1391_v46, %v4048_v56  ;;  %v1469_v21 = vpop.f32.mrf.mxu0  ;;  %v1609_v14 = vmul.f32 %v4084_v55, %v1444_v25  ;;  %v1463_v46 = vadd.f32 %v1462_v26, %v4076_v43  ;;  %vm1576_vm11 = vcmp.ge.f32.partialorder %v1444_v25, 0.0 }
 0x391   :  { %v1637_v26 = vsel %vm1572_vm13, %v1439_v4, %v1605_v63  ;;  %v4232_v63 = vld [vmem:[%s4727_s9 + $0x8] sm:$0xff] }
 0x392   :  { %v1441_v54 = vadd.f32 %v1440_v32, %v1392_v10 }
 0x394   :  { %v1607_v32 = vmul.f32 %v4084_v55, %v1441_v54  ;;  %vm1574_vm12 = vcmp.ge.f32.partialorder %v1441_v54, 0.0 }
 0x395   :  { %v1445_v50 = vpop.f32.mrf.mxu1 }
 0x396   :  { %v1446_v16 = vadd.f32 %v1445_v50, %v1397_v12  ;;  %v1639_v43 = vsel %vm1574_vm12, %v1441_v54, %v1607_v32  ;;  %v1468_v54 = vadd.f32 %v1467_v23, %v4074_v28  ;;  %v1470_v28 = vadd.f32 %v1469_v21, %v4100_v9  ;;  %v2852_v21 = vld [vmem:[%s4722_s4 + $0x8] sm:$0x10] }
 0x397   :  { %v1659_v12 = vpack.c.bf16 %v1639_v43, %v1637_v26 }
 0x398   :  { %vm1578_vm10 = vcmp.ge.f32.partialorder %v1446_v16, 0.0 }
 0x39d   :  { %v1448_v24 = vpop.f32.mrf.mxu1 }
 0x39e   :  { %v1449_v19 = vadd.f32 %v1448_v24, %v1400_v60  ;;  %v1641_v24 = vsel %vm1576_vm11, %v1444_v25, %v1609_v14  ;;  %v1633_v25 = vsel %vm1568_vm15, %v4139_v22, %v1601_v59 }
 0x3a0   :  { %1545 = vmatmul.bf16.gmra.mxu1 %v4064_v0  ;;  %v1613_v30 = vmul.f32 %v4084_v55, %v1449_v19  ;;  %vm1580_vm8 = vcmp.ge.f32.partialorder %v1449_v19, 0.0  ;;  %v1611_v0 = vmul.f32 %v4084_v55, %v1446_v16 }
 0x3a2   :  { %v1645_v36 = vsel %vm1580_vm8, %v1449_v19, %v1613_v30  ;;  %v1643_v5 = vsel %vm1578_vm10, %v1446_v16, %v1611_v0  ;;  %v1472_v19 = vpop.f32.mrf.mxu0  ;;  %v1465_v16 = vadd.f32 %v1464_v52, %v4082_v48 }
 0x3a3   :  { %v1661_v60 = vpack.c.bf16 %v1643_v5, %v1641_v24  ;;  %v1473_v9 = vadd.f32 %v1472_v19, %v4089_v3 }
 0x3a5   :  { %v1450_v53 = vpop.f32.mrf.mxu1 }
 0x3a6   :  { %v1451_v27 = vadd.f32 %v1450_v53, %v1402_v42  ;;  %v1635_v42 = vsel %vm1570_vm14, %v1436_v17, %v1603_v20 }
 0x3a7   :  { %v1657_v30 = vpack.c.bf16 %v1635_v42, %v1633_v25 }
 0x3a8   :  { %v1615_v8 = vmul.f32 %v4084_v55, %v1451_v27  ;;  %vm1582_vm9 = vcmp.ge.f32.partialorder %v1451_v27, 0.0 }
 0x3aa   :  { %v1647_v29 = vsel %vm1582_vm9, %v1451_v27, %v1615_v8  ;;  %v1474_v22 = vpop.f32.mrf.mxu0 }
 0x3ab   :  { %v1663_v2 = vpack.c.bf16 %v1647_v29, %v1645_v36  ;;  %v1475_v3 = vadd.f32 %v1474_v22, %v4068_v37  ;;  %v4217_v36 = vld [vmem:[%s4727_s9 + $0x10] sm:$0xff] }
 0x3ad   :  { %v1511_v50 = vpop.f32.mrf.mxu1  ;;  %1705 = vmatpush.bf16.msrb.mxu2 %v1663_v2 }
 0x3ae   :  { %v1512_v61 = vadd.f32 %v1511_v50, %v1463_v46 }
 0x3b0   :  { %v1586_v53 = vmul.f32 %v4084_v55, %v1512_v61  ;;  %vm1553_vm2 = vcmp.ge.f32.partialorder %v1512_v61, 0.0 }
 0x3b1   :  { %1706 = vmatpush.bf16.msrb.mxu2 %v1661_v60 }
 0x3b2   :  { %v4170_v0 = vsel %vm1553_vm2, %v1512_v61, %v1586_v53  ;;  %v1477_v46 = vpop.f32.mrf.mxu0 }
 0x3b3   :  { %v1478_v32 = vadd.f32 %v1477_v46, %v4055_v38 }
 0x3b5   :  { %v1513_v57 = vpop.f32.mrf.mxu1  ;;  %1707 = vmatpush.bf16.msrb.mxu2 %v1659_v12 }
 0x3b6   :  { %v1514_v10 = vadd.f32 %v1513_v57, %v1465_v16 }
 0x3b8   :  { %v1588_v27 = vmul.f32 %v4084_v55, %v1514_v10  ;;  %vm1555_vm3 = vcmp.ge.f32.partialorder %v1514_v10, 0.0 }
 0x3b9   :  { %1708 = vmatpush.bf16.msrb.mxu2 %v1657_v30  ;;  %v4251_v30 = vld [vmem:[%s4727_s9] sm:$0xff] }
 0x3ba   :  { %v4172_v8 = vsel %vm1555_vm3, %v1514_v10, %v1588_v27 }
 0x3bb   :  { %v1650_v48 = vpack.c.bf16 %v4172_v8, %v4170_v0 }
 0x3bd   :  { %v1516_v52 = vpop.f32.mrf.mxu1  ;;  %1709 = vmatpush.bf16.msrb.mxu2 %v1655_v35  ;;  %v2995_v35 = vmov 3  }
 0x3be   :  { %v1517_v13 = vadd.f32 %v1516_v52, %v1468_v54  ;;  %2903 = vset.pattern.permute.xlu1 %v2995_v35  ;;  %2902 = vset.pattern.permute.xlu0 %v2995_v35 }
 0x3bf   :  { %1690 = vperm.xlu1 %2903, %v1672_v31   ;;  %2904 = vset.pattern.permute.xlu2 %v2995_v35 }
 0x3c0   :  { %v1590_v4 = vmul.f32 %v4084_v55, %v1517_v13  ;;  %vm1557_vm4 = vcmp.ge.f32.partialorder %v1517_v13, 0.0  ;;  %1685 = vperm.xlu0 %2902, %v4217_v36   ;;  %1675 = vperm.xlu2 %2904, %v4251_v30  }
 0x3c1   :  { %1710 = vmatpush.bf16.msrb.mxu2 %v1653_v58  ;;  %v1479_v58 = vpop.f32.mrf.mxu0 }
 0x3c2   :  { %v4197_v45 = vsel %vm1557_vm4, %v1517_v13, %v1590_v4  ;;  %v1480_v38 = vadd.f32 %v1479_v58, %v4066_v18 }
 0x3c5   :  { %v1518_v23 = vpop.f32.mrf.mxu1  ;;  %1711 = vmatpush.bf16.msrb.mxu2 %v1651_v39 }
 0x3c6   :  { %v1519_v14 = vadd.f32 %v1518_v23, %v1470_v28 }
 0x3c7   :  { %1680 = vperm.xlu1 %2903, %v4232_v63  }
 0x3c8   :  { %v1592_v15 = vmul.f32 %v4084_v55, %v1519_v14  ;;  %vm1559_vm5 = vcmp.ge.f32.partialorder %v1519_v14, 0.0 }
 0x3c9   :  { %1712 = vmatpush.bf16.msrb.mxu2 %v1649_v62  ;;  %v2720_v62 = vld [vmem:[%s4722_s4 + $0x8] sm:$0xf]  ;;  %v1482_v61 = vpop.f32.mrf.mxu0 }
 0x3ca   :  { %v4199_v1 = vsel %vm1559_vm5, %v1519_v14, %v1592_v15  ;;  %v4222_v17 = vor.u32 %v2852_v21, %v2720_v62  ;;  %v1483_v16 = vadd.f32 %v1482_v61, %v4053_v6 }
 0x3cb   :  { %v1652_v39 = vpack.c.bf16 %v4199_v1, %v4197_v45  ;;  %v56_v45 = vld [vmem:[%s4718_s0 + $0x18] sm:$0x11] }
 0x3cc   :  { %1713 = vmatmul.bf16.vlgmr.msrb.gmra.mxu2 %v4191_v11 }
 0x3cd   :  { %v1521_v7 = vpop.f32.mrf.mxu1 }
 0x3ce   :  { %v1522_v49 = vadd.f32 %v1521_v7, %v1473_v9 }
 0x3d0   :  { %v1594_v29 = vmul.f32 %v4084_v55, %v1522_v49  ;;  %vm1561_vm6 = vcmp.ge.f32.partialorder %v1522_v49, 0.0 }
 0x3d1   :  { %v1484_v59 = vpop.f32.mrf.mxu0 }
 0x3d2   :  { %v4225_v5 = vsel %vm1561_vm6, %v1522_v49, %v1594_v29 }
 0x3d5   :  { %v1523_v41 = vpop.f32.mrf.mxu1 }
 0x3d6   :  { %v1524_v2 = vadd.f32 %v1523_v41, %v1475_v3 }
 0x3d8   :  { %v1596_v37 = vmul.f32 %v4084_v55, %v1524_v2  ;;  %vm1563_vm7 = vcmp.ge.f32.partialorder %v1524_v2, 0.0 }
 0x3d9   :  { %v1487_v25 = vpop.f32.mrf.mxu0 }
 0x3da   :  { %v4227_v50 = vsel %vm1563_vm7, %v1524_v2, %v1596_v37  ;;  %v1488_v31 = vadd.f32 %v1487_v25, %v4040_v40 }
 0x3db   :  { %v1654_v24 = vpack.c.bf16 %v4227_v50, %v4225_v5  ;;  %v55_v5 = vld [vmem:[%s4718_s0 + $0x10] sm:$0xff] }
 0x3dc   :  { %1718 = vmatmul.bf16.gmra.mxu2 %v4222_v17  ;;  %v1747_v0 = vunpack.c.l.bf16 %v55_v5 }
 0x3dd   :  { %v1526_v60 = vpop.f32.mrf.mxu1 }
 0x3de   :  { %v1527_v20 = vadd.f32 %v1526_v60, %v1478_v32 }
 0x3e0   :  { %v1598_v26 = vmul.f32 %v4084_v55, %v1527_v20  ;;  %vm1565_vm8 = vcmp.ge.f32.partialorder %v1527_v20, 0.0 }
 0x3e1   :  { %v1489_v54 = vpop.f32.mrf.mxu0 }
 0x3e2   :  { %v4242_v42 = vsel %vm1565_vm8, %v1527_v20, %v1598_v26  ;;  %v1490_v41 = vadd.f32 %v1489_v54, %v4048_v56 }
 0x3e5   :  { %v1528_v43 = vpop.f32.mrf.mxu1 }
 0x3e6   :  { %v1529_v12 = vadd.f32 %v1528_v43, %v1480_v38 }
 0x3e8   :  { %v1600_v19 = vmul.f32 %v4084_v55, %v1529_v12  ;;  %vm1567_vm9 = vcmp.ge.f32.partialorder %v1529_v12, 0.0 }
 0x3e9   :  { %v1492_v52 = vpop.f32.mrf.mxu0 }
 0x3ea   :  { %v4244_v57 = vsel %vm1567_vm9, %v1529_v12, %v1600_v19  ;;  %v1493_v9 = vadd.f32 %v1492_v52, %v4071_v47 }
 0x3eb   :  { %v1656_v53 = vpack.c.bf16 %v4244_v57, %v4242_v42 }
 0x3ed   :  { %v1531_v10 = vpop.f32.mrf.mxu1 }
 0x3ee   :  { %v1532_v18 = vadd.f32 %v1531_v10, %v1483_v16 }
 0x3f0   :  { %v1602_v12 = vmul.f32 %v4084_v55, %v1532_v18  ;;  %vm1569_vm3 = vcmp.ge.f32.partialorder %v1532_v18, 0.0 }
 0x3f1   :  { %v1494_v13 = vpop.f32.mrf.mxu0 }
 0x3f2   :  { %v1495_v7 = vadd.f32 %v1494_v13, %v4036_v33  ;;  %v1485_v33 = vadd.f32 %v1484_v59, %v4079_v44  ;;  %v1634_v25 = vsel %vm1569_vm3, %v1532_v18, %v1602_v12 }
 0x3f5   :  { %v1533_v27 = vpop.f32.mrf.mxu1 }
 0x3f6   :  { %v1534_v61 = vadd.f32 %v1533_v27, %v1485_v33 }
 0x3f8   :  { %v1604_v44 = vmul.f32 %v4084_v55, %v1534_v61  ;;  %vm1571_vm2 = vcmp.ge.f32.partialorder %v1534_v61, 0.0 }
 0x3f9   :  { %v1497_v4 = vpop.f32.mrf.mxu0 }
 0x3fa   :  { %v1498_v46 = vadd.f32 %v1497_v4, %v4024_v34  ;;  %v1636_v10 = vsel %vm1571_vm2, %v1534_v61, %v1604_v44 }
 0x3fb   :  { %v1658_v27 = vpack.c.bf16 %v1636_v10, %v1634_v25 }
 0x3fd   :  { %v1536_v6 = vpop.f32.mrf.mxu1 }
 0x401   :  { %v1499_v15 = vpop.f32.mrf.mxu0 }
 0x402   :  { %v1500_v35 = vadd.f32 %v1499_v15, %v4034_v51  ;;  %v1537_v51 = vadd.f32 %v1536_v6, %v1488_v31  ;;  %v1778_v31 = vld [vmem:[%s4727_s9 + $0x38] sm:$0xff] }
 0x404   :  { %v1606_v38 = vmul.f32 %v4084_v55, %v1537_v51  ;;  %vm1573_vm15 = vcmp.ge.f32.partialorder %v1537_v51, 0.0 }
 0x405   :  { %v1538_v22 = vpop.f32.mrf.mxu1 }
 0x406   :  { %v1539_v34 = vadd.f32 %v1538_v22, %v1490_v41  ;;  %v1638_v19 = vsel %vm1573_vm15, %v1537_v51, %v1606_v38  ;;  %v1777_v41 = vld [vmem:[%s4727_s9 + $0x30] sm:$0xff] }
 0x408   :  { %v1608_v60 = vmul.f32 %v4084_v55, %v1539_v34  ;;  %vm1575_vm14 = vcmp.ge.f32.partialorder %v1539_v34, 0.0 }
 0x40a   :  { %v1640_v59 = vsel %vm1575_vm14, %v1539_v34, %v1608_v60 }
 0x40b   :  { %v1660_v16 = vpack.c.bf16 %v1640_v59, %v1638_v19 }
 0x40d   :  { %v1541_v28 = vpop.f32.mrf.mxu1 }
 0x40e   :  { %v1542_v62 = vadd.f32 %v1541_v28, %v1493_v9  ;;  %v2853_v9 = vld [vmem:[%s4723_s5] sm:$0xff] }
 0x410   :  { %v1610_v40 = vmul.f32 %v4084_v55, %v1542_v62  ;;  %vm1577_vm13 = vcmp.ge.f32.partialorder %v1542_v62, 0.0 }
 0x412   :  { %v1642_v43 = vsel %vm1577_vm13, %v1542_v62, %v1610_v40  ;;  %v1776_v62 = vld [vmem:[%s4727_s9 + $0x28] sm:$0xff] }
 0x415   :  { %v1543_v23 = vpop.f32.mrf.mxu1 }
 0x416   :  { %v1544_v58 = vadd.f32 %v1543_v23, %v1495_v7  ;;  %v2854_v7 = vld [vmem:[%s4723_s5 + $0x8] sm:$0xff] }
 0x418   :  { %v1612_v2 = vmul.f32 %v4084_v55, %v1544_v58  ;;  %vm1579_vm12 = vcmp.ge.f32.partialorder %v1544_v58, 0.0 }
 0x41a   :  { %v1644_v20 = vsel %vm1579_vm12, %v1544_v58, %v1612_v2  ;;  %v2996_v58 = vmov 4   ;;  %vm2093_vm12 = vcmask 523264  }
 0x41b   :  { %v1662_v26 = vpack.c.bf16 %v1644_v20, %v1642_v43  ;;  %2907 = vset.pattern.permute.xlu1 %v2996_v58  ;;  %2906 = vset.pattern.permute.xlu0 %v2996_v58 }
 0x41c   :  { %2905 = vset.pattern.permute.xlu2 %v2996_v58  ;;  %1816 = vperm.xlu0 %2906, %v1778_v31  }
 0x41d   :  { %v1546_v14 = vpop.f32.mrf.mxu1  ;;  %1811 = vperm.xlu2 %2905, %v1777_v41  }
 0x41e   :  { %v1547_v49 = vadd.f32 %v1546_v14, %v1498_v46 }
 0x420   :  { %v1614_v21 = vmul.f32 %v4084_v55, %v1547_v49  ;;  %vm1581_vm10 = vcmp.ge.f32.partialorder %v1547_v49, 0.0 }
 0x422   :  { %v1646_v37 = vsel %vm1581_vm10, %v1547_v49, %v1614_v21  ;;  %v2855_v49 = vld [vmem:[%s4723_s5 + $0x10] sm:$0xff] }
 0x424   :  { %1781 = vperm.xlu0 %2906, %v4251_v30  }
 0x425   :  { %v1548_v3 = vpop.f32.mrf.mxu1  ;;  %1806 = vperm.xlu2 %2905, %v1776_v62  }
 0x426   :  { %v1549_v29 = vadd.f32 %v1548_v3, %v1500_v35  ;;  %v1775_v35 = vld [vmem:[%s4727_s9 + $0x20] sm:$0xff]  ;;  %v2856_v3 = vld [vmem:[%s4723_s5 + $0x18] sm:$0xff] }
 0x427   :  { %1801 = vperm.xlu1 %2907, %v1775_v35  }
 0x428   :  { %v1616_v47 = vmul.f32 %v4084_v55, %v1549_v29  ;;  %vm1583_vm11 = vcmp.ge.f32.partialorder %v1549_v29, 0.0 }
 0x42a   :  { %v1648_v32 = vsel %vm1583_vm11, %v1549_v29, %v1616_v47  ;;  %v1750_v47 = vunpack.c.h.bf16 %v56_v45 }
 0x42b   :  { %v1664_v56 = vpack.c.bf16 %v1648_v32, %v1646_v37 }
 0x42d   :  { %1724 = vmatpush.bf16.msrb.mxu3 %v1664_v56 }
 0x42f   :  { %1791 = vperm.xlu1 %2907, %v4217_v36   ;;  %v1774_v36 = vld [vmem:[%s4727_s9 + $0x18] sm:$0xff] }
 0x430   :  { %1796 = vperm.xlu2 %2905, %v1774_v36  }
 0x431   :  { %1725 = vmatpush.bf16.msrb.mxu3 %v1662_v26  ;;  %v1691_v54 = vpop.permute.xlu1 %1690 }
 0x432   :  { %v1686_v57 = vpop.permute.xlu0 %1685 }
 0x435   :  { %1726 = vmatpush.bf16.msrb.mxu3 %v1660_v16 }
 0x437   :  { %1786 = vperm.xlu1 %2907, %v4232_v63   ;;  %v1748_v63 = vunpack.c.h.bf16 %v55_v5 }
 0x439   :  { %1727 = vmatpush.bf16.msrb.mxu3 %v1658_v27  ;;  %v1681_v8 = vpop.permute.xlu1 %1680 }
 0x43d   :  { %1728 = vmatpush.bf16.msrb.mxu3 %v1656_v53 }
 0x441   :  { %1729 = vmatpush.bf16.msrb.mxu3 %v1654_v24 }
 0x445   :  { %1730 = vmatpush.bf16.msrb.mxu3 %v1652_v39  ;;  %v53_v39 = vld [vmem:[%s4718_s0] sm:$0xff] }
 0x446   :  { %v1743_v52 = vunpack.c.l.bf16 %v53_v39  ;;  %v1744_v60 = vunpack.c.h.bf16 %v53_v39 }
 0x449   :  { %1731 = vmatpush.bf16.msrb.mxu3 %v1650_v48  ;;  %v54_v48 = vld [vmem:[%s4718_s0 + $0x8] sm:$0xff]  ;;  %s2804_s0 = sld [smem:[#allocation2 + $0x5]] }
 0x44a   :  { %v1745_v53 = vunpack.c.l.bf16 %v54_v48  ;;  %v1746_v37 = vunpack.c.h.bf16 %v54_v48 }
 0x44c   :  { %1732 = vmatmul.bf16.vlgmr.msrb.gmra.mxu3 %v4191_v11  ;;  %v1676_v11 = vpop.permute.xlu2 %1675 }
 0x44f   :  { %v1714_v55 = vpop.f32.mrf.mxu2 }
 0x450   :  { %v4299_v6 = vadd.f32 %v1714_v55, %v1676_v11 }
 0x452   :  { %v1751_v4 = vsub.f32 %v1743_v52, %v4299_v6 }
 0x457   :  { %v1716_v18 = vpop.f32.mrf.mxu2 }
 0x458   :  { %v4297_v24 = vadd.f32 %v1716_v18, %v1681_v8 }
 0x45a   :  { %v1753_v23 = vsub.f32 %v1745_v53, %v4297_v24 }
 0x45c   :  { %1737 = vmatmul.bf16.gmra.mxu3 %v4222_v17  ;;  %v1749_v17 = vunpack.c.l.bf16 %v56_v45  ;;  %v1759_v15 = vpack.c.bf16 %v1753_v23, %v1751_v4  ;;  %v4370_v45 = vstv %s2746_s26 }
 0x45f   :  { %v1719_v42 = vpop.f32.mrf.mxu2 }
 0x460   :  { %v4289_v1 = vadd.f32 %v1719_v42, %v1686_v57 }
 0x462   :  { %v1755_v22 = vsub.f32 %v1747_v0, %v4289_v1 }
 0x467   :  { %v1721_v50 = vpop.f32.mrf.mxu2 }
 0x468   :  { %v4302_v13 = vadd.f32 %v1721_v50, %v1691_v54 }
 0x46a   :  { %v1757_v28 = vsub.f32 %v1749_v17, %v4302_v13 }
 0x46c   :  { %v1761_v14 = vpack.c.bf16 %v1757_v28, %v1755_v22 }
 0x46e   :  { %v1852_v46 = vsel %vm252_vm0, %v1761_v14, 0 }
 0x46f   :  { %1863 = vmatpush.bf16.msra.mxu2 %v1852_v46 }
 0x473   :  { %1864 = vmatpush.bf16.msra.mxu2 %v1759_v15 }
 0x476   :  { %2738 = vmatmul.msk.bf16.vlgmr.msra.gmra.mxu2 %vm227_vm1, %v2853_v9 }
 0x477   :  { %v4358_v25 = vpop.permute.xlu2 %1811 }
 0x47f   :  { %v4362_v18 = vpop.permute.xlu2 %1806 }
 0x486   :  { %2739 = vmatmul.msk.bf16.gmra.mxu2 %vm227_vm1, %v2854_v7 }
 0x48a   :  { %v4374_v48 = vpop.permute.xlu2 %1796 }
 0x496   :  { %2740 = vmatmul.msk.bf16.gmra.mxu2 %vm227_vm1, %v2855_v49 }
 0x499   :  { %v4360_v27 = vpop.permute.xlu1 %1801 }
 0x4a1   :  { %v4365_v42 = vpop.permute.xlu1 %1791 }
 0x4a6   :  { %2741 = vmatmul.msk.bf16.gmra.mxu2 %vm227_vm1, %v2856_v3 }
 0x4a9   :  { %v4384_v23 = vpop.permute.xlu1 %1786 }
 0x4cf   :  { %v1733_v21 = vpop.f32.mrf.mxu3 }
 0x4d0   :  { %v4350_v61 = vadd.f32 %v1733_v21, %v1676_v11 }
 0x4d2   :  { %v1752_v26 = vsub.f32 %v1744_v60, %v4350_v61 }
 0x4d7   :  { %v1735_v29 = vpop.f32.mrf.mxu3 }
 0x4d8   :  { %v4346_v40 = vadd.f32 %v1735_v29, %v1681_v8 }
 0x4da   :  { %v1754_v38 = vsub.f32 %v1746_v37, %v4346_v40  ;;  %v4403_v37 = vld [vmem:[%s4724_s6 + $0x8] sm:$0xff] }
 0x4dc   :  { %v1760_v44 = vpack.c.bf16 %v1754_v38, %v1752_v26  ;;  %v4426_v38 = vld [vmem:[%s4724_s6 + $0x20] sm:$0xff] }
 0x4df   :  { %v1738_v34 = vpop.f32.mrf.mxu3 }
 0x4e0   :  { %v4342_v2 = vadd.f32 %v1738_v34, %v1686_v57  ;;  %v4367_v57 = vpop.permute.xlu0 %1816 }
 0x4e2   :  { %v1756_v32 = vsub.f32 %v1748_v63, %v4342_v2 }
 0x4e7   :  { %v1740_v33 = vpop.f32.mrf.mxu3 }
 0x4e8   :  { %v4344_v51 = vadd.f32 %v1740_v33, %v1691_v54  ;;  %v4382_v28 = vpop.permute.xlu0 %1781  ;;  %v4396_v33 = vld [vmem:[%s4724_s6] sm:$0xff] }
 0x4ea   :  { %v1758_v56 = vsub.f32 %v1750_v47, %v4344_v51 }
 0x4ec   :  { %v1762_v20 = vpack.c.bf16 %v1758_v56, %v1756_v32  ;;  %v4410_v32 = vld [vmem:[%s4724_s6 + $0x10] sm:$0xff]  ;;  %v4417_v56 = vld [vmem:[%s4724_s6 + $0x18] sm:$0xff] }
 0x4ee   :  { %v1855_v43 = vsel %vm252_vm0, %v1762_v20, 0 }
 0x4ef   :  { %1892 = vmatpush.bf16.msra.mxu3 %v1855_v43 }
 0x4f3   :  { %1893 = vmatpush.bf16.msra.mxu3 %v1760_v44  ;;  %v4433_v44 = vld [vmem:[%s4724_s6 + $0x28] sm:$0xff] }
 0x4f6   :  { %2742 = vmatmul.msk.bf16.vlgmr.msra.gmra.mxu3 %vm227_vm1, %v2853_v9 }
 0x4f9   :  { %v1866_v59 = vpop.f32.mrf.mxu2 }
 0x501   :  { %v1868_v12 = vpop.f32.mrf.mxu2 }
 0x502   :  { %v1869_v58 = vadd.f32 %v1868_v12, %v4384_v23  ;;  %v2932_v12 = vld [vmem:[%s4727_s9 + $0x60] sm:$0xff] }
 0x504   :  { %v1935_v62 = vmul.f32 %v4370_v45, %v1869_v58  ;;  %vm1918_vm11 = vcmp.ge.f32.partialorder %v1869_v58, 0.0 }
 0x506   :  { %2743 = vmatmul.msk.bf16.gmra.mxu3 %vm227_vm1, %v2854_v7  ;;  %v1951_v63 = vsel %vm1918_vm11, %v1869_v58, %v1935_v62 }
 0x509   :  { %v1871_v19 = vpop.f32.mrf.mxu2 }
 0x50a   :  { %v1872_v50 = vadd.f32 %v1871_v19, %v4365_v42 }
 0x50c   :  { %v1937_v46 = vmul.f32 %v4370_v45, %v1872_v50  ;;  %vm1920_vm8 = vcmp.ge.f32.partialorder %v1872_v50, 0.0 }
 0x50e   :  { %v1953_v36 = vsel %vm1920_vm8, %v1872_v50, %v1937_v46  ;;  %v2940_v50 = vld [vmem:[%s4727_s9 + $0x58] sm:$0xff] }
 0x511   :  { %v1873_v16 = vpop.f32.mrf.mxu2 }
 0x512   :  { %v1874_v53 = vadd.f32 %v1873_v16, %v4374_v48  ;;  %v2933_v16 = vld [vmem:[%s4727_s9 + $0x78] sm:$0xff] }
 0x514   :  { %v1939_v15 = vmul.f32 %v4370_v45, %v1874_v53  ;;  %vm1922_vm9 = vcmp.ge.f32.partialorder %v1874_v53, 0.0 }
 0x516   :  { %2744 = vmatmul.msk.bf16.gmra.mxu3 %vm227_vm1, %v2855_v49  ;;  %v1867_v49 = vadd.f32 %v1866_v59, %v4382_v28  ;;  %v1955_v21 = vsel %vm1922_vm9, %v1874_v53, %v1939_v15  ;;  %v2997_v59 = vmov 5  }
 0x517   :  { %v1967_v29 = vpack.c.bf16 %v1955_v21, %v1953_v36  ;;  %2910 = vset.pattern.permute.xlu1 %v2997_v59  ;;  %2909 = vset.pattern.permute.xlu0 %v2997_v59  ;;  %v2944_v36 = vld [vmem:[%s4727_s9 + $0x18] sm:$0xff] }
 0x518   :  { %v1933_v41 = vmul.f32 %v4370_v45, %v1867_v49  ;;  %vm1916_vm10 = vcmp.ge.f32.partialorder %v1867_v49, 0.0  ;;  %2038 = vperm.xlu1 %2910, %v2932_v12   ;;  %2050 = vperm.xlu0 %2909, %v2933_v16   ;;  %v2947_v12 = vld [vmem:[%s4727_s9] sm:$0xff] }
 0x519   :  { %v1876_v10 = vpop.f32.mrf.mxu2  ;;  %2908 = vset.pattern.permute.xlu2 %v2997_v59 }
 0x51a   :  { %v1877_v0 = vadd.f32 %v1876_v10, %v4360_v27  ;;  %v1949_v34 = vsel %vm1916_vm10, %v1867_v49, %v1933_v41  ;;  %v2934_v10 = vld [vmem:[%s4727_s9 + $0x70] sm:$0xff] }
 0x51b   :  { %v1965_v47 = vpack.c.bf16 %v1951_v63, %v1949_v34  ;;  %2046 = vperm.xlu2 %2908, %v2934_v10   ;;  %v2946_v34 = vld [vmem:[%s4727_s9 + $0x28] sm:$0xff] }
 0x51c   :  { %v1941_v39 = vmul.f32 %v4370_v45, %v1877_v0  ;;  %vm1924_vm5 = vcmp.ge.f32.partialorder %v1877_v0, 0.0 }
 0x51e   :  { %v1957_v9 = vsel %vm1924_vm5, %v1877_v0, %v1941_v39  ;;  %v2937_v0 = vld [vmem:[%s4727_s9 + $0x68] sm:$0xff] }
 0x521   :  { %v1878_v55 = vpop.f32.mrf.mxu2 }
 0x522   :  { %v1879_v8 = vadd.f32 %v1878_v55, %v4362_v18  ;;  %v2935_v55 = vld [vmem:[%s4727_s9 + $0x50] sm:$0xff] }
 0x523   :  { %2030 = vperm.xlu1 %2910, %v2935_v55   ;;  %2042 = vperm.xlu2 %2908, %v2937_v0  }
 0x524   :  { %v1943_v52 = vmul.f32 %v4370_v45, %v1879_v8  ;;  %vm1926_vm6 = vcmp.ge.f32.partialorder %v1879_v8, 0.0 }
 0x526   :  { %2745 = vmatmul.msk.bf16.gmra.mxu3 %vm227_vm1, %v2856_v3  ;;  %v1959_v35 = vsel %vm1926_vm6, %v1879_v8, %v1943_v52  ;;  %v4458_v8 = vld [vmem:[%s4724_s6 + $0x30] sm:$0xff] }
 0x527   :  { %v1969_v3 = vpack.c.bf16 %v1959_v35, %v1957_v9 }
 0x529   :  { %v1881_v54 = vpop.f32.mrf.mxu2 }
 0x52a   :  { %v1882_v5 = vadd.f32 %v1881_v54, %v4358_v25 }
 0x52b   :  { %2034 = vperm.xlu2 %2908, %v2940_v50  }
 0x52c   :  { %v1945_v11 = vmul.f32 %v4370_v45, %v1882_v5  ;;  %vm1928_vm4 = vcmp.ge.f32.partialorder %v1882_v5, 0.0 }
 0x52e   :  { %v1961_v4 = vsel %vm1928_vm4, %v1882_v5, %v1945_v11  ;;  %v2936_v5 = vld [vmem:[%s4727_s9 + $0x40] sm:$0xff]  ;;  %v2938_v11 = vld [vmem:[%s4727_s9 + $0x48] sm:$0xff] }
 0x52f   :  { %2022 = vperm.xlu0 %2909, %v2936_v5   ;;  %2026 = vperm.xlu1 %2910, %v2938_v11  }
 0x531   :  { %v1883_v17 = vpop.f32.mrf.mxu2 }
 0x532   :  { %v1884_v22 = vadd.f32 %v1883_v17, %v4367_v57  ;;  %v2939_v17 = vld [vmem:[%s4727_s9 + $0x38] sm:$0xff] }
 0x534   :  { %vm1930_vm7 = vcmp.ge.f32.partialorder %v1884_v22, 0.0  ;;  %v1947_v14 = vmul.f32 %v4370_v45, %v1884_v22 }
 0x536   :  { %v1963_v7 = vsel %vm1930_vm7, %v1884_v22, %v1947_v14  ;;  %v2941_v22 = vld [vmem:[%s4727_s9 + $0x20] sm:$0xff]  ;;  %v2942_v14 = vld [vmem:[%s4727_s9 + $0x10] sm:$0xff] }
 0x537   :  { %v1971_v31 = vpack.c.bf16 %v1963_v7, %v1961_v4  ;;  %2018 = vperm.xlu0 %2909, %v2939_v17   ;;  %2006 = vperm.xlu1 %2910, %v2941_v22  }
 0x539   :  { %2122 = vmatpush.bf16.msrb.mxu2 %v1971_v31 }
 0x53d   :  { %2123 = vmatpush.bf16.msrb.mxu2 %v1969_v3 }
 0x53f   :  { %1998 = vperm.xlu0 %2909, %v2942_v14   ;;  %2002 = vperm.xlu1 %2910, %v2944_v36  }
 0x541   :  { %2124 = vmatpush.bf16.msrb.mxu2 %v1967_v29 }
 0x545   :  { %2125 = vmatpush.bf16.msrb.mxu2 %v1965_v47 }
 0x548   :  { %2779 = vmatmul.msk.bf16.vlgmr.msrb.gmra.mxu2 %vm2093_vm12, %v4396_v33 }
 0x558   :  { %2780 = vmatmul.msk.bf16.gmra.mxu2 %vm2093_vm12, %v4403_v37 }
 0x568   :  { %2781 = vmatmul.msk.bf16.gmra.mxu2 %vm2093_vm12, %v4410_v32 }
 0x578   :  { %2782 = vmatmul.msk.bf16.gmra.mxu2 %vm2093_vm12, %v4417_v56 }
 0x579   :  { %v4421_v60 = vpop.f32.mrf.mxu3 }
 0x581   :  { %v1897_v20 = vpop.f32.mrf.mxu3 }
 0x588   :  { %2783 = vmatmul.msk.bf16.gmra.mxu2 %vm2093_vm12, %v4426_v38 }
 0x589   :  { %v1900_v43 = vpop.f32.mrf.mxu3 }
 0x58a   :  { %v4542_v17 = vpop.permute.xlu0 %2050  ;;  %v4552_v22 = vpop.permute.xlu1 %2038 }
 0x591   :  { %v1902_v26 = vpop.f32.mrf.mxu3 }
 0x598   :  { %2784 = vmatmul.msk.bf16.gmra.mxu2 %vm2093_vm12, %v4433_v44 }
 0x599   :  { %v1905_v19 = vpop.f32.mrf.mxu3 }
 0x59a   :  { %v1906_v46 = vadd.f32 %v1905_v19, %v4360_v27  ;;  %v4491_v27 = vld [vmem:[%s4724_s6 + $0x38] sm:$0xff]  ;;  %s2510_s6 = sshll.u32 %s4729_s11, 4  ;;  %s2511_s6 = int_to_ptr.hbm [resolvable:$true] %s2510_s6 }
 0x59c   :  { %v1942_v58 = vmul.f32 %v4370_v45, %v1906_v46  ;;  %vm1925_vm2 = vcmp.ge.f32.partialorder %v1906_v46, 0.0 }
 0x59e   :  { %v1958_v29 = vsel %vm1925_vm2, %v1906_v46, %v1942_v58  ;;  %v4558_v46 = vpop.permute.xlu1 %2030 }
 0x5a1   :  { %v1907_v54 = vpop.f32.mrf.mxu3 }
 0x5a2   :  { %v1908_v52 = vadd.f32 %v1907_v54, %v4362_v18  ;;  %v1903_v18 = vadd.f32 %v1902_v26, %v4374_v48  ;;  %v1898_v48 = vadd.f32 %v1897_v20, %v4384_v23  ;;  %v1896_v23 = vadd.f32 %v4421_v60, %v4382_v28 }
 0x5a4   :  { %v1944_v7 = vmul.f32 %v4370_v45, %v1908_v52  ;;  %vm1927_vm15 = vcmp.ge.f32.partialorder %v1908_v52, 0.0  ;;  %v1940_v41 = vmul.f32 %v4370_v45, %v1903_v18  ;;  %vm1923_vm3 = vcmp.ge.f32.partialorder %v1903_v18, 0.0 }
 0x5a5   :  { %v1936_v47 = vmul.f32 %v4370_v45, %v1898_v48  ;;  %vm1919_vm5 = vcmp.ge.f32.partialorder %v1898_v48, 0.0  ;;  %vm1917_vm6 = vcmp.ge.f32.partialorder %v1896_v23, 0.0 }
 0x5a6   :  { %v1960_v62 = vsel %vm1927_vm15, %v1908_v52, %v1944_v7  ;;  %v1956_v20 = vsel %vm1923_vm3, %v1903_v18, %v1940_v41 }
 0x5a7   :  { %v1970_v63 = vpack.c.bf16 %v1960_v62, %v1958_v29  ;;  %v1952_v60 = vsel %vm1919_vm5, %v1898_v48, %v1936_v47 }
 0x5a8   :  { %2785 = vmatmul.msk.bf16.gmra.mxu2 %vm2093_vm12, %v4458_v8 }
 0x5a9   :  { %v1910_v39 = vpop.f32.mrf.mxu3 }
 0x5aa   :  { %v1911_v53 = vadd.f32 %v1910_v39, %v4358_v25  ;;  %v2943_v25 = vld [vmem:[%s4727_s9 + $0x30] sm:$0xff]  ;;  %v4538_v39 = vpop.permute.xlu2 %2046 }
 0x5ab   :  { %2014 = vperm.xlu2 %2908, %v2943_v25  }
 0x5ac   :  { %v1946_v15 = vmul.f32 %v4370_v45, %v1911_v53  ;;  %vm1929_vm13 = vcmp.ge.f32.partialorder %v1911_v53, 0.0 }
 0x5ae   :  { %v1962_v35 = vsel %vm1929_vm13, %v1911_v53, %v1946_v15 }
 0x5b1   :  { %v1912_v4 = vpop.f32.mrf.mxu3 }
 0x5b2   :  { %v1913_v9 = vadd.f32 %v1912_v4, %v4367_v57  ;;  %v1901_v57 = vadd.f32 %v1900_v43, %v4365_v42  ;;  %v2945_v42 = vld [vmem:[%s4727_s9 + $0x8] sm:$0xff]  ;;  %v1934_v43 = vmul.f32 %v4370_v45, %v1896_v23  ;;  %v4544_v50 = vpop.permute.xlu2 %2042 }
 0x5b3   :  { %1994 = vperm.xlu0 %2909, %v2945_v42   ;;  %2010 = vperm.xlu2 %2908, %v2946_v34  }
 0x5b4   :  { %vm1931_vm14 = vcmp.ge.f32.partialorder %v1913_v9, 0.0  ;;  %v1948_v49 = vmul.f32 %v4370_v45, %v1913_v9  ;;  %v1938_v21 = vmul.f32 %v4370_v45, %v1901_v57  ;;  %vm1921_vm4 = vcmp.ge.f32.partialorder %v1901_v57, 0.0 }
 0x5b5   :  { %v1950_v59 = vsel %vm1917_vm6, %v1896_v23, %v1934_v43 }
 0x5b6   :  { %v1964_v31 = vsel %vm1931_vm14, %v1913_v9, %v1948_v49  ;;  %v1954_v26 = vsel %vm1921_vm4, %v1901_v57, %v1938_v21  ;;  %v1966_v19 = vpack.c.bf16 %v1952_v60, %v1950_v59 }
 0x5b7   :  { %v1972_v3 = vpack.c.bf16 %v1964_v31, %v1962_v35  ;;  %v1968_v28 = vpack.c.bf16 %v1956_v20, %v1954_v26  ;;  %v4575_v31 = vpop.permute.xlu1 %2026 }
 0x5b8   :  { %2786 = vmatmul.msk.bf16.gmra.mxu2 %vm2093_vm12, %v4491_v27 }
 0x5b9   :  { %2171 = vmatpush.bf16.msrb.mxu3 %v1972_v3 }
 0x5ba   :  { %v4550_v52 = vpop.permute.xlu2 %2034 }
 0x5bb   :  { %1990 = vperm.xlu2 %2908, %v2947_v12  }
 0x5bd   :  { %2172 = vmatpush.bf16.msrb.mxu3 %v1970_v63 }
 0x5c1   :  { %2173 = vmatpush.bf16.msrb.mxu3 %v1968_v28 }
 0x5c5   :  { %2174 = vmatpush.bf16.msrb.mxu3 %v1966_v19 }
 0x5c8   :  { %2787 = vmatmul.msk.bf16.vlgmr.msrb.gmra.mxu3 %vm2093_vm12, %v4396_v33 }
 0x5cb   :  { %v4518_v16 = vpop.f32.mrf.mxu2 }
 0x5d3   :  { %v4520_v10 = vpop.f32.mrf.mxu2 }
 0x5d8   :  { %2788 = vmatmul.msk.bf16.gmra.mxu3 %vm2093_vm12, %v4403_v37 }
 0x5db   :  { %v4524_v45 = vpop.f32.mrf.mxu2 }
 0x5e3   :  { %v4526_v55 = vpop.f32.mrf.mxu2 }
 0x5e8   :  { %2789 = vmatmul.msk.bf16.gmra.mxu3 %vm2093_vm12, %v4410_v32 }
 0x5eb   :  { %v4530_v54 = vpop.f32.mrf.mxu2 }
 0x5f3   :  { %v4532_v5 = vpop.f32.mrf.mxu2 }
 0x5f8   :  { %2790 = vmatmul.msk.bf16.gmra.mxu3 %vm2093_vm12, %v4417_v56  ;;  %v4548_v56 = vpop.permute.xlu0 %2022 }
 0x5fb   :  { %v2142_v33 = vpop.f32.mrf.mxu2 }
 0x600   :  { %v4554_v14 = vpop.permute.xlu0 %2018 }
 0x603   :  { %v2144_v0 = vpop.f32.mrf.mxu2 }
 0x604   :  { %v2145_v15 = vadd.f32 %v2144_v0, %v4554_v14 }
 0x606   :  { %vm2231_vm7 = vcmp.ge.f32.partialorder %v2145_v15, 0.0 }
 0x608   :  { %2791 = vmatmul.msk.bf16.gmra.mxu3 %vm2093_vm12, %v4426_v38  ;;  %v1999_v12 = vpop.permute.xlu0 %1998 }
 0x60b   :  { %v2147_v37 = vpop.f32.mrf.mxu2 }
 0x60c   :  { %v2148_v20 = vadd.f32 %v2147_v37, %v4548_v56 }
 0x60e   :  { %vm2233_vm15 = vcmp.ge.f32.partialorder %v2148_v20, 0.0 }
 0x613   :  { %v2149_v11 = vpop.f32.mrf.mxu2 }
 0x614   :  { %v2150_v28 = vadd.f32 %v2149_v11, %v4575_v31 }
 0x616   :  { %vm2235_vm2 = vcmp.ge.f32.partialorder %v2150_v28, 0.0 }
 0x618   :  { %2792 = vmatmul.msk.bf16.gmra.mxu3 %vm2093_vm12, %v4433_v44  ;;  %v4556_v44 = vpop.permute.xlu2 %2014 }
 0x619   :  { %v2143_v9 = vadd.f32 %v2142_v33, %v4556_v44  ;;  %v4592_v33 = vpop.permute.xlu1 %2006 }
 0x61b   :  { %v2152_v32 = vpop.f32.mrf.mxu2  ;;  %vm2229_vm8 = vcmp.ge.f32.partialorder %v2143_v9, 0.0 }
 0x61c   :  { %v2153_v41 = vadd.f32 %v2152_v32, %v4558_v46 }
 0x61e   :  { %vm2237_vm13 = vcmp.ge.f32.partialorder %v2153_v41, 0.0 }
 0x620   :  { %v4585_v29 = vpop.permute.xlu2 %2010 }
 0x623   :  { %v2154_v53 = vpop.f32.mrf.mxu2 }
 0x624   :  { %v2155_v36 = vadd.f32 %v2154_v53, %v4550_v52 }
 0x626   :  { %vm2239_vm14 = vcmp.ge.f32.partialorder %v2155_v36, 0.0 }
 0x628   :  { %2793 = vmatmul.msk.bf16.gmra.mxu3 %vm2093_vm12, %v4458_v8  ;;  %v4562_v8 = vstv %s2795_s24 }
 0x629   :  { %v2264_v25 = vmul.f32 %v4562_v8, %v2145_v15  ;;  %v2262_v18 = vmul.f32 %v4562_v8, %v2143_v9  ;;  %v2270_v47 = vmul.f32 %v4562_v8, %v2153_v41  ;;  %v2272_v43 = vmul.f32 %v4562_v8, %v2155_v36 }
 0x62a   :  { %v2266_v32 = vmul.f32 %v4562_v8, %v2148_v20  ;;  %v2268_v37 = vmul.f32 %v4562_v8, %v2150_v28 }
 0x62b   :  { %v2157_v38 = vpop.f32.mrf.mxu2  ;;  %v4568_v7 = vsel %vm2229_vm8, %v2143_v9, %v2262_v18  ;;  %v4570_v49 = vsel %vm2231_vm7, %v2145_v15, %v2264_v25  ;;  %v1991_v9 = vpop.permute.xlu2 %1990  ;;  %v2138_v25 = vadd.f32 %v4530_v54, %v4592_v33  ;;  %v2140_v18 = vadd.f32 %v4532_v5, %v4585_v29 }
 0x62c   :  { %v2320_v58 = vpack.c.bf16 %v4570_v49, %v4568_v7  ;;  %v2158_v3 = vadd.f32 %v2157_v38, %v4552_v22  ;;  %v2302_v38 = vsel %vm2237_vm13, %v2153_v41, %v2270_v47  ;;  %v2298_v15 = vsel %vm2233_vm15, %v2148_v20, %v2266_v32 }
 0x62d   :  { %v2258_v41 = vmul.f32 %v4562_v8, %v2138_v25  ;;  %vm2225_vm3 = vcmp.ge.f32.partialorder %v2138_v25, 0.0  ;;  %vm2227_vm4 = vcmp.ge.f32.partialorder %v2140_v18, 0.0  ;;  %v2133_v54 = vadd.f32 %v4524_v45, %v1999_v12 }
 0x62e   :  { %v2274_v42 = vmul.f32 %v4562_v8, %v2158_v3  ;;  %vm2241_vm10 = vcmp.ge.f32.partialorder %v2158_v3, 0.0 }
 0x62f   :  { %vm2221_vm7 = vcmp.ge.f32.partialorder %v2133_v54, 0.0 }
 0x630   :  { %v2306_v60 = vsel %vm2241_vm10, %v2158_v3, %v2274_v42  ;;  %v1995_v3 = vpop.permute.xlu0 %1994 }
 0x631   :  { %v2130_v45 = vadd.f32 %v4520_v10, %v1995_v3 }
 0x633   :  { %v2159_v4 = vpop.f32.mrf.mxu2 }
 0x634   :  { %v2160_v48 = vadd.f32 %v2159_v4, %v4544_v50  ;;  %v2304_v4 = vsel %vm2239_vm14, %v2155_v36, %v2272_v43  ;;  %v2260_v36 = vmul.f32 %v4562_v8, %v2140_v18 }
 0x635   :  { %v2324_v11 = vpack.c.bf16 %v2304_v4, %v2302_v38 }
 0x636   :  { %v2276_v23 = vmul.f32 %v4562_v8, %v2160_v48  ;;  %vm2243_vm11 = vcmp.ge.f32.partialorder %v2160_v48, 0.0 }
 0x638   :  { %2794 = vmatmul.msk.bf16.gmra.mxu3 %vm2093_vm12, %v4491_v27  ;;  %v2308_v59 = vsel %vm2243_vm11, %v2160_v48, %v2276_v23 }
 0x639   :  { %v2326_v53 = vpack.c.bf16 %v2308_v59, %v2306_v60 }
 0x63b   :  { %v2162_v57 = vpop.f32.mrf.mxu2 }
 0x63c   :  { %v2163_v35 = vadd.f32 %v2162_v57, %v4538_v39  ;;  %v2300_v57 = vsel %vm2235_vm2, %v2150_v28, %v2268_v37 }
 0x63e   :  { %v2278_v27 = vmul.f32 %v4562_v8, %v2163_v35  ;;  %vm2245_vm9 = vcmp.ge.f32.partialorder %v2163_v35, 0.0 }
 0x640   :  { %v2310_v34 = vsel %vm2245_vm9, %v2163_v35, %v2278_v27  ;;  %v2322_v27 = vpack.c.bf16 %v2300_v57, %v2298_v15  ;;  %vm2219_vm9 = vcmp.ge.f32.partialorder %v2130_v45, 0.0 }
 0x643   :  { %v2164_v62 = vpop.f32.mrf.mxu2 }
 0x644   :  { %v2165_v21 = vadd.f32 %v2164_v62, %v4542_v17  ;;  %v2003_v62 = vpop.permute.xlu1 %2002 }
 0x645   :  { %v2135_v5 = vadd.f32 %v4526_v55, %v2003_v62  ;;  %v2128_v55 = vadd.f32 %v4518_v16, %v1991_v9 }
 0x646   :  { %vm2247_vm12 = vcmp.ge.f32.partialorder %v2165_v21, 0.0  ;;  %v2280_v63 = vmul.f32 %v4562_v8, %v2165_v21 }
 0x647   :  { %v2256_v28 = vmul.f32 %v4562_v8, %v2135_v5  ;;  %vm2223_vm8 = vcmp.ge.f32.partialorder %v2135_v5, 0.0  ;;  %v2250_v32 = vmul.f32 %v4562_v8, %v2128_v55  ;;  %vm2217_vm10 = vcmp.ge.f32.partialorder %v2128_v55, 0.0 }
 0x648   :  { %v2312_v26 = vsel %vm2247_vm12, %v2165_v21, %v2280_v63  ;;  %v2292_v63 = vsel %vm2227_vm4, %v2140_v18, %v2260_v36 }
 0x649   :  { %v2328_v19 = vpack.c.bf16 %v2312_v26, %v2310_v34  ;;  %v2290_v34 = vsel %vm2225_vm3, %v2138_v25, %v2258_v41  ;;  %v2254_v26 = vmul.f32 %v4562_v8, %v2133_v54  ;;  %v2288_v37 = vsel %vm2223_vm8, %v2135_v5, %v2256_v28 }
 0x64a   :  { %v2318_v59 = vpack.c.bf16 %v2292_v63, %v2290_v34  ;;  %v2282_v16 = vsel %vm2217_vm10, %v2128_v55, %v2250_v32 }
 0x64b   :  { %v2176_v0 = vpop.f32.mrf.mxu3  ;;  %2362 = vmatpush.bf16.msra.mxu0 %v2328_v19 }
 0x64c   :  { %v2177_v35 = vadd.f32 %v2176_v0, %v1991_v9  ;;  %v2252_v0 = vmul.f32 %v4562_v8, %v2130_v45 }
 0x64e   :  { %v2251_v23 = vmul.f32 %v4562_v8, %v2177_v35  ;;  %vm2218_vm5 = vcmp.ge.f32.partialorder %v2177_v35, 0.0  ;;  %v2284_v38 = vsel %vm2219_vm9, %v2130_v45, %v2252_v0 }
 0x64f   :  { %2363 = vmatpush.bf16.msra.mxu0 %v2326_v53  ;;  %v2286_v53 = vsel %vm2221_vm7, %v2133_v54, %v2254_v26  ;;  %v2314_v49 = vpack.c.bf16 %v2284_v38, %v2282_v16 }
 0x650   :  { %v4606_v47 = vsel %vm2218_vm5, %v2177_v35, %v2251_v23  ;;  %v2316_v10 = vpack.c.bf16 %v2288_v37, %v2286_v53 }
 0x653   :  { %v2178_v48 = vpop.f32.mrf.mxu3  ;;  %2364 = vmatpush.bf16.msra.mxu0 %v2324_v11 }
 0x654   :  { %v2179_v42 = vadd.f32 %v2178_v48, %v1995_v3 }
 0x656   :  { %vm2220_vm6 = vcmp.ge.f32.partialorder %v2179_v42, 0.0  ;;  %v2253_v21 = vmul.f32 %v4562_v8, %v2179_v42 }
 0x657   :  { %2365 = vmatpush.bf16.msra.mxu0 %v2322_v27 }
 0x658   :  { %v4608_v20 = vsel %vm2220_vm6, %v2179_v42, %v2253_v21 }
 0x659   :  { %v2315_v43 = vpack.c.bf16 %v4608_v20, %v4606_v47 }
 0x65b   :  { %v2181_v60 = vpop.f32.mrf.mxu3  ;;  %2366 = vmatpush.bf16.msra.mxu0 %v2320_v58 }
 0x65c   :  { %v2182_v19 = vadd.f32 %v2181_v60, %v1999_v12  ;;  %v2865_v60 = vld [vmem:[%s4725_s7] sm:$0xff] }
 0x65e   :  { %v2255_v11 = vmul.f32 %v4562_v8, %v2182_v19  ;;  %vm2222_vm11 = vcmp.ge.f32.partialorder %v2182_v19, 0.0 }
 0x65f   :  { %2367 = vmatpush.bf16.msra.mxu0 %v2318_v59 }
 0x660   :  { %v4623_v12 = vsel %vm2222_vm11, %v2182_v19, %v2255_v11 }
 0x663   :  { %v2183_v4 = vpop.f32.mrf.mxu3  ;;  %2368 = vmatpush.bf16.msra.mxu0 %v2316_v10 }
 0x664   :  { %v2184_v7 = vadd.f32 %v2183_v4, %v2003_v62 }
 0x666   :  { %vm2224_vm12 = vcmp.ge.f32.partialorder %v2184_v7, 0.0  ;;  %v2257_v58 = vmul.f32 %v4562_v8, %v2184_v7 }
 0x667   :  { %2369 = vmatpush.bf16.msra.mxu0 %v2314_v49 }
 0x668   :  { %v4625_v15 = vsel %vm2224_vm12, %v2184_v7, %v2257_v58  ;;  %v2866_v58 = vld [vmem:[%s4725_s7 + $0x8] sm:$0x10] }
 0x669   :  { %v2317_v9 = vpack.c.bf16 %v4625_v15, %v4623_v12  ;;  %v2409_v15 = vstv %s2804_s0 }
 0x66a   :  { %2370 = vmatmul.bf16.vlgmr.msra.gmra.mxu0 %v2865_v60 }
 0x66b   :  { %v2186_v25 = vpop.f32.mrf.mxu3 }
 0x66c   :  { %v2187_v18 = vadd.f32 %v2186_v25, %v4592_v33 }
 0x66e   :  { %v2259_v35 = vmul.f32 %v4562_v8, %v2187_v18  ;;  %vm2226_vm13 = vcmp.ge.f32.partialorder %v2187_v18, 0.0 }
 0x670   :  { %v4633_v27 = vsel %vm2226_vm13, %v2187_v18, %v2259_v35  ;;  %v2948_v35 = vld [vmem:[%s4727_s9 + $0x10] sm:$0xff] }
 0x673   :  { %v2188_v57 = vpop.f32.mrf.mxu3 }
 0x674   :  { %v2189_v3 = vadd.f32 %v2188_v57, %v4585_v29 }
 0x676   :  { %vm2228_vm14 = vcmp.ge.f32.partialorder %v2189_v3, 0.0  ;;  %v2261_v48 = vmul.f32 %v4562_v8, %v2189_v3 }
 0x678   :  { %v4635_v62 = vsel %vm2228_vm14, %v2189_v3, %v2261_v48 }
 0x679   :  { %v2319_v41 = vpack.c.bf16 %v4635_v62, %v4633_v27  ;;  %v2451_v27 = vld [vmem:[%s4727_s9] sm:$0x1]  ;;  %v2999_v62 = vmov 7  }
 0x67b   :  { %v2191_v36 = vpop.f32.mrf.mxu3 }
 0x67c   :  { %v2192_v42 = vadd.f32 %v2191_v36, %v4556_v44 }
 0x67e   :  { %v2263_v54 = vmul.f32 %v4562_v8, %v2192_v42  ;;  %vm2230_vm15 = vcmp.ge.f32.partialorder %v2192_v42, 0.0 }
 0x680   :  { %v4643_v5 = vsel %vm2230_vm15, %v2192_v42, %v2263_v54 }
 0x683   :  { %v2193_v33 = vpop.f32.mrf.mxu3 }
 0x684   :  { %v2194_v23 = vadd.f32 %v2193_v33, %v4554_v14 }
 0x686   :  { %vm2232_vm2 = vcmp.ge.f32.partialorder %v2194_v23, 0.0  ;;  %v2265_v29 = vmul.f32 %v4562_v8, %v2194_v23 }
 0x688   :  { %v4645_v21 = vsel %vm2232_vm2, %v2194_v23, %v2265_v29 }
 0x689   :  { %v2321_v34 = vpack.c.bf16 %v4645_v21, %v4643_v5 }
 0x68b   :  { %v2196_v63 = vpop.f32.mrf.mxu3 }
 0x68c   :  { %v2197_v25 = vadd.f32 %v2196_v63, %v4548_v56  ;;  %v2949_v56 = vld [vmem:[%s4727_s9 + $0x18] sm:$0x3]  ;;  %v2950_v63 = vld [vmem:[%s4727_s9 + $0x8] sm:$0xff] }
 0x68e   :  { %vm2234_vm10 = vcmp.ge.f32.partialorder %v2197_v25, 0.0 }
 0x693   :  { %v2198_v26 = vpop.f32.mrf.mxu3 }
 0x694   :  { %v2199_v7 = vadd.f32 %v2198_v26, %v4575_v31 }
 0x696   :  { %v2269_v48 = vmul.f32 %v4562_v8, %v2199_v7  ;;  %vm2236_vm9 = vcmp.ge.f32.partialorder %v2199_v7, 0.0 }
 0x698   :  { %v2301_v23 = vsel %vm2236_vm9, %v2199_v7, %v2269_v48 }
 0x69b   :  { %v2201_v28 = vpop.f32.mrf.mxu3 }
 0x6a3   :  { %v2203_v44 = vpop.f32.mrf.mxu3 }
 0x6a4   :  { %v2204_v10 = vadd.f32 %v2203_v44, %v4550_v52  ;;  %v2802_v52 = vld [vmem:[%s4725_s7 + $0x8] sm:$0xf] }
 0x6a5   :  { %v2803_v3 = vor.u32 %v2866_v58, %v2802_v52 }
 0x6a6   :  { %vm2240_vm7 = vcmp.ge.f32.partialorder %v2204_v10, 0.0 }
 0x6a7   :  { %2375 = vmatmul.bf16.gmra.mxu0 %v2803_v3 }
 0x6ab   :  { %v2206_v45 = vpop.f32.mrf.mxu3 }
 0x6ac   :  { %v2207_v32 = vadd.f32 %v2206_v45, %v4552_v22 }
 0x6ae   :  { %vm2242_vm6 = vcmp.ge.f32.partialorder %v2207_v32, 0.0 }
 0x6b3   :  { %v2208_v55 = vpop.f32.mrf.mxu3 }
 0x6b4   :  { %v2209_v19 = vadd.f32 %v2208_v55, %v4544_v50  ;;  %v2275_v50 = vmul.f32 %v4562_v8, %v2207_v32 }
 0x6b6   :  { %v2277_v16 = vmul.f32 %v4562_v8, %v2209_v19  ;;  %vm2244_vm5 = vcmp.ge.f32.partialorder %v2209_v19, 0.0  ;;  %v2307_v31 = vsel %vm2242_vm6, %v2207_v32, %v2275_v50 }
 0x6b8   :  { %v2309_v49 = vsel %vm2244_vm5, %v2209_v19, %v2277_v16 }
 0x6b9   :  { %v2327_v57 = vpack.c.bf16 %v2309_v49, %v2307_v31 }
 0x6bb   :  { %v2211_v14 = vpop.f32.mrf.mxu3 }
 0x6bc   :  { %v2212_v59 = vadd.f32 %v2211_v14, %v4538_v39  ;;  %v2202_v39 = vadd.f32 %v2201_v28, %v4558_v46  ;;  %v2998_v46 = vmov 6  }
 0x6bd   :  { %2913 = vset.pattern.permute.xlu0 %v2998_v46  ;;  %2911 = vset.pattern.permute.xlu1 %v2998_v46 }
 0x6be   :  { %v2279_v53 = vmul.f32 %v4562_v8, %v2212_v59  ;;  %vm2246_vm3 = vcmp.ge.f32.partialorder %v2212_v59, 0.0  ;;  %v2271_v18 = vmul.f32 %v4562_v8, %v2202_v39  ;;  %2335 = vperm.xlu0 %2913, %v4251_v30   ;;  %vm2238_vm8 = vcmp.ge.f32.partialorder %v2202_v39, 0.0  ;;  %2343 = vperm.xlu1 %2911, %v2948_v35  }
 0x6bf   :  { %2912 = vset.pattern.permute.xlu2 %v2998_v46  ;;  %v2267_v30 = vmul.f32 %v4562_v8, %v2197_v25 }
 0x6c0   :  { %v2311_v4 = vsel %vm2246_vm3, %v2212_v59, %v2279_v53  ;;  %2347 = vperm.xlu2 %2912, %v2949_v56   ;;  %v2303_v42 = vsel %vm2238_vm8, %v2202_v39, %v2271_v18 }
 0x6c1   :  { %v2299_v54 = vsel %vm2234_vm10, %v2197_v25, %v2267_v30 }
 0x6c2   :  { %v2323_v29 = vpack.c.bf16 %v2301_v23, %v2299_v54 }
 0x6c3   :  { %v2213_v0 = vpop.f32.mrf.mxu3 }
 0x6c4   :  { %v2214_v37 = vadd.f32 %v2213_v0, %v4542_v17  ;;  %v2273_v17 = vmul.f32 %v4562_v8, %v2204_v10 }
 0x6c6   :  { %vm2248_vm4 = vcmp.ge.f32.partialorder %v2214_v37, 0.0  ;;  %v2281_v38 = vmul.f32 %v4562_v8, %v2214_v37  ;;  %v2305_v36 = vsel %vm2240_vm7, %v2204_v10, %v2273_v17  ;;  %2339 = vperm.xlu1 %2911, %v2950_v63   ;;  %2915 = vset.pattern.permute.xlu0 %v2999_v62 }
 0x6c7   :  { %v2325_v33 = vpack.c.bf16 %v2305_v36, %v2303_v42 }
 0x6c8   :  { %v2313_v11 = vsel %vm2248_vm4, %v2214_v37, %v2281_v38  ;;  %2914 = vset.pattern.permute.xlu2 %v2999_v62 }
 0x6c9   :  { %v2329_v22 = vpack.c.bf16 %v2313_v11, %v2311_v4  ;;  %2454 = vperm.xlu2 %2914, %v2451_v27  }
 0x6cb   :  { %2381 = vmatpush.bf16.msra.mxu1 %v2329_v22 }
 0x6cf   :  { %2382 = vmatpush.bf16.msra.mxu1 %v2327_v57 }
 0x6d3   :  { %2383 = vmatpush.bf16.msra.mxu1 %v2325_v33 }
 0x6d7   :  { %2384 = vmatpush.bf16.msra.mxu1 %v2323_v29 }
 0x6db   :  { %2385 = vmatpush.bf16.msra.mxu1 %v2321_v34 }
 0x6df   :  { %2386 = vmatpush.bf16.msra.mxu1 %v2319_v41 }
 0x6e3   :  { %2387 = vmatpush.bf16.msra.mxu1 %v2317_v9 }
 0x6e7   :  { %2388 = vmatpush.bf16.msra.mxu1 %v2315_v43  ;;  %v2371_v8 = vpop.f32.mrf.mxu0 }
 0x6ea   :  { %2389 = vmatmul.bf16.vlgmr.msra.gmra.mxu1 %v2865_v60 }
 0x6ef   :  { %v2373_v26 = vpop.f32.mrf.mxu0 }
 0x6fa   :  { %2394 = vmatmul.bf16.gmra.mxu1 %v2803_v3 }
 0x71a   :  { %v2348_v41 = vpop.permute.xlu2 %2347 }
 0x724   :  { %v2376_v21 = vpop.f32.mrf.mxu0 }
 0x72c   :  { %v2378_v34 = vpop.f32.mrf.mxu0 }
 0x72d   :  { %v2379_v19 = vadd.f32 %v2378_v34, %v2348_v41 }
 0x72f   :  { %v2416_v39 = vmul.f32 %v2409_v15, %v2379_v19  ;;  %vm2407_vm2 = vcmp.ge.f32.partialorder %v2379_v19, 0.0 }
 0x730   :  { %v2344_v44 = vpop.permute.xlu1 %2343  ;;  %v2336_v45 = vpop.permute.xlu0 %2335 }
 0x731   :  { %v2377_v20 = vadd.f32 %v2376_v21, %v2344_v44  ;;  %v2372_v0 = vadd.f32 %v2371_v8, %v2336_v45  ;;  %v2424_v58 = vsel %vm2407_vm2, %v2379_v19, %v2416_v39  ;;  %v2498_v21 = vlaneseq }
 0x733   :  { %v2414_v59 = vmul.f32 %v2409_v15, %v2377_v20  ;;  %vm2405_vm12 = vcmp.ge.f32.partialorder %v2377_v20, 0.0  ;;  %v2410_v4 = vmul.f32 %v2409_v15, %v2372_v0  ;;  %vm2401_vm3 = vcmp.ge.f32.partialorder %v2372_v0, 0.0 }
 0x734   :  { %vm2500_vm5 = vcmp.lt.s32.totalorder %v2498_v21, 256 }
 0x735   :  { %v2422_v38 = vsel %vm2405_vm12, %v2377_v20, %v2414_v59  ;;  %v2418_v25 = vsel %vm2401_vm3, %v2372_v0, %v2410_v4 }
 0x738   :  { %v2340_v47 = vpop.permute.xlu1 %2339 }
 0x739   :  { %v2374_v60 = vadd.f32 %v2373_v26, %v2340_v47 }
 0x73b   :  { %vm2403_vm14 = vcmp.ge.f32.partialorder %v2374_v60, 0.0  ;;  %v2412_v10 = vmul.f32 %v2409_v15, %v2374_v60 }
 0x73d   :  { %v2420_v49 = vsel %vm2403_vm14, %v2374_v60, %v2412_v10 }
 0x767   :  { %v2390_v28 = vpop.f32.mrf.mxu1 }
 0x768   :  { %v2391_v14 = vadd.f32 %v2390_v28, %v2336_v45 }
 0x76a   :  { %v2411_v37 = vmul.f32 %v2409_v15, %v2391_v14  ;;  %vm2402_vm15 = vcmp.ge.f32.partialorder %v2391_v14, 0.0 }
 0x76c   :  { %v2419_v17 = vsel %vm2402_vm15, %v2391_v14, %v2411_v37 }
 0x76d   :  { %v2426_v35 = vpack.c.bf16 %v2419_v17, %v2418_v25 }
 0x76f   :  { %v2392_v5 = vpop.f32.mrf.mxu1  ;;  %v2430_v54 = vunpack.c.l.bf16 %v2426_v35  ;;  %v2431_v29 = vunpack.c.h.bf16 %v2426_v35 }
 0x770   :  { %v2393_v9 = vadd.f32 %v2392_v5, %v2340_v47 }
 0x772   :  { %v2413_v32 = vmul.f32 %v2409_v15, %v2393_v9  ;;  %vm2404_vm13 = vcmp.ge.f32.partialorder %v2393_v9, 0.0 }
 0x774   :  { %v2421_v11 = vsel %vm2404_vm13, %v2393_v9, %v2413_v32 }
 0x775   :  { %v2427_v52 = vpack.c.bf16 %v2421_v11, %v2420_v49 }
 0x777   :  { %v2395_v12 = vpop.f32.mrf.mxu1  ;;  %v2432_v36 = vunpack.c.l.bf16 %v2427_v52  ;;  %v2433_v56 = vunpack.c.h.bf16 %v2427_v52 }
 0x778   :  { %v2396_v43 = vadd.f32 %v2395_v12, %v2344_v44 }
 0x779   :  { %v2440_v26 = vadd.f32 %v2432_v36, %v4297_v24  ;;  %v2441_v28 = vadd.f32 %v2433_v56, %v4346_v40  ;;  %v2450_v24 = vld [vmem:[%s4726_s8] sm:$0x1]  ;;  %v2455_v40 = vpop.permute.xlu2 %2454 }
 0x77a   :  { %v2415_v55 = vmul.f32 %v2409_v15, %v2396_v43  ;;  %vm2406_vm11 = vcmp.ge.f32.partialorder %v2396_v43, 0.0 }
 0x77c   :  { %v2423_v53 = vsel %vm2406_vm11, %v2396_v43, %v2415_v55 }
 0x77d   :  { %v2428_v22 = vpack.c.bf16 %v2423_v53, %v2422_v38 }
 0x77f   :  { %v2397_v16 = vpop.f32.mrf.mxu1  ;;  %v2434_v18 = vunpack.c.l.bf16 %v2428_v22  ;;  %v2435_v31 = vunpack.c.h.bf16 %v2428_v22 }
 0x780   :  { %v2398_v50 = vadd.f32 %v2397_v16, %v2348_v41 }
 0x781   :  { %v2442_v30 = vadd.f32 %v2434_v18, %v4289_v1  ;;  %v2443_v33 = vadd.f32 %v2435_v31, %v4342_v2  ;;  %v2438_v1 = vadd.f32 %v2430_v54, %v4299_v6 }
 0x782   :  { %vm2408_vm4 = vcmp.ge.f32.partialorder %v2398_v50, 0.0  ;;  %v2417_v7 = vmul.f32 %v2409_v15, %v2398_v50 }
 0x783   :  { %v2446_v2 = vpack.c.bf16 %v2440_v26, %v2438_v1 }
 0x784   :  { %v2425_v46 = vsel %vm2408_vm4, %v2398_v50, %v2417_v7 }
 0x785   :  { %v2429_v57 = vpack.c.bf16 %v2425_v46, %v2424_v58 }
 0x787   :  { %v2436_v3 = vunpack.c.l.bf16 %v2429_v57  ;;  %v2437_v48 = vunpack.c.h.bf16 %v2429_v57 }
 0x789   :  { %v2444_v42 = vadd.f32 %v2436_v3, %v4302_v13  ;;  %v2445_v23 = vadd.f32 %v2437_v48, %v4344_v51  ;;  %v2439_v13 = vadd.f32 %v2431_v29, %v4350_v61 }
 0x78b   :  { %v2448_v63 = vpack.c.bf16 %v2444_v42, %v2442_v30  ;;  %v2449_v8 = vpack.c.bf16 %v2445_v23, %v2443_v33  ;;  %v2447_v51 = vpack.c.bf16 %v2441_v28, %v2439_v13 }
 0x78d   :  { %v2461_v44 = vsel %vm252_vm0, %v2448_v63, 0  ;;  %v2464_v5 = vsel %vm252_vm0, %v2449_v8, 0  ;;  %vm2495_vm0 = vcmask 1040384  }
 0x78e   :  { %2472 = vmatpush.bf16.msrb.mxu0 %v2461_v44  ;;  %2485 = vmatpush.bf16.msrb.mxu1 %v2464_v5 }
 0x792   :  { %2473 = vmatpush.bf16.msrb.mxu0 %v2446_v2  ;;  %2486 = vmatpush.bf16.msrb.mxu1 %v2447_v51 }
 0x795   :  { %2805 = vmatmul.msk.bf16.vlgmr.msrb.gmra.mxu0 %vm227_vm1, %v2450_v24  ;;  %2806 = vmatmul.msk.bf16.vlgmr.msrb.gmra.mxu1 %vm227_vm1, %v2450_v24 }
 0x812   :  { %v2475_v27 = vpop.f32.mrf.mxu0  ;;  %v2488_v62 = vpop.f32.mrf.mxu1 }
 0x813   :  { %v2489_v12 = vadd.f32 %v2488_v62, %v2455_v40  ;;  %v2476_v6 = vadd.f32 %v2475_v27, %v2455_v40 }
 0x815   :  { %v2494_v61 = vrot.slane %v2489_v12, 7 }
 0x817   :  { %v2496_v47 = vsel %vm2495_vm0, %v2476_v6, %v2494_v61 }
 0x818   :  { %2502 = vst.msk [vmem:[#allocation5] sm:$0x3] %vm2500_vm5, %v2496_v47 }
 0x819   :  { %2513 = dma.vmem_to_hbm [thread:$0]  %s2509_s16, 32, %s2511_s6, [#allocation3]  }
 0x81a   :  { %v2477_v20 = vpop.f32.mrf.mxu0  ;;  %v2490_v43 = vpop.f32.mrf.mxu1 }
 0x81b   :  { %2989 = dma.done.wait [#allocation3], 32  }
 0x81c   :  { %2990 = vsyncadd [#allocation3], 4294967264 }
 0x81d   :  { %2518 = vsyncpa [#allocation3], 1 }
 0x81e   :  { %2519 = vsyncpa [#allocation4], 1 }

</bundles_post_ra>
